<compile_context>
chip_gen: v7x
topology: tpu7x:2x2x1
jax: 0.10.0
libtpu: 0.0.40
codegen_flags: <defaults>
</compile_context>

<pallas_src>
import functools

import jax
import jax.numpy as jnp
from jax import lax
from jax.experimental import pallas as pl
from jax.experimental.pallas import tpu as pltpu

LANE = 128  # TPU lane width; channel dims are padded to a multiple of this.


def _round_up(x, m):
    return (x + m - 1) // m * m


# ----------------------------------------------------------------------------
# Fused Pallas kernel
# ----------------------------------------------------------------------------
def _shift_w(slab, kw, width):
    """win[:, j, :] = slab[:, j + kw - 1, :], zero-filled outside [0, width)."""
    if kw == 1:
        return slab
    col = lax.broadcasted_iota(jnp.int32, slab.shape, 1)
    if kw == 0:
        rolled = pltpu.roll(slab, shift=1, axis=1)             # slab[:, j-1, :]
        return jnp.where(col >= 1, rolled, jnp.zeros_like(rolled))
    rolled = pltpu.roll(slab, shift=width - 1, axis=1)          # slab[:, j+1, :]
    return jnp.where(col <= width - 2, rolled, jnp.zeros_like(rolled))


def _make_fused_kernel(H, W, Ho, Wo, cin_p, cout_p, stride, has_projection):
    def kernel(*refs):
        if has_projection:
            (x_ref, w1_ref, b1_ref, w2_ref, b2_ref, wr_ref, br_ref,
             o_ref, xpad_ref, h1pad_ref) = refs
        else:
            (x_ref, w1_ref, b1_ref, w2_ref, b2_ref,
             o_ref, xpad_ref, h1pad_ref) = refs

        # Zero-padded tiles in VMEM (border rows supply the conv "same" padding).
        xpad_ref[...] = jnp.zeros(xpad_ref.shape, xpad_ref.dtype)
        h1pad_ref[...] = jnp.zeros(h1pad_ref.shape, h1pad_ref.dtype)

        x = x_ref[...]                                          # (H, W, cin_p) bf16
        if stride == 1:
            xpad_ref[pl.ds(1, H), :, :] = x.astype(jnp.float32)
        else:
            # TODO(synk): stride > 1 path (strided sublane reads) is not exercised
            # by the self-test below, which uses stride == 1.
            xpad_ref[pl.ds(1, H), pl.ds(1, W), :] = x.astype(jnp.float32)

        # --- conv1: 3x3/stride, pad 1, BN1 scale folded into w1, + shift, ReLU ---
        acc = jnp.zeros((Ho * Wo, cout_p), jnp.float32)
        for kh in range(3):
            if stride == 1:
                slab = xpad_ref[pl.ds(kh, Ho), :, :]            # (Ho, W, cin_p) f32
            for kw in range(3):
                if stride == 1:
                    win = _shift_w(slab, kw, W)
                else:
                    win = xpad_ref[pl.ds(kh, Ho, stride), pl.ds(kw, Wo, stride), :]
                acc = acc + jnp.dot(
                    win.reshape(Ho * Wo, cin_p).astype(jnp.bfloat16),
                    w1_ref[kh * 3 + kw],
                    preferred_element_type=jnp.float32)
        h1 = jnp.maximum(acc + b1_ref[...], 0.0)                # (Ho*Wo, cout_p) f32
        h1pad_ref[pl.ds(1, Ho), :, :] = h1.reshape(Ho, Wo, cout_p)

        # --- conv2: 3x3/1, pad 1, BN2 scale folded into w2, + shift (no act) ------
        acc = jnp.zeros((Ho * Wo, cout_p), jnp.float32)
        for kh in range(3):
            slab = h1pad_ref[pl.ds(kh, Ho), :, :]               # (Ho, Wo, cout_p) f32
            for kw in range(3):
                win = _shift_w(slab, kw, Wo)
                acc = acc + jnp.dot(
                    win.reshape(Ho * Wo, cout_p).astype(jnp.bfloat16),
                    w2_ref[kh * 3 + kw],
                    preferred_element_type=jnp.float32)
        acc = acc + b2_ref[...]

        # --- residual branch (fused: no separate kernel / HBM round-trip) --------
        if has_projection:
            if stride == 1:
                xs = x
            else:
                xs = x_ref[pl.ds(0, Ho, stride), pl.ds(0, Wo, stride), :]
            res = jnp.dot(xs.reshape(Ho * Wo, cin_p), wr_ref[...],
                          preferred_element_type=jnp.float32) + br_ref[...]
        else:
            res = x.reshape(Ho * Wo, cout_p).astype(jnp.float32)

        out = jnp.maximum(acc + res, 0.0)
        o_ref[...] = out.reshape(Ho, Wo, cout_p).astype(o_ref.dtype)

    return kernel


# ----------------------------------------------------------------------------
# Glue: BN folding, weight packing, pallas_call wrapper
# ----------------------------------------------------------------------------
def _fold_bn(gamma, beta, mean, var, eps=1e-5):
    scale = gamma / jnp.sqrt(var + eps)
    shift = beta - mean * scale
    return scale, shift


def _prep_conv_weight(w_oihw, bn_scale, cin_p, cout_p):
    """Torch (Cout, Cin, KH, KW) -> (KH*KW, cin_p, cout_p) bf16, BN scale folded in."""
    cout, cin, kh, kw = w_oihw.shape
    w = jnp.transpose(w_oihw, (2, 3, 1, 0)).reshape(kh * kw, cin, cout)
    w = w * bn_scale[None, None, :]
    w = jnp.pad(w, ((0, 0), (0, cin_p - cin), (0, cout_p - cout)))
    return w.astype(jnp.bfloat16)


def _prep_bn_shift(shift, cout_p):
    return jnp.pad(shift, (0, cout_p - shift.shape[0])).reshape(1, cout_p).astype(jnp.float32)


def resnet_basic_layer_forward(x_nchw, params, stride=1):
    N, cin, H, W = x_nchw.shape
    cout = params["w1"].shape[0]
    has_projection = (cin != cout) or (stride != 1)

    cin_p = _round_up(cin, LANE)
    cout_p = _round_up(cout, LANE)
    Ho = (H - 1) // stride + 1
    Wo = (W - 1) // stride + 1

    # NCHW -> NHWC, lane-pad channels, cast to bf16 (MXU-native, halves HBM bytes).
    x = jnp.transpose(x_nchw, (0, 2, 3, 1))
    x = jnp.pad(x, ((0, 0), (0, 0), (0, 0), (0, cin_p - cin))).astype(jnp.bfloat16)

    s1, sh1 = _fold_bn(params["bn1_gamma"], params["bn1_beta"],
                       params["bn1_mean"], params["bn1_var"])
    s2, sh2 = _fold_bn(params["bn2_gamma"], params["bn2_beta"],
                       params["bn2_mean"], params["bn2_var"])
    w1 = _prep_conv_weight(params["w1"], s1, cin_p, cout_p)   # (9, cin_p, cout_p)
    w2 = _prep_conv_weight(params["w2"], s2, cout_p, cout_p)  # (9, cout_p, cout_p)
    b1 = _prep_bn_shift(sh1, cout_p)
    b2 = _prep_bn_shift(sh2, cout_p)

    args = [x, w1, b1, w2, b2]
    in_specs = [
        pl.BlockSpec((None, H, W, cin_p), lambda n: (n, 0, 0, 0)),
        pl.BlockSpec((9, cin_p, cout_p), lambda n: (0, 0, 0)),
        pl.BlockSpec((1, cout_p), lambda n: (0, 0)),
        pl.BlockSpec((9, cout_p, cout_p), lambda n: (0, 0, 0)),
        pl.BlockSpec((1, cout_p), lambda n: (0, 0)),
    ]
    if has_projection:
        sr, shr = _fold_bn(params["bnr_gamma"], params["bnr_beta"],
                           params["bnr_mean"], params["bnr_var"])
        wr = _prep_conv_weight(params["wr"], sr, cin_p, cout_p)[0]  # (cin_p, cout_p)
        br = _prep_bn_shift(shr, cout_p)
        args += [wr, br]
        in_specs += [pl.BlockSpec((cin_p, cout_p), lambda n: (0, 0)),
                     pl.BlockSpec((1, cout_p), lambda n: (0, 0))]

    xpad_shape = (H + 2, W, cin_p) if stride == 1 else (H + 2, W + 2, cin_p)
    kernel = _make_fused_kernel(H, W, Ho, Wo, cin_p, cout_p, stride, has_projection)

    out = pl.pallas_call(
        kernel,
        out_shape=jax.ShapeDtypeStruct((N, Ho, Wo, cout_p), jnp.float32),
        grid_spec=pltpu.PrefetchScalarGridSpec(
            num_scalar_prefetch=0,
            grid=(N,),
            in_specs=in_specs,
            out_specs=pl.BlockSpec((None, Ho, Wo, cout_p), lambda n: (n, 0, 0, 0)),
            scratch_shapes=[
                pltpu.VMEM(xpad_shape, jnp.float32),
                pltpu.VMEM((Ho + 2, Wo, cout_p), jnp.float32),
            ],
        ),
        compiler_params=pltpu.CompilerParams(dimension_semantics=("parallel",)),
    )(*args)

    out = out[..., :cout]
    return jnp.transpose(out, (0, 3, 1, 2))  # NHWC -> NCHW


# ----------------------------------------------------------------------------
# Pure-JAX f32 reference (module semantics) for correctness check
# ----------------------------------------------------------------------------
def resnet_basic_layer_ref(x_nchw, params, stride):
    def conv_bn(x, w, gamma, beta, mean, var, s, pad):
        y = lax.conv_general_dilated(
            x, w, window_strides=(s, s), padding=[(pad, pad), (pad, pad)],
            dimension_numbers=("NCHW", "OIHW", "NCHW"))
        sc, sh = _fold_bn(gamma, beta, mean, var)
        return y * sc[None, :, None, None] + sh[None, :, None, None]

    cin = x_nchw.shape[1]
    cout = params["w1"].shape[0]
    has_projection = (cin != cout) or (stride != 1)

    h = jax.nn.relu(conv_bn(x_nchw, params["w1"], params["bn1_gamma"],
                            params["bn1_beta"], params["bn1_mean"],
                            params["bn1_var"], stride, 1))
    h = conv_bn(h, params["w2"], params["bn2_gamma"], params["bn2_beta"],
                params["bn2_mean"], params["bn2_var"], 1, 1)
    if has_projection:
        r = conv_bn(x_nchw, params["wr"], params["bnr_gamma"], params["bnr_beta"],
                    params["bnr_mean"], params["bnr_var"], stride, 0)
    else:
        r = x_nchw
    return jax.nn.relu(h + r)


# ----------------------------------------------------------------------------
# Deterministic parameter init
# ----------------------------------------------------------------------------
def init_params(key, in_channels, out_channels):
    ks = jax.random.split(key, 16)

    def bn(k, c):
        k0, k1, k2, k3 = jax.random.split(k, 4)
        return dict(
            gamma=1.0 + 0.1 * jax.random.normal(k0, (c,), jnp.float32),
            beta=0.1 * jax.random.normal(k1, (c,), jnp.float32),
            mean=0.1 * jax.random.normal(k2, (c,), jnp.float32),
            var=0.5 + 0.5 * jnp.abs(jax.random.normal(k3, (c,), jnp.float32)),
        )

    bn1, bn2, bnr = bn(ks[3], out_channels), bn(ks[4], out_channels), bn(ks[5], out_channels)
    return {
        "w1": 0.1 * jax.random.normal(ks[0], (out_channels, in_channels, 3, 3), jnp.float32),
        "w2": 0.1 * jax.random.normal(ks[1], (out_channels, out_channels, 3, 3), jnp.float32),
        "wr": 0.1 * jax.random.normal(ks[2], (out_channels, in_channels, 1, 1), jnp.float32),
        "bn1_gamma": bn1["gamma"], "bn1_beta": bn1["beta"], "bn1_mean": bn1["mean"], "bn1_var": bn1["var"],
        "bn2_gamma": bn2["gamma"], "bn2_beta": bn2["beta"], "bn2_mean": bn2["mean"], "bn2_var": bn2["var"],
        "bnr_gamma": bnr["gamma"], "bnr_beta": bnr["beta"], "bnr_mean": bnr["mean"], "bnr_var": bnr["var"],
    }


if __name__ == "__main__":
    key = jax.random.PRNGKey(0)
    k_x, k_p = jax.random.split(key)

    batch, in_channels, out_channels, spatial, stride = 2, 4, 8, 16, 1
    x = jax.random.normal(k_x, (batch, in_channels, spatial, spatial), jnp.float32)
    params = init_params(k_p, in_channels, out_channels)

    fwd = jax.jit(functools.partial(resnet_basic_layer_forward, stride=stride))
    out = jax.block_until_ready(fwd(x, params))

    ref = resnet_basic_layer_ref(x, params, stride)
    assert out.shape == ref.shape == (batch, out_channels, spatial, spatial)
    # bf16 MXU operands (f32 accumulation) -> compare against the f32 reference
    # with a tolerance covering bf16 input rounding.
    assert jnp.allclose(out, ref, atol=5e-2, rtol=5e-2), "Pallas output mismatch vs JAX reference"

    print("KERNEL_OK")
</pallas_src>

<mosaic_0001>
module attributes {stable_mosaic.version = 11 : i64} {
  func.func @kernel(%arg0: i32, %arg1: memref<1x16x16x128xbf16, #tpu.memory_space<vmem>>, %arg2: memref<9x128x128xbf16, #tpu.memory_space<vmem>>, %arg3: memref<1x128xf32, #tpu.memory_space<vmem>>, %arg4: memref<9x128x128xbf16, #tpu.memory_space<vmem>>, %arg5: memref<1x128xf32, #tpu.memory_space<vmem>>, %arg6: memref<128x128xbf16, #tpu.memory_space<vmem>>, %arg7: memref<1x128xf32, #tpu.memory_space<vmem>>, %arg8: memref<1x16x16x128xf32, #tpu.memory_space<vmem>>, %arg9: memref<18x16x128xf32, #tpu.memory_space<vmem>>, %arg10: memref<18x16x128xf32, #tpu.memory_space<vmem>>) attributes {dimension_semantics = [#tpu.dimension_semantics<parallel>], iteration_bounds = array<i64: 2>, scalar_prefetch = 0 : i64, scratch_operands = 2 : i64, tpu.core_type = #tpu.core_type<tc>, window_params = [{transform_indices = @transform_0, window_bounds = array<i64: 1, 16, 16, 128>}, {pipeline_mode = #tpu.pipeline_mode<synchronous>, transform_indices = @transform_1, window_bounds = array<i64: 9, 128, 128>}, {pipeline_mode = #tpu.pipeline_mode<synchronous>, transform_indices = @transform_2, window_bounds = array<i64: 1, 128>}, {pipeline_mode = #tpu.pipeline_mode<synchronous>, transform_indices = @transform_3, window_bounds = array<i64: 9, 128, 128>}, {pipeline_mode = #tpu.pipeline_mode<synchronous>, transform_indices = @transform_4, window_bounds = array<i64: 1, 128>}, {pipeline_mode = #tpu.pipeline_mode<synchronous>, transform_indices = @transform_5, window_bounds = array<i64: 128, 128>}, {pipeline_mode = #tpu.pipeline_mode<synchronous>, transform_indices = @transform_6, window_bounds = array<i64: 1, 128>}, {transform_indices = @transform_7, window_bounds = array<i64: 1, 16, 16, 128>}]} {
    %cst = arith.constant 0.000000e+00 : f32
    %0 = vector.broadcast %cst : f32 to vector<18x16x128xf32>
    %c0 = arith.constant 0 : index
    %c0_0 = arith.constant 0 : index
    %c0_1 = arith.constant 0 : index
    %1 = vector.load %arg9[%c0, %c0_0, %c0_1] : memref<18x16x128xf32, #tpu.memory_space<vmem>>, vector<18x16x128xf32>
    tpu.vector_store %arg9[%c0, %c0_0, %c0_1], %0 {strides = array<i32>} : memref<18x16x128xf32, #tpu.memory_space<vmem>>, vector<18x16x128xf32>,
    %cst_2 = arith.constant 0.000000e+00 : f32
    %2 = vector.broadcast %cst_2 : f32 to vector<18x16x128xf32>
    %c0_3 = arith.constant 0 : index
    %c0_4 = arith.constant 0 : index
    %c0_5 = arith.constant 0 : index
    %3 = vector.load %arg10[%c0_3, %c0_4, %c0_5] : memref<18x16x128xf32, #tpu.memory_space<vmem>>, vector<18x16x128xf32>
    tpu.vector_store %arg10[%c0_3, %c0_4, %c0_5], %2 {strides = array<i32>} : memref<18x16x128xf32, #tpu.memory_space<vmem>>, vector<18x16x128xf32>,
    %c0_6 = arith.constant 0 : index
    %c0_7 = arith.constant 0 : index
    %c0_8 = arith.constant 0 : index
    %c0_9 = arith.constant 0 : index
    %4 = vector.load %arg1[%c0_6, %c0_7, %c0_8, %c0_9] : memref<1x16x16x128xbf16, #tpu.memory_space<vmem>>, vector<1x16x16x128xbf16>
    %5 = vector.shape_cast %4 : vector<1x16x16x128xbf16> to vector<16x16x128xbf16>
    %6 = arith.extf %5 : vector<16x16x128xbf16> to vector<16x16x128xf32>
    %c1 = arith.constant 1 : index
    %c0_10 = arith.constant 0 : index
    %c0_11 = arith.constant 0 : index
    %7 = vector.load %arg9[%c1, %c0_10, %c0_11] : memref<18x16x128xf32, #tpu.memory_space<vmem>>, vector<16x16x128xf32>
    tpu.vector_store %arg9[%c1, %c0_10, %c0_11], %6 {strides = array<i32>} : memref<18x16x128xf32, #tpu.memory_space<vmem>>, vector<16x16x128xf32>,
    %cst_12 = arith.constant 0.000000e+00 : f32
    %8 = vector.broadcast %cst_12 : f32 to vector<256x128xf32>
    %c0_13 = arith.constant 0 : index
    %c0_14 = arith.constant 0 : index
    %c0_15 = arith.constant 0 : index
    %9 = vector.load %arg9[%c0_13, %c0_14, %c0_15] : memref<18x16x128xf32, #tpu.memory_space<vmem>>, vector<16x16x128xf32>
    %10 = tpu.iota {dimensions = array<i32: 1>} : vector<16x16x128xi32>
    %c1_i32 = arith.constant 1 : i32
    %11 = tpu.dynamic_rotate %9 by %c1_i32 dim 1 : vector<16x16x128xf32>, i32 -> vector<16x16x128xf32>
    %c1_i32_16 = arith.constant 1 : i32
    %12 = vector.broadcast %c1_i32_16 : i32 to vector<16x16x128xi32>
    %13 = arith.cmpi sge, %10, %12 : vector<16x16x128xi32>
    %cst_17 = arith.constant 0.000000e+00 : f32
    %14 = vector.broadcast %cst_17 : f32 to vector<16x16x128xf32>
    %15 = arith.select %13, %11, %14 : vector<16x16x128xi1>, vector<16x16x128xf32>
    %16 = vector.shape_cast %15 : vector<16x16x128xf32> to vector<256x128xf32>
    %17 = arith.truncf %16 : vector<256x128xf32> to vector<256x128xbf16>
    %c0_18 = arith.constant 0 : index
    %c0_19 = arith.constant 0 : index
    %c0_20 = arith.constant 0 : index
    %18 = vector.load %arg2[%c0_18, %c0_19, %c0_20] : memref<9x128x128xbf16, #tpu.memory_space<vmem>>, vector<1x128x128xbf16>
    %19 = vector.shape_cast %18 : vector<1x128x128xbf16> to vector<128x128xbf16>
    %cst_21 = arith.constant dense<0.000000e+00> : vector<256x128xf32>
    %20 = tpu.matmul %17, %19, %cst_21 {dimension_numbers = #tpu.dot_dimension_numbers<[1], [0], [0], [1], [0, 0, 1, 1], [], []>} : vector<256x128xbf16>, vector<128x128xbf16>, vector<256x128xf32> -> vector<256x128xf32>
    %21 = arith.addf %8, %20 : vector<256x128xf32>
    %22 = vector.shape_cast %9 : vector<16x16x128xf32> to vector<256x128xf32>
    %23 = arith.truncf %22 : vector<256x128xf32> to vector<256x128xbf16>
    %c1_22 = arith.constant 1 : index
    %c0_23 = arith.constant 0 : index
    %c0_24 = arith.constant 0 : index
    %24 = vector.load %arg2[%c1_22, %c0_23, %c0_24] : memref<9x128x128xbf16, #tpu.memory_space<vmem>>, vector<1x128x128xbf16>
    %25 = vector.shape_cast %24 : vector<1x128x128xbf16> to vector<128x128xbf16>
    %cst_25 = arith.constant dense<0.000000e+00> : vector<256x128xf32>
    %26 = tpu.matmul %23, %25, %cst_25 {dimension_numbers = #tpu.dot_dimension_numbers<[1], [0], [0], [1], [0, 0, 1, 1], [], []>} : vector<256x128xbf16>, vector<128x128xbf16>, vector<256x128xf32> -> vector<256x128xf32>
    %27 = arith.addf %21, %26 : vector<256x128xf32>
    %28 = tpu.iota {dimensions = array<i32: 1>} : vector<16x16x128xi32>
    %c15_i32 = arith.constant 15 : i32
    %29 = tpu.dynamic_rotate %9 by %c15_i32 dim 1 : vector<16x16x128xf32>, i32 -> vector<16x16x128xf32>
    %c14_i32 = arith.constant 14 : i32
    %30 = vector.broadcast %c14_i32 : i32 to vector<16x16x128xi32>
    %31 = arith.cmpi sle, %28, %30 : vector<16x16x128xi32>
    %cst_26 = arith.constant 0.000000e+00 : f32
    %32 = vector.broadcast %cst_26 : f32 to vector<16x16x128xf32>
    %33 = arith.select %31, %29, %32 : vector<16x16x128xi1>, vector<16x16x128xf32>
    %34 = vector.shape_cast %33 : vector<16x16x128xf32> to vector<256x128xf32>
    %35 = arith.truncf %34 : vector<256x128xf32> to vector<256x128xbf16>
    %c2 = arith.constant 2 : index
    %c0_27 = arith.constant 0 : index
    %c0_28 = arith.constant 0 : index
    %36 = vector.load %arg2[%c2, %c0_27, %c0_28] : memref<9x128x128xbf16, #tpu.memory_space<vmem>>, vector<1x128x128xbf16>
    %37 = vector.shape_cast %36 : vector<1x128x128xbf16> to vector<128x128xbf16>
    %cst_29 = arith.constant dense<0.000000e+00> : vector<256x128xf32>
    %38 = tpu.matmul %35, %37, %cst_29 {dimension_numbers = #tpu.dot_dimension_numbers<[1], [0], [0], [1], [0, 0, 1, 1], [], []>} : vector<256x128xbf16>, vector<128x128xbf16>, vector<256x128xf32> -> vector<256x128xf32>
    %39 = arith.addf %27, %38 : vector<256x128xf32>
    %c1_30 = arith.constant 1 : index
    %c0_31 = arith.constant 0 : index
    %c0_32 = arith.constant 0 : index
    %40 = vector.load %arg9[%c1_30, %c0_31, %c0_32] : memref<18x16x128xf32, #tpu.memory_space<vmem>>, vector<16x16x128xf32>
    %41 = tpu.iota {dimensions = array<i32: 1>} : vector<16x16x128xi32>
    %c1_i32_33 = arith.constant 1 : i32
    %42 = tpu.dynamic_rotate %40 by %c1_i32_33 dim 1 : vector<16x16x128xf32>, i32 -> vector<16x16x128xf32>
    %c1_i32_34 = arith.constant 1 : i32
    %43 = vector.broadcast %c1_i32_34 : i32 to vector<16x16x128xi32>
    %44 = arith.cmpi sge, %41, %43 : vector<16x16x128xi32>
    %cst_35 = arith.constant 0.000000e+00 : f32
    %45 = vector.broadcast %cst_35 : f32 to vector<16x16x128xf32>
    %46 = arith.select %44, %42, %45 : vector<16x16x128xi1>, vector<16x16x128xf32>
    %47 = vector.shape_cast %46 : vector<16x16x128xf32> to vector<256x128xf32>
    %48 = arith.truncf %47 : vector<256x128xf32> to vector<256x128xbf16>
    %c3 = arith.constant 3 : index
    %c0_36 = arith.constant 0 : index
    %c0_37 = arith.constant 0 : index
    %49 = vector.load %arg2[%c3, %c0_36, %c0_37] : memref<9x128x128xbf16, #tpu.memory_space<vmem>>, vector<1x128x128xbf16>
    %50 = vector.shape_cast %49 : vector<1x128x128xbf16> to vector<128x128xbf16>
    %cst_38 = arith.constant dense<0.000000e+00> : vector<256x128xf32>
    %51 = tpu.matmul %48, %50, %cst_38 {dimension_numbers = #tpu.dot_dimension_numbers<[1], [0], [0], [1], [0, 0, 1, 1], [], []>} : vector<256x128xbf16>, vector<128x128xbf16>, vector<256x128xf32> -> vector<256x128xf32>
    %52 = arith.addf %39, %51 : vector<256x128xf32>
    %53 = vector.shape_cast %40 : vector<16x16x128xf32> to vector<256x128xf32>
    %54 = arith.truncf %53 : vector<256x128xf32> to vector<256x128xbf16>
    %c4 = arith.constant 4 : index
    %c0_39 = arith.constant 0 : index
    %c0_40 = arith.constant 0 : index
    %55 = vector.load %arg2[%c4, %c0_39, %c0_40] : memref<9x128x128xbf16, #tpu.memory_space<vmem>>, vector<1x128x128xbf16>
    %56 = vector.shape_cast %55 : vector<1x128x128xbf16> to vector<128x128xbf16>
    %cst_41 = arith.constant dense<0.000000e+00> : vector<256x128xf32>
    %57 = tpu.matmul %54, %56, %cst_41 {dimension_numbers = #tpu.dot_dimension_numbers<[1], [0], [0], [1], [0, 0, 1, 1], [], []>} : vector<256x128xbf16>, vector<128x128xbf16>, vector<256x128xf32> -> vector<256x128xf32>
    %58 = arith.addf %52, %57 : vector<256x128xf32>
    %59 = tpu.iota {dimensions = array<i32: 1>} : vector<16x16x128xi32>
    %c15_i32_42 = arith.constant 15 : i32
    %60 = tpu.dynamic_rotate %40 by %c15_i32_42 dim 1 : vector<16x16x128xf32>, i32 -> vector<16x16x128xf32>
    %c14_i32_43 = arith.constant 14 : i32
    %61 = vector.broadcast %c14_i32_43 : i32 to vector<16x16x128xi32>
    %62 = arith.cmpi sle, %59, %61 : vector<16x16x128xi32>
    %cst_44 = arith.constant 0.000000e+00 : f32
    %63 = vector.broadcast %cst_44 : f32 to vector<16x16x128xf32>
    %64 = arith.select %62, %60, %63 : vector<16x16x128xi1>, vector<16x16x128xf32>
    %65 = vector.shape_cast %64 : vector<16x16x128xf32> to vector<256x128xf32>
    %66 = arith.truncf %65 : vector<256x128xf32> to vector<256x128xbf16>
    %c5 = arith.constant 5 : index
    %c0_45 = arith.constant 0 : index
    %c0_46 = arith.constant 0 : index
    %67 = vector.load %arg2[%c5, %c0_45, %c0_46] : memref<9x128x128xbf16, #tpu.memory_space<vmem>>, vector<1x128x128xbf16>
    %68 = vector.shape_cast %67 : vector<1x128x128xbf16> to vector<128x128xbf16>
    %cst_47 = arith.constant dense<0.000000e+00> : vector<256x128xf32>
    %69 = tpu.matmul %66, %68, %cst_47 {dimension_numbers = #tpu.dot_dimension_numbers<[1], [0], [0], [1], [0, 0, 1, 1], [], []>} : vector<256x128xbf16>, vector<128x128xbf16>, vector<256x128xf32> -> vector<256x128xf32>
    %70 = arith.addf %58, %69 : vector<256x128xf32>
    %c2_48 = arith.constant 2 : index
    %c0_49 = arith.constant 0 : index
    %c0_50 = arith.constant 0 : index
    %71 = vector.load %arg9[%c2_48, %c0_49, %c0_50] : memref<18x16x128xf32, #tpu.memory_space<vmem>>, vector<16x16x128xf32>
    %72 = tpu.iota {dimensions = array<i32: 1>} : vector<16x16x128xi32>
    %c1_i32_51 = arith.constant 1 : i32
    %73 = tpu.dynamic_rotate %71 by %c1_i32_51 dim 1 : vector<16x16x128xf32>, i32 -> vector<16x16x128xf32>
    %c1_i32_52 = arith.constant 1 : i32
    %74 = vector.broadcast %c1_i32_52 : i32 to vector<16x16x128xi32>
    %75 = arith.cmpi sge, %72, %74 : vector<16x16x128xi32>
    %cst_53 = arith.constant 0.000000e+00 : f32
    %76 = vector.broadcast %cst_53 : f32 to vector<16x16x128xf32>
    %77 = arith.select %75, %73, %76 : vector<16x16x128xi1>, vector<16x16x128xf32>
    %78 = vector.shape_cast %77 : vector<16x16x128xf32> to vector<256x128xf32>
    %79 = arith.truncf %78 : vector<256x128xf32> to vector<256x128xbf16>
    %c6 = arith.constant 6 : index
    %c0_54 = arith.constant 0 : index
    %c0_55 = arith.constant 0 : index
    %80 = vector.load %arg2[%c6, %c0_54, %c0_55] : memref<9x128x128xbf16, #tpu.memory_space<vmem>>, vector<1x128x128xbf16>
    %81 = vector.shape_cast %80 : vector<1x128x128xbf16> to vector<128x128xbf16>
    %cst_56 = arith.constant dense<0.000000e+00> : vector<256x128xf32>
    %82 = tpu.matmul %79, %81, %cst_56 {dimension_numbers = #tpu.dot_dimension_numbers<[1], [0], [0], [1], [0, 0, 1, 1], [], []>} : vector<256x128xbf16>, vector<128x128xbf16>, vector<256x128xf32> -> vector<256x128xf32>
    %83 = arith.addf %70, %82 : vector<256x128xf32>
    %84 = vector.shape_cast %71 : vector<16x16x128xf32> to vector<256x128xf32>
    %85 = arith.truncf %84 : vector<256x128xf32> to vector<256x128xbf16>
    %c7 = arith.constant 7 : index
    %c0_57 = arith.constant 0 : index
    %c0_58 = arith.constant 0 : index
    %86 = vector.load %arg2[%c7, %c0_57, %c0_58] : memref<9x128x128xbf16, #tpu.memory_space<vmem>>, vector<1x128x128xbf16>
    %87 = vector.shape_cast %86 : vector<1x128x128xbf16> to vector<128x128xbf16>
    %cst_59 = arith.constant dense<0.000000e+00> : vector<256x128xf32>
    %88 = tpu.matmul %85, %87, %cst_59 {dimension_numbers = #tpu.dot_dimension_numbers<[1], [0], [0], [1], [0, 0, 1, 1], [], []>} : vector<256x128xbf16>, vector<128x128xbf16>, vector<256x128xf32> -> vector<256x128xf32>
    %89 = arith.addf %83, %88 : vector<256x128xf32>
    %90 = tpu.iota {dimensions = array<i32: 1>} : vector<16x16x128xi32>
    %c15_i32_60 = arith.constant 15 : i32
    %91 = tpu.dynamic_rotate %71 by %c15_i32_60 dim 1 : vector<16x16x128xf32>, i32 -> vector<16x16x128xf32>
    %c14_i32_61 = arith.constant 14 : i32
    %92 = vector.broadcast %c14_i32_61 : i32 to vector<16x16x128xi32>
    %93 = arith.cmpi sle, %90, %92 : vector<16x16x128xi32>
    %cst_62 = arith.constant 0.000000e+00 : f32
    %94 = vector.broadcast %cst_62 : f32 to vector<16x16x128xf32>
    %95 = arith.select %93, %91, %94 : vector<16x16x128xi1>, vector<16x16x128xf32>
    %96 = vector.shape_cast %95 : vector<16x16x128xf32> to vector<256x128xf32>
    %97 = arith.truncf %96 : vector<256x128xf32> to vector<256x128xbf16>
    %c8 = arith.constant 8 : index
    %c0_63 = arith.constant 0 : index
    %c0_64 = arith.constant 0 : index
    %98 = vector.load %arg2[%c8, %c0_63, %c0_64] : memref<9x128x128xbf16, #tpu.memory_space<vmem>>, vector<1x128x128xbf16>
    %99 = vector.shape_cast %98 : vector<1x128x128xbf16> to vector<128x128xbf16>
    %cst_65 = arith.constant dense<0.000000e+00> : vector<256x128xf32>
    %100 = tpu.matmul %97, %99, %cst_65 {dimension_numbers = #tpu.dot_dimension_numbers<[1], [0], [0], [1], [0, 0, 1, 1], [], []>} : vector<256x128xbf16>, vector<128x128xbf16>, vector<256x128xf32> -> vector<256x128xf32>
    %101 = arith.addf %89, %100 : vector<256x128xf32>
    %c0_66 = arith.constant 0 : index
    %c0_67 = arith.constant 0 : index
    %102 = vector.load %arg3[%c0_66, %c0_67] : memref<1x128xf32, #tpu.memory_space<vmem>>, vector<1x128xf32>
    %103 = vector.broadcast %102 : vector<1x128xf32> to vector<256x128xf32>
    %104 = arith.addf %101, %103 : vector<256x128xf32>
    %cst_68 = arith.constant 0.000000e+00 : f32
    %105 = vector.broadcast %cst_68 : f32 to vector<256x128xf32>
    %106 = arith.maximumf %104, %105 : vector<256x128xf32>
    %107 = vector.shape_cast %106 : vector<256x128xf32> to vector<16x16x128xf32>
    %c1_69 = arith.constant 1 : index
    %c0_70 = arith.constant 0 : index
    %c0_71 = arith.constant 0 : index
    %108 = vector.load %arg10[%c1_69, %c0_70, %c0_71] : memref<18x16x128xf32, #tpu.memory_space<vmem>>, vector<16x16x128xf32>
    tpu.vector_store %arg10[%c1_69, %c0_70, %c0_71], %107 {strides = array<i32>} : memref<18x16x128xf32, #tpu.memory_space<vmem>>, vector<16x16x128xf32>,
    %cst_72 = arith.constant 0.000000e+00 : f32
    %109 = vector.broadcast %cst_72 : f32 to vector<256x128xf32>
    %c0_73 = arith.constant 0 : index
    %c0_74 = arith.constant 0 : index
    %c0_75 = arith.constant 0 : index
    %110 = vector.load %arg10[%c0_73, %c0_74, %c0_75] : memref<18x16x128xf32, #tpu.memory_space<vmem>>, vector<16x16x128xf32>
    %111 = tpu.iota {dimensions = array<i32: 1>} : vector<16x16x128xi32>
    %c1_i32_76 = arith.constant 1 : i32
    %112 = tpu.dynamic_rotate %110 by %c1_i32_76 dim 1 : vector<16x16x128xf32>, i32 -> vector<16x16x128xf32>
    %c1_i32_77 = arith.constant 1 : i32
    %113 = vector.broadcast %c1_i32_77 : i32 to vector<16x16x128xi32>
    %114 = arith.cmpi sge, %111, %113 : vector<16x16x128xi32>
    %cst_78 = arith.constant 0.000000e+00 : f32
    %115 = vector.broadcast %cst_78 : f32 to vector<16x16x128xf32>
    %116 = arith.select %114, %112, %115 : vector<16x16x128xi1>, vector<16x16x128xf32>
    %117 = vector.shape_cast %116 : vector<16x16x128xf32> to vector<256x128xf32>
    %118 = arith.truncf %117 : vector<256x128xf32> to vector<256x128xbf16>
    %c0_79 = arith.constant 0 : index
    %c0_80 = arith.constant 0 : index
    %c0_81 = arith.constant 0 : index
    %119 = vector.load %arg4[%c0_79, %c0_80, %c0_81] : memref<9x128x128xbf16, #tpu.memory_space<vmem>>, vector<1x128x128xbf16>
    %120 = vector.shape_cast %119 : vector<1x128x128xbf16> to vector<128x128xbf16>
    %cst_82 = arith.constant dense<0.000000e+00> : vector<256x128xf32>
    %121 = tpu.matmul %118, %120, %cst_82 {dimension_numbers = #tpu.dot_dimension_numbers<[1], [0], [0], [1], [0, 0, 1, 1], [], []>} : vector<256x128xbf16>, vector<128x128xbf16>, vector<256x128xf32> -> vector<256x128xf32>
    %122 = arith.addf %109, %121 : vector<256x128xf32>
    %123 = vector.shape_cast %110 : vector<16x16x128xf32> to vector<256x128xf32>
    %124 = arith.truncf %123 : vector<256x128xf32> to vector<256x128xbf16>
    %c1_83 = arith.constant 1 : index
    %c0_84 = arith.constant 0 : index
    %c0_85 = arith.constant 0 : index
    %125 = vector.load %arg4[%c1_83, %c0_84, %c0_85] : memref<9x128x128xbf16, #tpu.memory_space<vmem>>, vector<1x128x128xbf16>
    %126 = vector.shape_cast %125 : vector<1x128x128xbf16> to vector<128x128xbf16>
    %cst_86 = arith.constant dense<0.000000e+00> : vector<256x128xf32>
    %127 = tpu.matmul %124, %126, %cst_86 {dimension_numbers = #tpu.dot_dimension_numbers<[1], [0], [0], [1], [0, 0, 1, 1], [], []>} : vector<256x128xbf16>, vector<128x128xbf16>, vector<256x128xf32> -> vector<256x128xf32>
    %128 = arith.addf %122, %127 : vector<256x128xf32>
    %129 = tpu.iota {dimensions = array<i32: 1>} : vector<16x16x128xi32>
    %c15_i32_87 = arith.constant 15 : i32
    %130 = tpu.dynamic_rotate %110 by %c15_i32_87 dim 1 : vector<16x16x128xf32>, i32 -> vector<16x16x128xf32>
    %c14_i32_88 = arith.constant 14 : i32
    %131 = vector.broadcast %c14_i32_88 : i32 to vector<16x16x128xi32>
    %132 = arith.cmpi sle, %129, %131 : vector<16x16x128xi32>
    %cst_89 = arith.constant 0.000000e+00 : f32
    %133 = vector.broadcast %cst_89 : f32 to vector<16x16x128xf32>
    %134 = arith.select %132, %130, %133 : vector<16x16x128xi1>, vector<16x16x128xf32>
    %135 = vector.shape_cast %134 : vector<16x16x128xf32> to vector<256x128xf32>
    %136 = arith.truncf %135 : vector<256x128xf32> to vector<256x128xbf16>
    %c2_90 = arith.constant 2 : index
    %c0_91 = arith.constant 0 : index
    %c0_92 = arith.constant 0 : index
    %137 = vector.load %arg4[%c2_90, %c0_91, %c0_92] : memref<9x128x128xbf16, #tpu.memory_space<vmem>>, vector<1x128x128xbf16>
    %138 = vector.shape_cast %137 : vector<1x128x128xbf16> to vector<128x128xbf16>
    %cst_93 = arith.constant dense<0.000000e+00> : vector<256x128xf32>
    %139 = tpu.matmul %136, %138, %cst_93 {dimension_numbers = #tpu.dot_dimension_numbers<[1], [0], [0], [1], [0, 0, 1, 1], [], []>} : vector<256x128xbf16>, vector<128x128xbf16>, vector<256x128xf32> -> vector<256x128xf32>
    %140 = arith.addf %128, %139 : vector<256x128xf32>
    %c1_94 = arith.constant 1 : index
    %c0_95 = arith.constant 0 : index
    %c0_96 = arith.constant 0 : index
    %141 = vector.load %arg10[%c1_94, %c0_95, %c0_96] : memref<18x16x128xf32, #tpu.memory_space<vmem>>, vector<16x16x128xf32>
    %142 = tpu.iota {dimensions = array<i32: 1>} : vector<16x16x128xi32>
    %c1_i32_97 = arith.constant 1 : i32
    %143 = tpu.dynamic_rotate %141 by %c1_i32_97 dim 1 : vector<16x16x128xf32>, i32 -> vector<16x16x128xf32>
    %c1_i32_98 = arith.constant 1 : i32
    %144 = vector.broadcast %c1_i32_98 : i32 to vector<16x16x128xi32>
    %145 = arith.cmpi sge, %142, %144 : vector<16x16x128xi32>
    %cst_99 = arith.constant 0.000000e+00 : f32
    %146 = vector.broadcast %cst_99 : f32 to vector<16x16x128xf32>
    %147 = arith.select %145, %143, %146 : vector<16x16x128xi1>, vector<16x16x128xf32>
    %148 = vector.shape_cast %147 : vector<16x16x128xf32> to vector<256x128xf32>
    %149 = arith.truncf %148 : vector<256x128xf32> to vector<256x128xbf16>
    %c3_100 = arith.constant 3 : index
    %c0_101 = arith.constant 0 : index
    %c0_102 = arith.constant 0 : index
    %150 = vector.load %arg4[%c3_100, %c0_101, %c0_102] : memref<9x128x128xbf16, #tpu.memory_space<vmem>>, vector<1x128x128xbf16>
    %151 = vector.shape_cast %150 : vector<1x128x128xbf16> to vector<128x128xbf16>
    %cst_103 = arith.constant dense<0.000000e+00> : vector<256x128xf32>
    %152 = tpu.matmul %149, %151, %cst_103 {dimension_numbers = #tpu.dot_dimension_numbers<[1], [0], [0], [1], [0, 0, 1, 1], [], []>} : vector<256x128xbf16>, vector<128x128xbf16>, vector<256x128xf32> -> vector<256x128xf32>
    %153 = arith.addf %140, %152 : vector<256x128xf32>
    %154 = vector.shape_cast %141 : vector<16x16x128xf32> to vector<256x128xf32>
    %155 = arith.truncf %154 : vector<256x128xf32> to vector<256x128xbf16>
    %c4_104 = arith.constant 4 : index
    %c0_105 = arith.constant 0 : index
    %c0_106 = arith.constant 0 : index
    %156 = vector.load %arg4[%c4_104, %c0_105, %c0_106] : memref<9x128x128xbf16, #tpu.memory_space<vmem>>, vector<1x128x128xbf16>
    %157 = vector.shape_cast %156 : vector<1x128x128xbf16> to vector<128x128xbf16>
    %cst_107 = arith.constant dense<0.000000e+00> : vector<256x128xf32>
    %158 = tpu.matmul %155, %157, %cst_107 {dimension_numbers = #tpu.dot_dimension_numbers<[1], [0], [0], [1], [0, 0, 1, 1], [], []>} : vector<256x128xbf16>, vector<128x128xbf16>, vector<256x128xf32> -> vector<256x128xf32>
    %159 = arith.addf %153, %158 : vector<256x128xf32>
    %160 = tpu.iota {dimensions = array<i32: 1>} : vector<16x16x128xi32>
    %c15_i32_108 = arith.constant 15 : i32
    %161 = tpu.dynamic_rotate %141 by %c15_i32_108 dim 1 : vector<16x16x128xf32>, i32 -> vector<16x16x128xf32>
    %c14_i32_109 = arith.constant 14 : i32
    %162 = vector.broadcast %c14_i32_109 : i32 to vector<16x16x128xi32>
    %163 = arith.cmpi sle, %160, %162 : vector<16x16x128xi32>
    %cst_110 = arith.constant 0.000000e+00 : f32
    %164 = vector.broadcast %cst_110 : f32 to vector<16x16x128xf32>
    %165 = arith.select %163, %161, %164 : vector<16x16x128xi1>, vector<16x16x128xf32>
    %166 = vector.shape_cast %165 : vector<16x16x128xf32> to vector<256x128xf32>
    %167 = arith.truncf %166 : vector<256x128xf32> to vector<256x128xbf16>
    %c5_111 = arith.constant 5 : index
    %c0_112 = arith.constant 0 : index
    %c0_113 = arith.constant 0 : index
    %168 = vector.load %arg4[%c5_111, %c0_112, %c0_113] : memref<9x128x128xbf16, #tpu.memory_space<vmem>>, vector<1x128x128xbf16>
    %169 = vector.shape_cast %168 : vector<1x128x128xbf16> to vector<128x128xbf16>
    %cst_114 = arith.constant dense<0.000000e+00> : vector<256x128xf32>
    %170 = tpu.matmul %167, %169, %cst_114 {dimension_numbers = #tpu.dot_dimension_numbers<[1], [0], [0], [1], [0, 0, 1, 1], [], []>} : vector<256x128xbf16>, vector<128x128xbf16>, vector<256x128xf32> -> vector<256x128xf32>
    %171 = arith.addf %159, %170 : vector<256x128xf32>
    %c2_115 = arith.constant 2 : index
    %c0_116 = arith.constant 0 : index
    %c0_117 = arith.constant 0 : index
    %172 = vector.load %arg10[%c2_115, %c0_116, %c0_117] : memref<18x16x128xf32, #tpu.memory_space<vmem>>, vector<16x16x128xf32>
    %173 = tpu.iota {dimensions = array<i32: 1>} : vector<16x16x128xi32>
    %c1_i32_118 = arith.constant 1 : i32
    %174 = tpu.dynamic_rotate %172 by %c1_i32_118 dim 1 : vector<16x16x128xf32>, i32 -> vector<16x16x128xf32>
    %c1_i32_119 = arith.constant 1 : i32
    %175 = vector.broadcast %c1_i32_119 : i32 to vector<16x16x128xi32>
    %176 = arith.cmpi sge, %173, %175 : vector<16x16x128xi32>
    %cst_120 = arith.constant 0.000000e+00 : f32
    %177 = vector.broadcast %cst_120 : f32 to vector<16x16x128xf32>
    %178 = arith.select %176, %174, %177 : vector<16x16x128xi1>, vector<16x16x128xf32>
    %179 = vector.shape_cast %178 : vector<16x16x128xf32> to vector<256x128xf32>
    %180 = arith.truncf %179 : vector<256x128xf32> to vector<256x128xbf16>
    %c6_121 = arith.constant 6 : index
    %c0_122 = arith.constant 0 : index
    %c0_123 = arith.constant 0 : index
    %181 = vector.load %arg4[%c6_121, %c0_122, %c0_123] : memref<9x128x128xbf16, #tpu.memory_space<vmem>>, vector<1x128x128xbf16>
    %182 = vector.shape_cast %181 : vector<1x128x128xbf16> to vector<128x128xbf16>
    %cst_124 = arith.constant dense<0.000000e+00> : vector<256x128xf32>
    %183 = tpu.matmul %180, %182, %cst_124 {dimension_numbers = #tpu.dot_dimension_numbers<[1], [0], [0], [1], [0, 0, 1, 1], [], []>} : vector<256x128xbf16>, vector<128x128xbf16>, vector<256x128xf32> -> vector<256x128xf32>
    %184 = arith.addf %171, %183 : vector<256x128xf32>
    %185 = vector.shape_cast %172 : vector<16x16x128xf32> to vector<256x128xf32>
    %186 = arith.truncf %185 : vector<256x128xf32> to vector<256x128xbf16>
    %c7_125 = arith.constant 7 : index
    %c0_126 = arith.constant 0 : index
    %c0_127 = arith.constant 0 : index
    %187 = vector.load %arg4[%c7_125, %c0_126, %c0_127] : memref<9x128x128xbf16, #tpu.memory_space<vmem>>, vector<1x128x128xbf16>
    %188 = vector.shape_cast %187 : vector<1x128x128xbf16> to vector<128x128xbf16>
    %cst_128 = arith.constant dense<0.000000e+00> : vector<256x128xf32>
    %189 = tpu.matmul %186, %188, %cst_128 {dimension_numbers = #tpu.dot_dimension_numbers<[1], [0], [0], [1], [0, 0, 1, 1], [], []>} : vector<256x128xbf16>, vector<128x128xbf16>, vector<256x128xf32> -> vector<256x128xf32>
    %190 = arith.addf %184, %189 : vector<256x128xf32>
    %191 = tpu.iota {dimensions = array<i32: 1>} : vector<16x16x128xi32>
    %c15_i32_129 = arith.constant 15 : i32
    %192 = tpu.dynamic_rotate %172 by %c15_i32_129 dim 1 : vector<16x16x128xf32>, i32 -> vector<16x16x128xf32>
    %c14_i32_130 = arith.constant 14 : i32
    %193 = vector.broadcast %c14_i32_130 : i32 to vector<16x16x128xi32>
    %194 = arith.cmpi sle, %191, %193 : vector<16x16x128xi32>
    %cst_131 = arith.constant 0.000000e+00 : f32
    %195 = vector.broadcast %cst_131 : f32 to vector<16x16x128xf32>
    %196 = arith.select %194, %192, %195 : vector<16x16x128xi1>, vector<16x16x128xf32>
    %197 = vector.shape_cast %196 : vector<16x16x128xf32> to vector<256x128xf32>
    %198 = arith.truncf %197 : vector<256x128xf32> to vector<256x128xbf16>
    %c8_132 = arith.constant 8 : index
    %c0_133 = arith.constant 0 : index
    %c0_134 = arith.constant 0 : index
    %199 = vector.load %arg4[%c8_132, %c0_133, %c0_134] : memref<9x128x128xbf16, #tpu.memory_space<vmem>>, vector<1x128x128xbf16>
    %200 = vector.shape_cast %199 : vector<1x128x128xbf16> to vector<128x128xbf16>
    %cst_135 = arith.constant dense<0.000000e+00> : vector<256x128xf32>
    %201 = tpu.matmul %198, %200, %cst_135 {dimension_numbers = #tpu.dot_dimension_numbers<[1], [0], [0], [1], [0, 0, 1, 1], [], []>} : vector<256x128xbf16>, vector<128x128xbf16>, vector<256x128xf32> -> vector<256x128xf32>
    %202 = arith.addf %190, %201 : vector<256x128xf32>
    %c0_136 = arith.constant 0 : index
    %c0_137 = arith.constant 0 : index
    %203 = vector.load %arg5[%c0_136, %c0_137] : memref<1x128xf32, #tpu.memory_space<vmem>>, vector<1x128xf32>
    %204 = vector.broadcast %203 : vector<1x128xf32> to vector<256x128xf32>
    %205 = arith.addf %202, %204 : vector<256x128xf32>
    %206 = vector.shape_cast %5 : vector<16x16x128xbf16> to vector<256x128xbf16>
    %c0_138 = arith.constant 0 : index
    %c0_139 = arith.constant 0 : index
    %207 = vector.load %arg6[%c0_138, %c0_139] : memref<128x128xbf16, #tpu.memory_space<vmem>>, vector<128x128xbf16>
    %cst_140 = arith.constant dense<0.000000e+00> : vector<256x128xf32>
    %208 = tpu.matmul %206, %207, %cst_140 {dimension_numbers = #tpu.dot_dimension_numbers<[1], [0], [0], [1], [0, 0, 1, 1], [], []>} : vector<256x128xbf16>, vector<128x128xbf16>, vector<256x128xf32> -> vector<256x128xf32>
    %c0_141 = arith.constant 0 : index
    %c0_142 = arith.constant 0 : index
    %209 = vector.load %arg7[%c0_141, %c0_142] : memref<1x128xf32, #tpu.memory_space<vmem>>, vector<1x128xf32>
    %210 = vector.broadcast %209 : vector<1x128xf32> to vector<256x128xf32>
    %211 = arith.addf %208, %210 : vector<256x128xf32>
    %212 = arith.addf %205, %211 : vector<256x128xf32>
    %cst_143 = arith.constant 0.000000e+00 : f32
    %213 = vector.broadcast %cst_143 : f32 to vector<256x128xf32>
    %214 = arith.maximumf %212, %213 : vector<256x128xf32>
    %215 = vector.shape_cast %214 : vector<256x128xf32> to vector<16x16x128xf32>
    %c0_144 = arith.constant 0 : index
    %c0_145 = arith.constant 0 : index
    %c0_146 = arith.constant 0 : index
    %c0_147 = arith.constant 0 : index
    %216 = vector.load %arg8[%c0_144, %c0_145, %c0_146, %c0_147] : memref<1x16x16x128xf32, #tpu.memory_space<vmem>>, vector<1x16x16x128xf32>
    %217 = vector.shape_cast %216 : vector<1x16x16x128xf32> to vector<16x16x128xf32>
    %218 = vector.shape_cast %215 : vector<16x16x128xf32> to vector<1x16x16x128xf32>
    tpu.vector_store %arg8[%c0_144, %c0_145, %c0_146, %c0_147], %218 {strides = array<i32>} : memref<1x16x16x128xf32, #tpu.memory_space<vmem>>, vector<1x16x16x128xf32>,
    return
  }
  func.func @transform_0(%arg0: i32) -> (i32, i32, i32, i32) {
    %c0_i32 = arith.constant 0 : i32
    %c0_i32_0 = arith.constant 0 : i32
    %c0_i32_1 = arith.constant 0 : i32
    %c0_i32_2 = arith.constant 0 : i32
    return %arg0, %c0_i32, %c0_i32_0, %c0_i32_1 : i32, i32, i32, i32
  }
  func.func @transform_1(%arg0: i32) -> (i32, i32, i32) {
    %c0_i32 = arith.constant 0 : i32
    %c0_i32_0 = arith.constant 0 : i32
    %c0_i32_1 = arith.constant 0 : i32
    %c0_i32_2 = arith.constant 0 : i32
    return %c0_i32, %c0_i32_0, %c0_i32_1 : i32, i32, i32
  }
  func.func @transform_2(%arg0: i32) -> (i32, i32) {
    %c0_i32 = arith.constant 0 : i32
    %c0_i32_0 = arith.constant 0 : i32
    %c0_i32_1 = arith.constant 0 : i32
    return %c0_i32, %c0_i32_0 : i32, i32
  }
  func.func @transform_3(%arg0: i32) -> (i32, i32, i32) {
    %c0_i32 = arith.constant 0 : i32
    %c0_i32_0 = arith.constant 0 : i32
    %c0_i32_1 = arith.constant 0 : i32
    %c0_i32_2 = arith.constant 0 : i32
    return %c0_i32, %c0_i32_0, %c0_i32_1 : i32, i32, i32
  }
  func.func @transform_4(%arg0: i32) -> (i32, i32) {
    %c0_i32 = arith.constant 0 : i32
    %c0_i32_0 = arith.constant 0 : i32
    %c0_i32_1 = arith.constant 0 : i32
    return %c0_i32, %c0_i32_0 : i32, i32
  }
  func.func @transform_5(%arg0: i32) -> (i32, i32) {
    %c0_i32 = arith.constant 0 : i32
    %c0_i32_0 = arith.constant 0 : i32
    %c0_i32_1 = arith.constant 0 : i32
    return %c0_i32, %c0_i32_0 : i32, i32
  }
  func.func @transform_6(%arg0: i32) -> (i32, i32) {
    %c0_i32 = arith.constant 0 : i32
    %c0_i32_0 = arith.constant 0 : i32
    %c0_i32_1 = arith.constant 0 : i32
    return %c0_i32, %c0_i32_0 : i32, i32
  }
  func.func @transform_7(%arg0: i32) -> (i32, i32, i32, i32) {
    %c0_i32 = arith.constant 0 : i32
    %c0_i32_0 = arith.constant 0 : i32
    %c0_i32_1 = arith.constant 0 : i32
    %c0_i32_2 = arith.constant 0 : i32
    return %arg0, %c0_i32, %c0_i32_0, %c0_i32_1 : i32, i32, i32, i32
  }
}

</mosaic_0001>

<bundles_post_ra>
// kernel: resnet_basic_layer_forward.1
= control target key start
LH: loop header
LB: loop body
LE: loop exit
PB: predicated region body
PF: predicated region fallthrough
CT: control target
= control target key end

     0   :  { %s10498_s24 = smov 0   ;;  %s12568_s0 = inlined_call_operand.vmem [shape: bf16[2,16,16,128], index: 0, kind: input, shape index: {}]   ;;  %s12569_s1 = inlined_call_operand.vmem [shape: bf16[9,128,128], index: 1, kind: input, shape index: {}]   ;;  %s12570_s2 = inlined_call_operand.vmem [shape: f32[1,128], index: 2, kind: input, shape index: {}]   ;;  %s12571_s3 = inlined_call_operand.vmem [shape: bf16[9,128,128], index: 3, kind: input, shape index: {}]   ;;  %s12572_s4 = inlined_call_operand.vmem [shape: f32[1,128], index: 4, kind: input, shape index: {}]   ;;  %s12573_s5 = inlined_call_operand.vmem [shape: bf16[128,128], index: 5, kind: input, shape index: {}]   ;;  %s12574_s6 = inlined_call_operand.vmem [shape: f32[1,128], index: 6, kind: input, shape index: {}]   ;;  %s12575_s7 = inlined_call_operand.vmem [shape: f32[2,16,16,128], index: 7, kind: output, shape index: {}]  }
   0x1 LB: > { %s7228_s25 = sadd.s32 4294967295, %s10453_s24   ;;  %p7232_p0 = scmp.ge.s32.totalorder %s10453_s24, 1  ;;  %s10453_s24 = sphi %s10498_s24, %s17_s24  }
   0x2   : > { %p237_p1 = scmp.lt.s32.totalorder %s10453_s24, 3 }
   0x4   : > { %p238_p2 = pnand %p7232_p0, %p237_p1 }
   0x6   : > { %241 = sbr.rel (%p238_p2) target bundleno = 1631 (0x65f), region = 48 }
   0xd   : > { %v10263_v0 = vld [vmem:[%s12569_s1 + $0x40] sm:$0xff]   ;;  %v10264_v1 = vld [vmem:[%s12569_s1 + $0x48] sm:$0xff]   ;;  %v12576_v2 = vmov 0.0|0.0   ;;  %p269_p3 = scmp.lt.s32.totalorder %s7228_s25, 1  ;;  %v10265_v3 = vld [vmem:[%s12569_s1 + $0x50] sm:$0xff]   ;;  %v481_v4 = vlaneseq  ;;  %v12578_v27 = vmov 0.0  }
   0xe   : > { %8732 = vmatprep.mubr.bf16.mxu0 %v12576_v2  ;;  %8716 = vmatprep.subr.bf16.mxu0 %v10263_v0  ;;  %v10266_v5 = vld [vmem:[%s12569_s1 + $0x58] sm:$0xff]   ;;  %v10267_v12 = vld [vmem:[%s12569_s1 + $0x60] sm:$0xff]   ;;  %v10268_v16 = vld [vmem:[%s12569_s1 + $0x68] sm:$0xff]   ;;  %v10569_v28 = vrot.slane %v12578_v27, 7  ;;  %vm10457_vm3 = vmmov 1  }
   0xf   : > { %8717 = vmatpush3.bf16.msra.mxu0 %v10263_v0  ;;  %s12694_s25 = smov (!%p269_p3, %s7228_s25), 1  ;;  %v10530_v7 = vshrl.u32 %v481_v4, 7  ;;  %v10269_v17 = vld [vmem:[%s12569_s1 + $0x70] sm:$0xff]   ;;  %v10270_v23 = vld [vmem:[%s12569_s1 + $0x78] sm:$0xff]   ;;  %v10272_v30 = vld [vmem:[%s12569_s1] sm:$0xff]  }
  0x10   : > { %8718 = vmatprep.subr.bf16.mxu0 %v10264_v1  ;;  %s8242_s9 = sshll.u32 %s12694_s25, 7  ;;  %v10275_v49 = vld [vmem:[%s12569_s1 + $0x8] sm:$0xff]   ;;  %s8243_s28 = sshll.u32 %s12694_s25, 8 }
  0x11   : > { %s10522_s12 = scalar_lea.vmem %s12568_s0, %s8242_s9  ;;  %vm1098_vm0 = vcmp.lt.s32.totalorder %v10530_v7, 7  ;;  %vm549_vm1 = vcmp.ge.s32.totalorder %v10530_v7, 1  ;;  %vm516_vm2 = vcmp.lt.s32.totalorder %v10530_v7, 1  ;;  %s12496_s30 = scalar_lea.vmem %s12575_s7, %s8243_s28 }
  0x12   : > { %v10528_v6 = vld [vmem:[%s10522_s12] sm:$0xff]   ;;  %v10551_v18 = vld [vmem:[%s10522_s12 + $0x8] sm:$0xff]   ;;  %v10556_v21 = vld [vmem:[%s10522_s12 + $0x10] sm:$0xff]  }
  0x13   : > { %8719 = vmatpush3.bf16.msra.mxu0 %v10264_v1  ;;  %12620 = vst [vmem:[#allocation4_spill] sm:$0xff] %v10528_v6  ;;  %v384_v8 = vunpack.c.l.bf16 %v10528_v6  ;;  %v385_v9 = vunpack.c.h.bf16 %v10528_v6  ;;  %12621 = vst [vmem:[#allocation5_spill] sm:$0xff] %v10551_v18  ;;  %v386_v19 = vunpack.c.l.bf16 %v10551_v18  ;;  %v387_v20 = vunpack.c.h.bf16 %v10551_v18  ;;  %v10566_v26 = vld [vmem:[%s10522_s12 + $0x18] sm:$0xff]   ;;  %v10582_v34 = vld [vmem:[%s10522_s12 + $0x20] sm:$0xff]  }
  0x14   : > { %8720 = vmatprep.subr.bf16.mxu0 %v10265_v3  ;;  %12622 = vst [vmem:[#allocation6_spill] sm:$0xff] %v10556_v21  ;;  %v388_v22 = vunpack.c.l.bf16 %v10556_v21  ;;  %v389_v24 = vunpack.c.h.bf16 %v10556_v21  ;;  %12623 = vst [vmem:[#allocation7_spill] sm:$0xff] %v10566_v26  ;;  %v390_v33 = vunpack.c.l.bf16 %v10566_v26  ;;  %v391_v38 = vunpack.c.h.bf16 %v10566_v26  ;;  %v10592_v39 = vld [vmem:[%s10522_s12 + $0x28] sm:$0xff]   ;;  %v10607_v48 = vld [vmem:[%s10522_s12 + $0x30] sm:$0xff]  }
  0x15   : > { %v1067_v10 = vrot.slane %v384_v8, 1  ;;  %v1083_v11 = vrot.slane %v385_v9, 1  ;;  %v10563_v25 = vrot.slane %v384_v8, 7  ;;  %v10571_v29 = vrot.slane %v385_v9, 7  ;;  %12624 = vst [vmem:[#allocation8_spill] sm:$0xff] %v10582_v34  ;;  %12625 = vst [vmem:[#allocation9_spill] sm:$0xff] %v10592_v39 }
  0x16   : > { %v10576_v31 = vrot.slane %v386_v19, 7  ;;  %v10578_v32 = vrot.slane %v387_v20, 7  ;;  %v10584_v35 = vrot.slane %v386_v19, 1  ;;  %v10586_v36 = vrot.slane %v387_v20, 1  ;;  %12626 = vst [vmem:[#allocation10_spill] sm:$0xff] %v10607_v48  ;;  %v10636_v62 = vld [vmem:[%s10522_s12 + $0x38] sm:$0xff]   ;;  %vm10890_vm4 = vmpackc.low %vm10457_vm3, %vm549_vm1 }
  0x17   : > { %8721 = vmatpush3.bf16.msra.mxu0 %v10265_v3  ;;  %v1100_v13 = vsel %vm1098_vm0, %v1067_v10, %v1083_v11  ;;  %v1116_v14 = vsel %vm1098_vm0, %v1083_v11, %v1067_v10  ;;  %v10588_v37 = vrot.slane %v388_v22, 7  ;;  %v10594_v40 = vrot.slane %v389_v24, 7  ;;  %12627 = vst [vmem:[#allocation11_spill] sm:$0xff] %v10636_v62  ;;  %v10646_v4 = vld [vmem:[%s10522_s12 + $0x40] sm:$0xff]   ;;  %v10678_v20 = vld [vmem:[%s10522_s12 + $0x50] sm:$0xff]  }
  0x18   : > { %8722 = vmatprep.subr.bf16.mxu0 %v10266_v5  ;;  %v10542_v15 = vpack.c.bf16 %v1116_v14, %v1100_v13  ;;  %v10596_v41 = vrot.slane %v388_v22, 1  ;;  %v392_v42 = vunpack.c.l.bf16 %v10582_v34  ;;  %v393_v43 = vunpack.c.h.bf16 %v10582_v34  ;;  %12628 = vst [vmem:[#allocation12_spill] sm:$0xff] %v10646_v4  ;;  %v10664_v14 = vld [vmem:[%s10522_s12 + $0x48] sm:$0xff]   ;;  %12630 = vst [vmem:[#allocation14_spill] sm:$0xff] %v10678_v20 }
  0x19   : > { %v10600_v44 = vrot.slane %v389_v24, 1  ;;  %v10602_v45 = vrot.slane %v390_v33, 7  ;;  %v394_v46 = vunpack.c.l.bf16 %v10592_v39  ;;  %v395_v47 = vunpack.c.h.bf16 %v10592_v39  ;;  %12629 = vst [vmem:[#allocation13_spill] sm:$0xff] %v10664_v14 }
  0x1a   : > { %v10612_v50 = vrot.slane %v391_v38, 7  ;;  %v10614_v51 = vrot.slane %v390_v33, 1  ;;  %v10616_v52 = vrot.slane %v391_v38, 1  ;;  %v396_v53 = vunpack.c.l.bf16 %v10607_v48  ;;  %v10284_v33 = vld [vmem:[%s12569_s1 + $0x20] sm:$0xff]  }
  0x1b   : > { %8723 = vmatpush3.bf16.msra.mxu0 %v10266_v5  ;;  %v10619_v54 = vrot.slane %v392_v42, 7  ;;  %v10621_v55 = vrot.slane %v393_v43, 7  ;;  %v10623_v56 = vrot.slane %v392_v42, 1  ;;  %v10625_v57 = vrot.slane %v393_v43, 1  ;;  %v10278_v5 = vld [vmem:[%s12569_s1 + $0x10] sm:$0xff]  }
  0x1c   : > { %8724 = vmatprep.subr.bf16.mxu0 %v10267_v12  ;;  %v10628_v58 = vrot.slane %v394_v46, 7  ;;  %v10630_v59 = vrot.slane %v395_v47, 7  ;;  %v10632_v60 = vrot.slane %v394_v46, 1  ;;  %v397_v61 = vunpack.c.h.bf16 %v10607_v48 }
  0x1d   : > { %v10639_v63 = vrot.slane %v395_v47, 1  ;;  %v10641_v0 = vrot.slane %v396_v53, 7  ;;  %v398_v1 = vunpack.c.l.bf16 %v10636_v62  ;;  %v399_v3 = vunpack.c.h.bf16 %v10636_v62  ;;  %v10706_v47 = vld [vmem:[%s10522_s12 + $0x58] sm:$0xff]  }
  0x1e   : > { %v1073_v8 = vrot.slane %v396_v53, 1  ;;  %v1089_v9 = vrot.slane %v397_v61, 1  ;;  %v12586_v10 = vunpack.c.l.bf16 %v10646_v4  ;;  %v12585_v11 = vunpack.c.h.bf16 %v10646_v4  ;;  %12631 = vst [vmem:[#allocation15_spill] sm:$0xff] %v10706_v47  ;;  %v10287_v53 = vld [vmem:[%s12569_s1 + $0x28] sm:$0xff]  }
  0x1f   : > { %8725 = vmatpush3.bf16.msra.mxu0 %v10267_v12  ;;  %v10657_v12 = vrot.slane %v398_v1, 1  ;;  %v10661_v13 = vrot.slane %v399_v3, 1  ;;  %v12584_v22 = vunpack.c.l.bf16 %v10664_v14  ;;  %v12580_v24 = vunpack.c.l.bf16 %v10678_v20 }
  0x20   : > { %8726 = vmatprep.subr.bf16.mxu0 %v10268_v16  ;;  %v10675_v19 = vrot.slane %v12585_v11, 1  ;;  %v12582_v2 = vunpack.c.l.bf16 %v10706_v47 }
  0x21   : > { %v10690_v38 = vrot.slane %v12584_v22, 1  ;;  %v10699_v43 = vrot.slane %v12580_v24, 1  ;;  %v1103_v22 = vsel %vm1098_vm0, %v10614_v51, %v10616_v52 }
  0x22   : > { %v10718_v27 = vrot.slane %v12582_v2, 1  ;;  %v1102_v2 = vsel %vm1098_vm0, %v10596_v41, %v10600_v44 }
  0x23   : > { %8727 = vmatpush3.bf16.msra.mxu0 %v10268_v16  ;;  %v10281_v16 = vld [vmem:[%s12569_s1 + $0x18] sm:$0xff]  }
  0x24   : > { %8728 = vmatprep.subr.bf16.mxu0 %v10269_v17 }
  0x27   : > { %8729 = vmatpush3.bf16.msra.mxu0 %v10269_v17  ;;  %v10671_v17 = vrot.slane %v12586_v10, 1 }
  0x28   : > { %8730 = vmatprep.subr.bf16.mxu0 %v10270_v23 }
  0x2b   : > { %8731 = vmatpush3.bf16.msra.mxu0 %v10270_v23  ;;  %v12581_v23 = vunpack.c.h.bf16 %v10664_v14 }
  0x2c   : > { %8764 = vmatprep.subr.bf16.mxu0 %v10272_v30 }
  0x2d   : > { %v10694_v42 = vrot.slane %v12581_v23, 1  ;;  %v1101_v23 = vsel %vm1098_vm0, %v10584_v35, %v10586_v36 }
  0x2e   : > { %8733 = vmatmul.mubr.bf16.vlgmr.msra.gmra.mrb[0].mxu0 %v10528_v6 }
  0x2f   : > { %8765 = vmatpush3.bf16.msra.mxu0 %v10272_v30  ;;  %8736 = vmatprep.mubr.bf16.mxu0 %v10551_v18  ;;  %v12579_v30 = vunpack.c.h.bf16 %v10678_v20 }
  0x30   : > { %8766 = vmatprep.subr.bf16.mxu0 %v10275_v49 }
  0x31   : > { %v10703_v46 = vrot.slane %v12579_v30, 1 }
  0x33   : > { %8767 = vmatpush3.bf16.msra.mxu0 %v10275_v49  ;;  %v10709_v49 = vld [vmem:[%s10522_s12 + $0x60] sm:$0xff]  }
  0x34   : > { %8768 = vmatprep.subr.bf16.mxu0 %v10278_v5  ;;  %12632 = vst [vmem:[#allocation16_spill] sm:$0xff] %v10709_v49  ;;  %v12587_v24 = vunpack.c.l.bf16 %v10709_v49 }
  0x36   : > { %8737 = vmatmul.mubr.bf16.gmra.mrb[4].mxu0 %v10556_v21 }
  0x37   : > { %8740 = vmatprep.mubr.bf16.mxu0 %v10566_v26  ;;  %8769 = vmatpush3.bf16.msra.mxu0 %v10278_v5  ;;  %v12583_v5 = vunpack.c.h.bf16 %v10706_v47 }
  0x38   : > { %8770 = vmatprep.subr.bf16.mxu0 %v10281_v16 }
  0x39   : > { %v10722_v30 = vrot.slane %v12583_v5, 1  ;;  %v1118_v5 = vsel %vm1098_vm0, %v10600_v44, %v10596_v41  ;;  %v1119_v41 = vsel %vm1098_vm0, %v10616_v52, %v10614_v51  ;;  %v1105_v51 = vsel %vm1098_vm0, %v10632_v60, %v10639_v63 }
  0x3a   : > { %v10753_v10 = vpack.c.bf16 %v1118_v5, %v1102_v2  ;;  %v10760_v44 = vpack.c.bf16 %v1119_v41, %v1103_v22  ;;  %v1120_v2 = vsel %vm1098_vm0, %v10625_v57, %v10623_v56  ;;  %v1121_v52 = vsel %vm1098_vm0, %v10639_v63, %v10632_v60 }
  0x3b   : > { %8771 = vmatpush3.bf16.msra.mxu0 %v10281_v16  ;;  %v1117_v16 = vsel %vm1098_vm0, %v10586_v36, %v10584_v35  ;;  %v1079_v35 = vrot.slane %v12587_v24, 1  ;;  %v10290_v36 = vld [vmem:[%s12569_s1 + $0x30] sm:$0xff]   ;;  %v1104_v24 = vsel %vm1098_vm0, %v10623_v56, %v10625_v57  ;;  %v1106_v22 = vsel %vm1098_vm0, %v1073_v8, %v1089_v9  ;;  %v10293_v57 = vld [vmem:[%s12569_s1 + $0x38] sm:$0xff]  }
  0x3c   : > { %8772 = vmatprep.subr.bf16.mxu0 %v10284_v33  ;;  %v10751_v11 = vpack.c.bf16 %v1117_v16, %v1101_v23  ;;  %v10770_v23 = vpack.c.bf16 %v1120_v2, %v1104_v24  ;;  %v10785_v5 = vpack.c.bf16 %v1121_v52, %v1105_v51  ;;  %v1122_v56 = vsel %vm1098_vm0, %v1089_v9, %v1073_v8  ;;  %v10804_v9 = vld [vmem:[%s12569_s1 + $0x80] sm:$0xff]  }
  0x3d   : > { %v10792_v24 = vpack.c.bf16 %v1122_v56, %v1106_v22  ;;  %v409_v16 = vunpack.c.h.bf16 %v10709_v49  ;;  %v1123_v41 = vsel %vm1098_vm0, %v10661_v13, %v10657_v12  ;;  %v1108_v51 = vsel %vm1098_vm0, %v10671_v17, %v10675_v19  ;;  %v10828_v56 = vld [vmem:[%s10522_s12 + $0x70] sm:$0xff]  }
  0x3e   : > { %8741 = vmatmul.mubr.bf16.gmra.mrb[8].mxu0 %v10582_v34  ;;  %v1124_v52 = vsel %vm1098_vm0, %v10675_v19, %v10671_v17  ;;  %12634 = vst [vmem:[#allocation18_spill] sm:$0xff] %v10828_v56  ;;  %v1109_v19 = vsel %vm1098_vm0, %v10690_v38, %v10694_v42 }
  0x3f   : > { %8744 = vmatprep.mubr.bf16.mxu0 %v10592_v39  ;;  %8773 = vmatpush3.bf16.msra.mxu0 %v10284_v33  ;;  %v10783_v33 = vld [vmem:[%s10522_s12 + $0x68] sm:$0xff]   ;;  %v1095_v63 = vrot.slane %v409_v16, 1  ;;  %v10825_v22 = vpack.c.bf16 %v1124_v52, %v1108_v51  ;;  %v1126_v51 = vsel %vm1098_vm0, %v10703_v46, %v10699_v43 }
  0x40   : > { %8774 = vmatprep.subr.bf16.mxu0 %v10287_v53  ;;  %12633 = vst [vmem:[#allocation17_spill] sm:$0xff] %v10783_v33  ;;  %v410_v60 = vunpack.c.l.bf16 %v10783_v33 }
  0x42   : > { %v1080_v8 = vrot.slane %v410_v60, 1 }
  0x43   : > { %8775 = vmatpush3.bf16.msra.mxu0 %v10287_v53  ;;  %v1107_v53 = vsel %vm1098_vm0, %v10657_v12, %v10661_v13  ;;  %v411_v12 = vunpack.c.h.bf16 %v10783_v33  ;;  %v412_v13 = vunpack.c.l.bf16 %v10828_v56 }
  0x44   : > { %8776 = vmatprep.subr.bf16.mxu0 %v10290_v36  ;;  %v10815_v2 = vpack.c.bf16 %v1123_v41, %v1107_v53  ;;  %v1110_v41 = vsel %vm1098_vm0, %v10699_v43, %v10703_v46  ;;  %v1127_v43 = vsel %vm1098_vm0, %v10722_v30, %v10718_v27 }
  0x45   : > { %v1081_v17 = vrot.slane %v412_v13, 1  ;;  %v10857_v52 = vpack.c.bf16 %v1126_v51, %v1110_v41  ;;  %v1128_v41 = vsel %vm1098_vm0, %v1095_v63, %v1079_v35 }
  0x46   : > { %8745 = vmatmul.mubr.bf16.gmra.mrb[12].mxu0 %v10607_v48 }
  0x47   : > { %8748 = vmatprep.mubr.bf16.mxu0 %v10636_v62  ;;  %8777 = vmatpush3.bf16.msra.mxu0 %v10290_v36  ;;  %v1096_v36 = vrot.slane %v411_v12, 1 }
  0x48   : > { %8778 = vmatprep.subr.bf16.mxu0 %v10293_v57 }
  0x4b   : > { %8779 = vmatpush3.bf16.msra.mxu0 %v10293_v57  ;;  %v1125_v57 = vsel %vm1098_vm0, %v10694_v42, %v10690_v38  ;;  %v12588_v38 = vunpack.c.h.bf16 %v10828_v56 }
  0x4c   : > { %8812 = vmatprep.subr.bf16.mxu0 %v10804_v9  ;;  %v10847_v53 = vpack.c.bf16 %v1125_v57, %v1109_v19  ;;  %v1111_v19 = vsel %vm1098_vm0, %v10718_v27, %v10722_v30  ;;  %v1112_v57 = vsel %vm1098_vm0, %v1079_v35, %v1095_v63  ;;  %v492_v27 = vrot.slane %v398_v1, 7  ;;  %v10418_v30 = vld [vmem:[%s12571_s3 + $0x218] sm:$0xff]  }
  0x4d   : > { %v1097_v42 = vrot.slane %v12588_v38, 1  ;;  %v10873_v46 = vpack.c.bf16 %v1127_v43, %v1111_v19  ;;  %v10879_v51 = vpack.c.bf16 %v1128_v41, %v1112_v57  ;;  %v507_v38 = vrot.slane %v397_v61, 7 }
  0x4e   : > { %8749 = vmatmul.mubr.bf16.gmra.mrb[16].mxu0 %v10646_v4  ;;  %v1113_v35 = vsel %vm1098_vm0, %v1080_v8, %v1096_v36  ;;  %v1129_v63 = vsel %vm1098_vm0, %v1096_v36, %v1080_v8  ;;  %v10909_v57 = vpack.c.bf16 %v10569_v28, %v10569_v28  ;;  %v508_v41 = vrot.slane %v399_v3, 7 }
  0x4f   : > { %8752 = vmatprep.mubr.bf16.mxu0 %v10664_v14  ;;  %v10899_v61 = vpack.c.bf16 %v1129_v63, %v1113_v35  ;;  %v1114_v1 = vsel %vm1098_vm0, %v1081_v17, %v1097_v42  ;;  %v1130_v19 = vsel %vm1098_vm0, %v1097_v42, %v1081_v17  ;;  %v12637_v8 = vunpack.c.l.bf16 %v10646_v4 }
  0x50   : > { %v10905_v43 = vpack.c.bf16 %v1130_v19, %v1114_v1  ;;  %v518_v35 = vsel %vm516_vm2, %v10563_v25, %v10571_v29  ;;  %v534_v17 = vsel %vm516_vm2, %v10571_v29, %v10563_v25  ;;  %v519_v28 = vsel %vm516_vm2, %v10576_v31, %v10578_v32  ;;  %v10295_v25 = vld [vmem:[%s12569_s1 + $0x88] sm:$0xff]   ;;  %v10296_v19 = vld [vmem:[%s12569_s1 + $0x90] sm:$0xff]  }
  0x51   : > { %v493_v36 = vrot.slane %v12637_v8, 7  ;;  %v535_v3 = vsel %vm516_vm2, %v10578_v32, %v10576_v31  ;;  %v10935_v42 = vpack.c.bf16 %v518_v35, %v534_v17  ;;  %v12638_v63 = vunpack.c.h.bf16 %v10646_v4  ;;  %v10297_v17 = vld [vmem:[%s12569_s1 + $0x98] sm:$0xff]  }
  0x52   : > { %v10940_v29 = vpack.c.bf16 %v519_v28, %v535_v3  ;;  %v520_v31 = vsel %vm516_vm2, %v10588_v37, %v10594_v40  ;;  %v536_v32 = vsel %vm516_vm2, %v10594_v40, %v10588_v37  ;;  %v537_v8 = vsel %vm516_vm2, %v10612_v50, %v10602_v45 }
  0x53   : > { %v509_v1 = vrot.slane %v12638_v63, 7  ;;  %v10970_v35 = vpack.c.bf16 %v520_v31, %v536_v32  ;;  %v12639_v37 = vunpack.c.l.bf16 %v10664_v14  ;;  %v538_v3 = vsel %vm516_vm2, %v10621_v55, %v10619_v54  ;;  %v10299_v32 = vld [vmem:[%s12569_s1 + $0xa8] sm:$0xff]  }
  0x54   : > { %v539_v63 = vsel %vm516_vm2, %v10630_v59, %v10628_v58 }
  0x55   : > { %v494_v40 = vrot.slane %v12639_v37, 7 }
  0x56   : > { %8753 = vmatmul.mubr.bf16.gmra.mrb[20].mxu0 %v10678_v20 }
  0x57   : > { %8756 = vmatprep.mubr.bf16.mxu0 %v10706_v47 }
  0x5e   : > { %8757 = vmatmul.mubr.bf16.gmra.mrb[24].mxu0 %v10709_v49 }
  0x5f   : > { %8760 = vmatprep.mubr.bf16.mxu0 %v10783_v33 }
  0x66   : > { %8761 = vmatmul.mubr.bf16.gmra.mrb[28].mxu0 %v10828_v56 }
  0x67   : > { %8780 = vmatprep.mubr.msk.bf16.mxu0 %vm10890_vm4, %v10909_v57 }
  0x6e   : > { %8781 = vmatmul.mubr.msk.bf16.vlgmr.msra.gmra.mrb[0].mxu0 %vm10890_vm4, %v10935_v42 }
  0x6f   : > { %8813 = vmatpush3.bf16.msra.mxu0 %v10804_v9  ;;  %8784 = vmatprep.mubr.msk.bf16.mxu0 %vm10890_vm4, %v10940_v29  ;;  %v521_v9 = vsel %vm516_vm2, %v10602_v45, %v10612_v50  ;;  %v10298_v45 = vld [vmem:[%s12569_s1 + $0xa0] sm:$0xff]   ;;  %v522_v50 = vsel %vm516_vm2, %v10619_v54, %v10621_v55  ;;  %v12640_v54 = vunpack.c.h.bf16 %v10664_v14 }
  0x70   : > { %8814 = vmatprep.subr.bf16.mxu0 %v10295_v25  ;;  %v10975_v28 = vpack.c.bf16 %v521_v9, %v537_v8  ;;  %v11004_v31 = vpack.c.bf16 %v522_v50, %v538_v3  ;;  %v525_v8 = vsel %vm516_vm2, %v492_v27, %v508_v41  ;;  %v10301_v50 = vld [vmem:[%s12569_s1 + $0xb8] sm:$0xff]  }
  0x71   : > { %v510_v55 = vrot.slane %v12640_v54, 7  ;;  %v12642_v54 = vunpack.c.h.bf16 %v10678_v20 }
  0x73   : > { %8815 = vmatpush3.bf16.msra.mxu0 %v10295_v25  ;;  %v523_v25 = vsel %vm516_vm2, %v10628_v58, %v10630_v59  ;;  %v10300_v58 = vld [vmem:[%s12569_s1 + $0xb0] sm:$0xff]   ;;  %v524_v59 = vsel %vm516_vm2, %v10641_v0, %v507_v38 }
  0x74   : > { %8816 = vmatprep.subr.bf16.mxu0 %v10296_v19  ;;  %v11009_v9 = vpack.c.bf16 %v523_v25, %v539_v63  ;;  %v12641_v63 = vunpack.c.l.bf16 %v10678_v20 }
  0x76   : > { %8785 = vmatmul.mubr.msk.bf16.gmra.mrb[4].mxu0 %vm10890_vm4, %v10970_v35 }
  0x77   : > { %8788 = vmatprep.mubr.msk.bf16.mxu0 %vm10890_vm4, %v10975_v28  ;;  %8817 = vmatpush3.bf16.msra.mxu0 %v10296_v19  ;;  %v540_v19 = vsel %vm516_vm2, %v507_v38, %v10641_v0  ;;  %v10302_v0 = vld [vmem:[%s12569_s1 + $0xc0] sm:$0xff]   ;;  %v526_v38 = vsel %vm516_vm2, %v493_v36, %v509_v1 }
  0x78   : > { %8818 = vmatprep.subr.bf16.mxu0 %v10297_v17  ;;  %v11032_v37 = vpack.c.bf16 %v524_v59, %v540_v19  ;;  %v511_v59 = vrot.slane %v12642_v54, 7  ;;  %v498_v54 = vrot.slane %v410_v60, 7 }
  0x7b   : > { %8819 = vmatpush3.bf16.msra.mxu0 %v10297_v17  ;;  %v541_v17 = vsel %vm516_vm2, %v508_v41, %v492_v27  ;;  %v542_v27 = vsel %vm516_vm2, %v509_v1, %v493_v36  ;;  %v527_v41 = vsel %vm516_vm2, %v494_v40, %v510_v55  ;;  %v12643_v36 = vunpack.c.l.bf16 %v10706_v47 }
  0x7c   : > { %8820 = vmatprep.subr.bf16.mxu0 %v10298_v45  ;;  %v11037_v3 = vpack.c.bf16 %v525_v8, %v541_v17  ;;  %v11056_v25 = vpack.c.bf16 %v526_v38, %v542_v27  ;;  %v12645_v27 = vunpack.c.l.bf16 %v10709_v49 }
  0x7d   : > { %v496_v1 = vrot.slane %v12643_v36, 7 }
  0x7e   : > { %8789 = vmatmul.mubr.msk.bf16.gmra.mrb[8].mxu0 %vm10890_vm4, %v11004_v31 }
  0x7f   : > { %8792 = vmatprep.mubr.msk.bf16.mxu0 %vm10890_vm4, %v11009_v9  ;;  %8821 = vmatpush3.bf16.msra.mxu0 %v10298_v45  ;;  %v543_v45 = vsel %vm516_vm2, %v510_v55, %v494_v40 }
  0x80   : > { %8822 = vmatprep.subr.bf16.mxu0 %v10299_v32  ;;  %v11062_v19 = vpack.c.bf16 %v527_v41, %v543_v45  ;;  %v497_v41 = vrot.slane %v12645_v27, 7  ;;  %v513_v45 = vrot.slane %v409_v16, 7 }
  0x82   : > { %v546_v16 = vsel %vm516_vm2, %v513_v45, %v497_v41 }
  0x83   : > { %8823 = vmatpush3.bf16.msra.mxu0 %v10299_v32  ;;  %v495_v32 = vrot.slane %v12641_v63, 7 }
  0x84   : > { %8824 = vmatprep.subr.bf16.mxu0 %v10300_v58 }
  0x85   : > { %v528_v40 = vsel %vm516_vm2, %v495_v32, %v511_v59  ;;  %v544_v55 = vsel %vm516_vm2, %v511_v59, %v495_v32  ;;  %v514_v32 = vrot.slane %v411_v12, 7  ;;  %v530_v59 = vsel %vm516_vm2, %v497_v41, %v513_v45 }
  0x86   : > { %8793 = vmatmul.mubr.msk.bf16.gmra.mrb[12].mxu0 %vm10890_vm4, %v11032_v37  ;;  %v11082_v38 = vpack.c.bf16 %v528_v40, %v544_v55  ;;  %v11108_v36 = vpack.c.bf16 %v530_v59, %v546_v16  ;;  %v483_v55 = vadd.s32 8, %v10530_v7  ;;  %v10304_v59 = vld [vmem:[%s12569_s1 + $0xd0] sm:$0xff]   ;;  %v10305_v16 = vld [vmem:[%s12569_s1 + $0xd8] sm:$0xff]   ;;  %v10368_v7 = vld [vmem:[%s12571_s3 + $0x88] sm:$0xff]  }
  0x87   : > { %8796 = vmatprep.mubr.msk.bf16.mxu0 %vm10890_vm4, %v11037_v3  ;;  %8825 = vmatpush3.bf16.msra.mxu0 %v10300_v58  ;;  %v12644_v58 = vunpack.c.h.bf16 %v10706_v47  ;;  %v531_v60 = vsel %vm516_vm2, %v498_v54, %v514_v32  ;;  %v547_v12 = vsel %vm516_vm2, %v514_v32, %v498_v54  ;;  %v10303_v32 = vld [vmem:[%s12569_s1 + $0xc8] sm:$0xff]   ;;  %v12682_v54 = vld [vmem:[#allocation14_spill] sm:$0xff] }
  0x88   : > { %8826 = vmatprep.subr.bf16.mxu0 %v10301_v50  ;;  %v11114_v40 = vpack.c.bf16 %v531_v60, %v547_v12  ;;  %vm1132_vm5 = vcmp.le.s32.totalorder %v483_v55, 14  ;;  %v10307_v60 = vld [vmem:[%s12569_s1 + $0xe8] sm:$0xff]   ;;  %v10308_v12 = vld [vmem:[%s12569_s1 + $0xf0] sm:$0xff]  }
  0x89   : > { %v512_v8 = vrot.slane %v12644_v58, 7  ;;  %v12646_v58 = vunpack.c.h.bf16 %v10828_v56  ;;  %vm11133_vm6 = vmpackc.low %vm1132_vm5, %vm10457_vm3  ;;  %v10312_v55 = vld [vmem:[%s12569_s1 + $0x110] sm:$0xff]  }
  0x8b   : > { %8827 = vmatpush3.bf16.msra.mxu0 %v10301_v50  ;;  %v529_v17 = vsel %vm516_vm2, %v496_v1, %v512_v8  ;;  %v545_v50 = vsel %vm516_vm2, %v512_v8, %v496_v1  ;;  %v499_v1 = vrot.slane %v412_v13, 7  ;;  %v515_v8 = vrot.slane %v12646_v58, 7  ;;  %v10310_v58 = vld [vmem:[%s12569_s1 + $0x100] sm:$0xff]  }
  0x8c   : > { %8860 = vmatprep.subr.bf16.mxu0 %v10302_v0  ;;  %v11088_v63 = vpack.c.bf16 %v529_v17, %v545_v50  ;;  %v12647_v50 = vmov 0.0  }
  0x8d   : > { %v532_v17 = vsel %vm516_vm2, %v499_v1, %v515_v8  ;;  %v548_v13 = vsel %vm516_vm2, %v515_v8, %v499_v1  ;;  %v1066_v27 = vrot.slane %v12647_v50, 1  ;;  %v10309_v1 = vld [vmem:[%s12569_s1 + $0xf8] sm:$0xff]   ;;  %v10311_v8 = vld [vmem:[%s12569_s1 + $0x108] sm:$0xff]   ;;  %v10316_v50 = vld [vmem:[%s12569_s1 + $0x130] sm:$0xff]  }
  0x8e   : > { %8797 = vmatmul.mubr.msk.bf16.gmra.mrb[16].mxu0 %vm10890_vm4, %v11056_v25  ;;  %v11128_v41 = vpack.c.bf16 %v532_v17, %v548_v13  ;;  %v10314_v17 = vld [vmem:[%s12569_s1 + $0x120] sm:$0xff]   ;;  %v10315_v13 = vld [vmem:[%s12569_s1 + $0x128] sm:$0xff]  }
  0x8f   : > { %8800 = vmatprep.mubr.msk.bf16.mxu0 %vm10890_vm4, %v11062_v19  ;;  %v11130_v45 = vpack.c.bf16 %v1066_v27, %v1066_v27  ;;  %v10317_v27 = vld [vmem:[%s12569_s1 + $0x138] sm:$0xff]  }
  0x96   : > { %8801 = vmatmul.mubr.msk.bf16.gmra.mrb[20].mxu0 %vm10890_vm4, %v11082_v38 }
  0x97   : > { %8804 = vmatprep.mubr.msk.bf16.mxu0 %vm10890_vm4, %v11088_v63 }
  0x9e   : > { %8805 = vmatmul.mubr.msk.bf16.gmra.mrb[24].mxu0 %vm10890_vm4, %v11108_v36 }
  0x9f   : > { %8808 = vmatprep.mubr.msk.bf16.mxu0 %vm10890_vm4, %v11114_v40 }
  0xa6   : > { %8809 = vmatmul.mubr.msk.bf16.gmra.mrb[28].mxu0 %vm10890_vm4, %v11128_v41 }
  0xa7   : > { %8828 = vmatprep.mubr.msk.bf16.mxu0 %vm11133_vm6, %v11130_v45 }
  0xae   : > { %8829 = vmatmul.mubr.msk.bf16.vlgmr.msra.gmra.mrb[0].mxu0 %vm11133_vm6, %v10542_v15 }
  0xaf   : > { %8861 = vmatpush3.bf16.msra.mxu0 %v10302_v0  ;;  %8832 = vmatprep.mubr.msk.bf16.mxu0 %vm11133_vm6, %v10751_v11  ;;  %v10306_v0 = vld [vmem:[%s12569_s1 + $0xe0] sm:$0xff]  }
  0xb0   : > { %8862 = vmatprep.subr.bf16.mxu0 %v10303_v32 }
  0xb3   : > { %8863 = vmatpush3.bf16.msra.mxu0 %v10303_v32  ;;  %v10318_v32 = vld [vmem:[%s12569_s1 + $0x140] sm:$0xff]  }
  0xb4   : > { %8864 = vmatprep.subr.bf16.mxu0 %v10304_v59 }
  0xb6   : > { %8833 = vmatmul.mubr.msk.bf16.gmra.mrb[4].mxu0 %vm11133_vm6, %v10753_v10 }
  0xb7   : > { %8836 = vmatprep.mubr.msk.bf16.mxu0 %vm11133_vm6, %v10760_v44  ;;  %8865 = vmatpush3.bf16.msra.mxu0 %v10304_v59  ;;  %v11270_v59 = vld [vmem:[%s10522_s12 + $0x78] sm:$0xff]  }
  0xb8   : > { %8866 = vmatprep.subr.bf16.mxu0 %v10305_v16  ;;  %12650 = vst [vmem:[#allocation19_spill] sm:$0xff] %v11270_v59 }
  0xbb   : > { %8867 = vmatpush3.bf16.msra.mxu0 %v10305_v16  ;;  %v414_v16 = vunpack.c.l.bf16 %v11270_v59 }
  0xbc   : > { %8868 = vmatprep.subr.bf16.mxu0 %v10306_v0 }
  0xbe   : > { %8837 = vmatmul.mubr.msk.bf16.gmra.mrb[8].mxu0 %vm11133_vm6, %v10770_v23 }
  0xbf   : > { %8840 = vmatprep.mubr.msk.bf16.mxu0 %vm11133_vm6, %v10785_v5  ;;  %8869 = vmatpush3.bf16.msra.mxu0 %v10306_v0  ;;  %v415_v0 = vunpack.c.h.bf16 %v11270_v59 }
  0xc0   : > { %8870 = vmatprep.subr.bf16.mxu0 %v10307_v60 }
  0xc3   : > { %8871 = vmatpush3.bf16.msra.mxu0 %v10307_v60  ;;  %v1486_v60 = vrot.slane %v414_v16, 7 }
  0xc4   : > { %8872 = vmatprep.subr.bf16.mxu0 %v10308_v12 }
  0xc6   : > { %8841 = vmatmul.mubr.msk.bf16.gmra.mrb[12].mxu0 %vm11133_vm6, %v10792_v24 }
  0xc7   : > { %8844 = vmatprep.mubr.msk.bf16.mxu0 %vm11133_vm6, %v10815_v2  ;;  %8873 = vmatpush3.bf16.msra.mxu0 %v10308_v12  ;;  %v1502_v12 = vrot.slane %v415_v0, 7 }
  0xc8   : > { %8874 = vmatprep.subr.bf16.mxu0 %v10309_v1 }
  0xcb   : > { %8875 = vmatpush3.bf16.msra.mxu0 %v10309_v1  ;;  %v1518_v1 = vsel %vm516_vm2, %v1486_v60, %v1502_v12 }
  0xcc   : > { %8908 = vmatprep.subr.bf16.mxu0 %v10310_v58 }
  0xce   : > { %8845 = vmatmul.mubr.msk.bf16.gmra.mrb[16].mxu0 %vm11133_vm6, %v10825_v22 }
  0xcf   : > { %8848 = vmatprep.mubr.msk.bf16.mxu0 %vm11133_vm6, %v10847_v53 }
  0xd6   : > { %8849 = vmatmul.mubr.msk.bf16.gmra.mrb[20].mxu0 %vm11133_vm6, %v10857_v52 }
  0xd7   : > { %8852 = vmatprep.mubr.msk.bf16.mxu0 %vm11133_vm6, %v10873_v46 }
  0xde   : > { %8853 = vmatmul.mubr.msk.bf16.gmra.mrb[24].mxu0 %vm11133_vm6, %v10879_v51 }
  0xdf   : > { %8856 = vmatprep.mubr.msk.bf16.mxu0 %vm11133_vm6, %v10899_v61 }
  0xe6   : > { %8857 = vmatmul.mubr.msk.bf16.gmra.mrb[28].mxu0 %vm11133_vm6, %v10905_v43 }
  0xe7   : > { %8876 = vmatprep.mubr.msk.bf16.mxu0 %vm10890_vm4, %v10935_v42  ;;  %v10313_v42 = vld [vmem:[%s12569_s1 + $0x118] sm:$0xff]  }
  0xee   : > { %8877 = vmatmul.mubr.msk.bf16.vlgmr.msra.gmra.mrb[0].mxu0 %vm10890_vm4, %v10940_v29 }
  0xef   : > { %8909 = vmatpush3.bf16.msra.mxu0 %v10310_v58  ;;  %8880 = vmatprep.mubr.msk.bf16.mxu0 %vm10890_vm4, %v10970_v35  ;;  %v1534_v58 = vsel %vm516_vm2, %v1502_v12, %v1486_v60  ;;  %v10327_v60 = vld [vmem:[%s12569_s1 + $0x180] sm:$0xff]   ;;  %v10328_v12 = vld [vmem:[%s12569_s1 + $0x188] sm:$0xff]  }
  0xf0   : > { %8910 = vmatprep.subr.bf16.mxu0 %v10311_v8 }
  0xf3   : > { %8911 = vmatpush3.bf16.msra.mxu0 %v10311_v8  ;;  %v11294_v8 = vpack.c.bf16 %v1518_v1, %v1534_v58  ;;  %v10329_v1 = vld [vmem:[%s12569_s1 + $0x190] sm:$0xff]   ;;  %v10331_v58 = vld [vmem:[%s12569_s1 + $0x1a0] sm:$0xff]  }
  0xf4   : > { %8912 = vmatprep.subr.bf16.mxu0 %v10312_v55 }
  0xf6   : > { %8881 = vmatmul.mubr.msk.bf16.gmra.mrb[4].mxu0 %vm10890_vm4, %v10975_v28 }
  0xf7   : > { %8884 = vmatprep.mubr.msk.bf16.mxu0 %vm10890_vm4, %v11004_v31  ;;  %8913 = vmatpush3.bf16.msra.mxu0 %v10312_v55  ;;  %v10319_v55 = vld [vmem:[%s12569_s1 + $0x148] sm:$0xff]  }
  0xf8   : > { %8914 = vmatprep.subr.bf16.mxu0 %v10313_v42 }
  0xfb   : > { %8915 = vmatpush3.bf16.msra.mxu0 %v10313_v42  ;;  %v10320_v42 = vld [vmem:[%s12569_s1 + $0x150] sm:$0xff]  }
  0xfc   : > { %8916 = vmatprep.subr.bf16.mxu0 %v10314_v17 }
  0xfe   : > { %8885 = vmatmul.mubr.msk.bf16.gmra.mrb[8].mxu0 %vm10890_vm4, %v11009_v9 }
  0xff   : > { %8888 = vmatprep.mubr.msk.bf16.mxu0 %vm10890_vm4, %v11032_v37  ;;  %8917 = vmatpush3.bf16.msra.mxu0 %v10314_v17  ;;  %v10321_v17 = vld [vmem:[%s12569_s1 + $0x158] sm:$0xff]  }
 0x100   : > { %8918 = vmatprep.subr.bf16.mxu0 %v10315_v13 }
 0x103   : > { %8919 = vmatpush3.bf16.msra.mxu0 %v10315_v13  ;;  %v10322_v13 = vld [vmem:[%s12569_s1 + $0x160] sm:$0xff]  }
 0x104   : > { %8920 = vmatprep.subr.bf16.mxu0 %v10316_v50 }
 0x106   : > { %8889 = vmatmul.mubr.msk.bf16.gmra.mrb[12].mxu0 %vm10890_vm4, %v11037_v3 }
 0x107   : > { %8892 = vmatprep.mubr.msk.bf16.mxu0 %vm10890_vm4, %v11056_v25  ;;  %8921 = vmatpush3.bf16.msra.mxu0 %v10316_v50  ;;  %v10323_v50 = vld [vmem:[%s12569_s1 + $0x168] sm:$0xff]  }
 0x108   : > { %8922 = vmatprep.subr.bf16.mxu0 %v10317_v27 }
 0x10b   : > { %8923 = vmatpush3.bf16.msra.mxu0 %v10317_v27  ;;  %v10324_v27 = vld [vmem:[%s12569_s1 + $0x170] sm:$0xff]  }
 0x10c   : > { %8956 = vmatprep.subr.bf16.mxu0 %v10318_v32 }
 0x10e   : > { %8893 = vmatmul.mubr.msk.bf16.gmra.mrb[16].mxu0 %vm10890_vm4, %v11062_v19 }
 0x10f   : > { %8896 = vmatprep.mubr.msk.bf16.mxu0 %vm10890_vm4, %v11082_v38 }
 0x116   : > { %8897 = vmatmul.mubr.msk.bf16.gmra.mrb[20].mxu0 %vm10890_vm4, %v11088_v63 }
 0x117   : > { %8900 = vmatprep.mubr.msk.bf16.mxu0 %vm10890_vm4, %v11108_v36 }
 0x11e   : > { %8901 = vmatmul.mubr.msk.bf16.gmra.mrb[24].mxu0 %vm10890_vm4, %v11114_v40 }
 0x11f   : > { %8904 = vmatprep.mubr.msk.bf16.mxu0 %vm10890_vm4, %v11128_v41 }
 0x126   : > { %8905 = vmatmul.mubr.msk.bf16.gmra.mrb[28].mxu0 %vm10890_vm4, %v11294_v8 }
 0x127   : > { %8924 = vmatprep.mubr.bf16.mxu0 %v10528_v6 }
 0x12e   : > { %8925 = vmatmul.mubr.bf16.vlgmr.msra.gmra.mrb[0].mxu0 %v10551_v18 }
 0x12f   : > { %8957 = vmatpush3.bf16.msra.mxu0 %v10318_v32  ;;  %8928 = vmatprep.mubr.bf16.mxu0 %v10556_v21  ;;  %v10326_v32 = vld [vmem:[%s12569_s1 + $0x178] sm:$0xff]  }
 0x130   : > { %8958 = vmatprep.subr.bf16.mxu0 %v10319_v55 }
 0x133   : > { %8959 = vmatpush3.bf16.msra.mxu0 %v10319_v55  ;;  %v10332_v55 = vld [vmem:[%s12569_s1 + $0x1a8] sm:$0xff]  }
 0x134   : > { %8960 = vmatprep.subr.bf16.mxu0 %v10320_v42 }
 0x136   : > { %8929 = vmatmul.mubr.bf16.gmra.mrb[4].mxu0 %v10566_v26 }
 0x137   : > { %8932 = vmatprep.mubr.bf16.mxu0 %v10582_v34  ;;  %8961 = vmatpush3.bf16.msra.mxu0 %v10320_v42  ;;  %v10333_v42 = vld [vmem:[%s12569_s1 + $0x1b0] sm:$0xff]  }
 0x138   : > { %8962 = vmatprep.subr.bf16.mxu0 %v10321_v17 }
 0x13b   : > { %8963 = vmatpush3.bf16.msra.mxu0 %v10321_v17  ;;  %v10334_v17 = vld [vmem:[%s12569_s1 + $0x1b8] sm:$0xff]  }
 0x13c   : > { %8964 = vmatprep.subr.bf16.mxu0 %v10322_v13 }
 0x13e   : > { %8933 = vmatmul.mubr.bf16.gmra.mrb[8].mxu0 %v10592_v39 }
 0x13f   : > { %8936 = vmatprep.mubr.bf16.mxu0 %v10607_v48  ;;  %8965 = vmatpush3.bf16.msra.mxu0 %v10322_v13  ;;  %v10335_v13 = vld [vmem:[%s12569_s1 + $0x1c0] sm:$0xff]  }
 0x140   : > { %8966 = vmatprep.subr.bf16.mxu0 %v10323_v50 }
 0x143   : > { %8967 = vmatpush3.bf16.msra.mxu0 %v10323_v50  ;;  %v2130_v50 = vrot.slane %v414_v16, 1  ;;  %v10336_v16 = vld [vmem:[%s12569_s1 + $0x1c8] sm:$0xff]  }
 0x144   : > { %8968 = vmatprep.subr.bf16.mxu0 %v10324_v27 }
 0x146   : > { %8937 = vmatmul.mubr.bf16.gmra.mrb[12].mxu0 %v10636_v62 }
 0x147   : > { %8940 = vmatprep.mubr.bf16.mxu0 %v10646_v4  ;;  %8969 = vmatpush3.bf16.msra.mxu0 %v10324_v27  ;;  %v2146_v27 = vrot.slane %v415_v0, 1  ;;  %v10337_v0 = vld [vmem:[%s12569_s1 + $0x1d0] sm:$0xff]  }
 0x148   : > { %8970 = vmatprep.subr.bf16.mxu0 %v10326_v32 }
 0x14b   : > { %8971 = vmatpush3.bf16.msra.mxu0 %v10326_v32  ;;  %v2162_v32 = vsel %vm1098_vm0, %v2130_v50, %v2146_v27 }
 0x14c   : > { %9004 = vmatprep.subr.bf16.mxu0 %v10327_v60 }
 0x14e   : > { %8941 = vmatmul.mubr.bf16.gmra.mrb[16].mxu0 %v10664_v14 }
 0x14f   : > { %8944 = vmatprep.mubr.bf16.mxu0 %v10678_v20 }
 0x156   : > { %8945 = vmatmul.mubr.bf16.gmra.mrb[20].mxu0 %v10706_v47 }
 0x157   : > { %8948 = vmatprep.mubr.bf16.mxu0 %v10709_v49 }
 0x15e   : > { %8949 = vmatmul.mubr.bf16.gmra.mrb[24].mxu0 %v10783_v33 }
 0x15f   : > { %8952 = vmatprep.mubr.bf16.mxu0 %v10828_v56 }
 0x166   : > { %8953 = vmatmul.mubr.bf16.gmra.mrb[28].mxu0 %v11270_v59 }
 0x167   : > { %8972 = vmatprep.mubr.msk.bf16.mxu0 %vm11133_vm6, %v10542_v15  ;;  %v10330_v15 = vld [vmem:[%s12569_s1 + $0x198] sm:$0xff]  }
 0x16e   : > { %8973 = vmatmul.mubr.msk.bf16.vlgmr.msra.gmra.mrb[0].mxu0 %vm11133_vm6, %v10751_v11 }
 0x16f   : > { %9005 = vmatpush3.bf16.msra.mxu0 %v10327_v60  ;;  %8976 = vmatprep.mubr.msk.bf16.mxu0 %vm11133_vm6, %v10753_v10  ;;  %v2178_v60 = vsel %vm1098_vm0, %v2146_v27, %v2130_v50 }
 0x170   : > { %9006 = vmatprep.subr.bf16.mxu0 %v10328_v12 }
 0x173   : > { %9007 = vmatpush3.bf16.msra.mxu0 %v10328_v12  ;;  %v11416_v12 = vpack.c.bf16 %v2178_v60, %v2162_v32 }
 0x174   : > { %9008 = vmatprep.subr.bf16.mxu0 %v10329_v1 }
 0x176   : > { %8977 = vmatmul.mubr.msk.bf16.gmra.mrb[4].mxu0 %vm11133_vm6, %v10760_v44 }
 0x177   : > { %8980 = vmatprep.mubr.msk.bf16.mxu0 %vm11133_vm6, %v10770_v23  ;;  %9009 = vmatpush3.bf16.msra.mxu0 %v10329_v1  ;;  %v10356_v1 = vld [vmem:[%s12571_s3 + $0x68] sm:$0xff]  }
 0x178   : > { %9010 = vmatprep.subr.bf16.mxu0 %v10330_v15 }
 0x17b   : > { %9011 = vmatpush3.bf16.msra.mxu0 %v10330_v15  ;;  %v10348_v15 = vld [vmem:[%s12569_s1 + $0x228] sm:$0xff]  }
 0x17c   : > { %9012 = vmatprep.subr.bf16.mxu0 %v10331_v58 }
 0x17e   : > { %8981 = vmatmul.mubr.msk.bf16.gmra.mrb[8].mxu0 %vm11133_vm6, %v10785_v5 }
 0x17f   : > { %8984 = vmatprep.mubr.msk.bf16.mxu0 %vm11133_vm6, %v10792_v24  ;;  %9013 = vmatpush3.bf16.msra.mxu0 %v10331_v58  ;;  %v10349_v58 = vld [vmem:[%s12569_s1 + $0x230] sm:$0xff]  }
 0x180   : > { %9014 = vmatprep.subr.bf16.mxu0 %v10332_v55 }
 0x183   : > { %9015 = vmatpush3.bf16.msra.mxu0 %v10332_v55  ;;  %v10350_v55 = vld [vmem:[%s12569_s1 + $0x238] sm:$0xff]  }
 0x184   : > { %9016 = vmatprep.subr.bf16.mxu0 %v10333_v42 }
 0x186   : > { %8985 = vmatmul.mubr.msk.bf16.gmra.mrb[12].mxu0 %vm11133_vm6, %v10815_v2 }
 0x187   : > { %8988 = vmatprep.mubr.msk.bf16.mxu0 %vm11133_vm6, %v10825_v22  ;;  %9017 = vmatpush3.bf16.msra.mxu0 %v10333_v42  ;;  %v12651_v42 = vmov 0.0|0.0  }
 0x188   : > { %9018 = vmatprep.subr.bf16.mxu0 %v10334_v17 }
 0x18b   : > { %9019 = vmatpush3.bf16.msra.mxu0 %v10334_v17 }
 0x18c   : > { %9052 = vmatprep.subr.bf16.mxu0 %v10335_v13 }
 0x18e   : > { %8989 = vmatmul.mubr.msk.bf16.gmra.mrb[16].mxu0 %vm11133_vm6, %v10847_v53 }
 0x18f   : > { %8992 = vmatprep.mubr.msk.bf16.mxu0 %vm11133_vm6, %v10857_v52 }
 0x196   : > { %8993 = vmatmul.mubr.msk.bf16.gmra.mrb[20].mxu0 %vm11133_vm6, %v10873_v46 }
 0x197   : > { %8996 = vmatprep.mubr.msk.bf16.mxu0 %vm11133_vm6, %v10879_v51 }
 0x19e   : > { %8997 = vmatmul.mubr.msk.bf16.gmra.mrb[24].mxu0 %vm11133_vm6, %v10899_v61 }
 0x19f   : > { %9000 = vmatprep.mubr.msk.bf16.mxu0 %vm11133_vm6, %v10905_v43 }
 0x1a6   : > { %9001 = vmatmul.mubr.msk.bf16.gmra.mrb[28].mxu0 %vm11133_vm6, %v11416_v12 }
 0x1a7   : > { %9020 = vmatprep.mubr.msk.bf16.mxu0 %vm10890_vm4, %v10940_v29  ;;  %v10338_v29 = vld [vmem:[%s12569_s1 + $0x1d8] sm:$0xff]  }
 0x1ae   : > { %9021 = vmatmul.mubr.msk.bf16.vlgmr.msra.gmra.mrb[0].mxu0 %vm10890_vm4, %v10970_v35  ;;  %v10339_v35 = vld [vmem:[%s12569_s1 + $0x1e0] sm:$0xff]  }
 0x1af   : > { %9053 = vmatpush3.bf16.msra.mxu0 %v10335_v13  ;;  %9024 = vmatprep.mubr.msk.bf16.mxu0 %vm10890_vm4, %v10975_v28  ;;  %v10340_v28 = vld [vmem:[%s12569_s1 + $0x1e8] sm:$0xff]  }
 0x1b0   : > { %9054 = vmatprep.subr.bf16.mxu0 %v10336_v16 }
 0x1b3   : > { %9055 = vmatpush3.bf16.msra.mxu0 %v10336_v16 }
 0x1b4   : > { %9056 = vmatprep.subr.bf16.mxu0 %v10337_v0 }
 0x1b6   : > { %9025 = vmatmul.mubr.msk.bf16.gmra.mrb[4].mxu0 %vm10890_vm4, %v11004_v31  ;;  %v10341_v31 = vld [vmem:[%s12569_s1 + $0x1f0] sm:$0xff]  }
 0x1b7   : > { %9028 = vmatprep.mubr.msk.bf16.mxu0 %vm10890_vm4, %v11009_v9  ;;  %9057 = vmatpush3.bf16.msra.mxu0 %v10337_v0  ;;  %v10342_v9 = vld [vmem:[%s12569_s1 + $0x1f8] sm:$0xff]  }
 0x1b8   : > { %9058 = vmatprep.subr.bf16.mxu0 %v10338_v29 }
 0x1bb   : > { %9059 = vmatpush3.bf16.msra.mxu0 %v10338_v29 }
 0x1bc   : > { %9060 = vmatprep.subr.bf16.mxu0 %v10339_v35 }
 0x1be   : > { %9029 = vmatmul.mubr.msk.bf16.gmra.mrb[8].mxu0 %vm10890_vm4, %v11032_v37  ;;  %v10343_v37 = vld [vmem:[%s12569_s1 + $0x200] sm:$0xff]  }
 0x1bf   : > { %9032 = vmatprep.mubr.msk.bf16.mxu0 %vm10890_vm4, %v11037_v3  ;;  %9061 = vmatpush3.bf16.msra.mxu0 %v10339_v35  ;;  %v10351_v3 = vld [vmem:[%s12571_s3 + $0x40] sm:$0xff]  }
 0x1c0   : > { %9062 = vmatprep.subr.bf16.mxu0 %v10340_v28  ;;  %9628 = vmatprep.subr.bf16.mxu1 %v10351_v3 }
 0x1c1   : > { %9636 = vmatpush3.bf16.msra.mxu1 %v10351_v3 }
 0x1c3   : > { %9063 = vmatpush3.bf16.msra.mxu0 %v10340_v28 }
 0x1c4   : > { %9064 = vmatprep.subr.bf16.mxu0 %v10341_v31 }
 0x1c6   : > { %9033 = vmatmul.mubr.msk.bf16.gmra.mrb[12].mxu0 %vm10890_vm4, %v11056_v25  ;;  %v10352_v25 = vld [vmem:[%s12571_s3 + $0x48] sm:$0xff]  }
 0x1c7   : > { %9036 = vmatprep.mubr.msk.bf16.mxu0 %vm10890_vm4, %v11062_v19  ;;  %9065 = vmatpush3.bf16.msra.mxu0 %v10341_v31  ;;  %v10344_v19 = vld [vmem:[%s12569_s1 + $0x208] sm:$0xff]  }
 0x1c8   : > { %9066 = vmatprep.subr.bf16.mxu0 %v10342_v9  ;;  %9629 = vmatprep.subr.bf16.mxu1 %v10352_v25 }
 0x1c9   : > { %9637 = vmatpush3.bf16.msra.mxu1 %v10352_v25 }
 0x1cb   : > { %9067 = vmatpush3.bf16.msra.mxu0 %v10342_v9 }
 0x1cc   : > { %9100 = vmatprep.subr.bf16.mxu0 %v10343_v37 }
 0x1ce   : > { %9037 = vmatmul.mubr.msk.bf16.gmra.mrb[16].mxu0 %vm10890_vm4, %v11082_v38  ;;  %v10353_v38 = vld [vmem:[%s12571_s3 + $0x50] sm:$0xff]  }
 0x1cf   : > { %9040 = vmatprep.mubr.msk.bf16.mxu0 %vm10890_vm4, %v11088_v63  ;;  %9630 = vmatprep.subr.bf16.mxu1 %v10353_v38  ;;  %v10345_v63 = vld [vmem:[%s12569_s1 + $0x210] sm:$0xff]  }
 0x1d0   : > { %9638 = vmatpush3.bf16.msra.mxu1 %v10353_v38 }
 0x1d6   : > { %9041 = vmatmul.mubr.msk.bf16.gmra.mrb[20].mxu0 %vm10890_vm4, %v11108_v36  ;;  %v10354_v36 = vld [vmem:[%s12571_s3 + $0x58] sm:$0xff]  }
 0x1d7   : > { %9044 = vmatprep.mubr.msk.bf16.mxu0 %vm10890_vm4, %v11114_v40  ;;  %9631 = vmatprep.subr.bf16.mxu1 %v10354_v36  ;;  %v10346_v40 = vld [vmem:[%s12569_s1 + $0x218] sm:$0xff]  }
 0x1d8   : > { %9639 = vmatpush3.bf16.msra.mxu1 %v10354_v36 }
 0x1de   : > { %9045 = vmatmul.mubr.msk.bf16.gmra.mrb[24].mxu0 %vm10890_vm4, %v11128_v41  ;;  %v10355_v41 = vld [vmem:[%s12571_s3 + $0x60] sm:$0xff]  }
 0x1df   : > { %9048 = vmatprep.mubr.msk.bf16.mxu0 %vm10890_vm4, %v11294_v8  ;;  %9632 = vmatprep.subr.bf16.mxu1 %v10355_v41  ;;  %v10347_v8 = vld [vmem:[%s12569_s1 + $0x220] sm:$0xff]  }
 0x1e0   : > { %9640 = vmatpush3.bf16.msra.mxu1 %v10355_v41 }
 0x1e1   : > { %9633 = vmatprep.subr.bf16.mxu1 %v10356_v1 }
 0x1e4   : > { %9641 = vmatpush3.bf16.msra.mxu1 %v10356_v1 }
 0x1e6   : > { %9049 = vmatmul.mubr.msk.bf16.gmra.mrb[28].mxu0 %vm10890_vm4, %v10909_v57 }
 0x1e7   : > { %9068 = vmatprep.mubr.bf16.mxu0 %v10551_v18 }
 0x1ee   : > { %9069 = vmatmul.mubr.bf16.vlgmr.msra.gmra.mrb[0].mxu0 %v10556_v21 }
 0x1ef   : > { %9101 = vmatpush3.bf16.msra.mxu0 %v10343_v37  ;;  %9072 = vmatprep.mubr.bf16.mxu0 %v10566_v26 }
 0x1f0   : > { %9102 = vmatprep.subr.bf16.mxu0 %v10344_v19 }
 0x1f3   : > { %9103 = vmatpush3.bf16.msra.mxu0 %v10344_v19 }
 0x1f4   : > { %9104 = vmatprep.subr.bf16.mxu0 %v10345_v63 }
 0x1f6   : > { %9073 = vmatmul.mubr.bf16.gmra.mrb[4].mxu0 %v10582_v34 }
 0x1f7   : > { %9076 = vmatprep.mubr.bf16.mxu0 %v10592_v39  ;;  %9105 = vmatpush3.bf16.msra.mxu0 %v10345_v63 }
 0x1f8   : > { %9106 = vmatprep.subr.bf16.mxu0 %v10346_v40 }
 0x1fb   : > { %9107 = vmatpush3.bf16.msra.mxu0 %v10346_v40 }
 0x1fc   : > { %9108 = vmatprep.subr.bf16.mxu0 %v10347_v8 }
 0x1fe   : > { %9077 = vmatmul.mubr.bf16.gmra.mrb[8].mxu0 %v10607_v48 }
 0x1ff   : > { %9080 = vmatprep.mubr.bf16.mxu0 %v10636_v62  ;;  %9109 = vmatpush3.bf16.msra.mxu0 %v10347_v8 }
 0x200   : > { %9110 = vmatprep.subr.bf16.mxu0 %v10348_v15 }
 0x203   : > { %9111 = vmatpush3.bf16.msra.mxu0 %v10348_v15 }
 0x204   : > { %9112 = vmatprep.subr.bf16.mxu0 %v10349_v58 }
 0x206   : > { %9081 = vmatmul.mubr.bf16.gmra.mrb[12].mxu0 %v10646_v4 }
 0x207   : > { %9084 = vmatprep.mubr.bf16.mxu0 %v10664_v14  ;;  %9113 = vmatpush3.bf16.msra.mxu0 %v10349_v58 }
 0x208   : > { %9114 = vmatprep.subr.bf16.mxu0 %v10350_v55 }
 0x20b   : > { %9115 = vmatpush3.bf16.msra.mxu0 %v10350_v55 }
 0x20c   : > { %9148 = vmatprep.subr.bf16.mxu0 %v10351_v3 }
 0x20e   : > { %9085 = vmatmul.mubr.bf16.gmra.mrb[16].mxu0 %v10678_v20 }
 0x20f   : > { %9088 = vmatprep.mubr.bf16.mxu0 %v10706_v47 }
 0x216   : > { %9089 = vmatmul.mubr.bf16.gmra.mrb[20].mxu0 %v10709_v49 }
 0x217   : > { %9092 = vmatprep.mubr.bf16.mxu0 %v10783_v33 }
 0x21e   : > { %9093 = vmatmul.mubr.bf16.gmra.mrb[24].mxu0 %v10828_v56 }
 0x21f   : > { %9096 = vmatprep.mubr.bf16.mxu0 %v11270_v59 }
 0x226   : > { %9097 = vmatmul.mubr.bf16.gmra.mrb[28].mxu0 %v12651_v42 }
 0x227   : > { %9116 = vmatprep.mubr.msk.bf16.mxu0 %vm11133_vm6, %v10751_v11  ;;  %v10358_v11 = vld [vmem:[%s12571_s3 + $0x78] sm:$0xff]  }
 0x22e   : > { %9117 = vmatmul.mubr.msk.bf16.vlgmr.msra.gmra.mrb[0].mxu0 %vm11133_vm6, %v10753_v10  ;;  %v10357_v10 = vld [vmem:[%s12571_s3 + $0x70] sm:$0xff]  }
 0x22f   : > { %9120 = vmatprep.mubr.msk.bf16.mxu0 %vm11133_vm6, %v10760_v44  ;;  %9149 = vmatpush3.bf16.msra.mxu0 %v10351_v3  ;;  %v11606_v44 = vld [vmem:[%s12571_s3] sm:$0xff]  }
 0x230   : > { %9150 = vmatprep.subr.bf16.mxu0 %v10352_v25  ;;  %9634 = vmatprep.subr.bf16.mxu1 %v10357_v10 }
 0x231   : > { %9642 = vmatpush3.bf16.msra.mxu1 %v10357_v10 }
 0x232   : > { %9635 = vmatprep.subr.bf16.mxu1 %v10358_v11 }
 0x233   : > { %9151 = vmatpush3.bf16.msra.mxu0 %v10352_v25 }
 0x234   : > { %9152 = vmatprep.subr.bf16.mxu0 %v10353_v38 }
 0x235   : > { %9643 = vmatpush3.bf16.msra.mxu1 %v10358_v11 }
 0x236   : > { %9121 = vmatmul.mubr.msk.bf16.gmra.mrb[4].mxu0 %vm11133_vm6, %v10770_v23  ;;  %9196 = vmatprep.subr.bf16.mxu1 %v11606_v44  ;;  %v11612_v23 = vld [vmem:[%s12570_s2] ss:$0 sm:$0xff] }
 0x237   : > { %9124 = vmatprep.mubr.msk.bf16.mxu0 %vm11133_vm6, %v10785_v5  ;;  %9153 = vmatpush3.bf16.msra.mxu0 %v10353_v38 }
 0x238   : > { %9154 = vmatprep.subr.bf16.mxu0 %v10354_v36 }
 0x23b   : > { %9155 = vmatpush3.bf16.msra.mxu0 %v10354_v36 }
 0x23c   : > { %9156 = vmatprep.subr.bf16.mxu0 %v10355_v41 }
 0x23e   : > { %9125 = vmatmul.mubr.msk.bf16.gmra.mrb[8].mxu0 %vm11133_vm6, %v10792_v24 }
 0x23f   : > { %9128 = vmatprep.mubr.msk.bf16.mxu0 %vm11133_vm6, %v10815_v2  ;;  %9157 = vmatpush3.bf16.msra.mxu0 %v10355_v41 }
 0x240   : > { %9158 = vmatprep.subr.bf16.mxu0 %v10356_v1 }
 0x243   : > { %9159 = vmatpush3.bf16.msra.mxu0 %v10356_v1 }
 0x244   : > { %9160 = vmatprep.subr.bf16.mxu0 %v10357_v10 }
 0x246   : > { %9129 = vmatmul.mubr.msk.bf16.gmra.mrb[12].mxu0 %vm11133_vm6, %v10825_v22 }
 0x247   : > { %9132 = vmatprep.mubr.msk.bf16.mxu0 %vm11133_vm6, %v10847_v53  ;;  %9161 = vmatpush3.bf16.msra.mxu0 %v10357_v10 }
 0x248   : > { %9162 = vmatprep.subr.bf16.mxu0 %v10358_v11 }
 0x24b   : > { %9163 = vmatpush3.bf16.msra.mxu0 %v10358_v11 }
 0x24e   : > { %9133 = vmatmul.mubr.msk.bf16.gmra.mrb[16].mxu0 %vm11133_vm6, %v10857_v52 }
 0x24f   : > { %9136 = vmatprep.mubr.msk.bf16.mxu0 %vm11133_vm6, %v10873_v46 }
 0x256   : > { %9137 = vmatmul.mubr.msk.bf16.gmra.mrb[20].mxu0 %vm11133_vm6, %v10879_v51 }
 0x257   : > { %9140 = vmatprep.mubr.msk.bf16.mxu0 %vm11133_vm6, %v10899_v61 }
 0x25e   : > { %9141 = vmatmul.mubr.msk.bf16.gmra.mrb[24].mxu0 %vm11133_vm6, %v10905_v43 }
 0x25f   : > { %9144 = vmatprep.mubr.msk.bf16.mxu0 %vm11133_vm6, %v11416_v12 }
 0x266   : > { %9145 = vmatmul.mubr.msk.bf16.gmra.mrb[28].mxu0 %vm11133_vm6, %v11130_v45 }
 0x267   : > { %9164 = vmatprep.mubr.bf16.mxu0 %v12651_v42 }
 0x301   : > { %v9118_v5 = vpop.f32.mrb[0].mxu0 }
 0x302   : > { %v3541_v24 = vadd.f32 %v9118_v5, %v11612_v23  ;;  %v3373_v2 = vpop.f32.mrb[1].mxu0 }
 0x303   : > { %v3539_v22 = vadd.f32 %v11612_v23, %v3373_v2  ;;  %v9119_v53 = vpop.f32.mrb[2].mxu0 }
 0x304   : > { %v3573_v52 = vmax.f32 %v3541_v24, 0.0  ;;  %v3542_v46 = vadd.f32 %v9119_v53, %v11612_v23  ;;  %v3376_v51 = vpop.f32.mrb[3].mxu0 }
 0x305   : > { %v3571_v61 = vmax.f32 %v3539_v22, 0.0  ;;  %v3540_v43 = vadd.f32 %v11612_v23, %v3376_v51 }
 0x306   : > { %v3574_v17 = vmax.f32 %v3542_v46, 0.0  ;;  %v3670_v13 = vrot.slane %v3573_v52, 7  ;;  %v4249_v50 = vrot.slane %v3573_v52, 1 }
 0x307   : > { %v3572_v27 = vmax.f32 %v3540_v43, 0.0  ;;  %v3669_v32 = vrot.slane %v3571_v61, 7  ;;  %v4248_v0 = vrot.slane %v3571_v61, 1 }
 0x308   : > { %v3686_v60 = vrot.slane %v3574_v17, 7  ;;  %v4265_v12 = vrot.slane %v3574_v17, 1  ;;  %v11618_v16 = vpack.c.bf16 %v3574_v17, %v3573_v52 }
 0x309   : > { %v3685_v29 = vrot.slane %v3572_v27, 7  ;;  %v11620_v35 = vpack.c.bf16 %v3572_v27, %v3571_v61  ;;  %v4264_v28 = vrot.slane %v3572_v27, 1  ;;  %v9122_v31 = vpop.f32.mrb[4].mxu0 }
 0x30a   : > { %v3545_v9 = vadd.f32 %v9122_v31, %v11612_v23  ;;  %v3389_v37 = vpop.f32.mrb[5].mxu0  ;;  %v3702_v3 = vsel %vm516_vm2, %v3670_v13, %v3686_v60  ;;  %v3718_v25 = vsel %vm516_vm2, %v3686_v60, %v3670_v13  ;;  %v4281_v19 = vsel %vm1098_vm0, %v4249_v50, %v4265_v12 }
 0x30b   : > { %v3701_v38 = vsel %vm516_vm2, %v3669_v32, %v3685_v29  ;;  %v3717_v63 = vsel %vm516_vm2, %v3685_v29, %v3669_v32  ;;  %v4280_v36 = vsel %vm1098_vm0, %v4248_v0, %v4264_v28  ;;  %v4296_v40 = vsel %vm1098_vm0, %v4264_v28, %v4248_v0  ;;  %v9123_v41 = vpop.f32.mrb[6].mxu0  ;;  %9165 = vmatmul.mubr.bf16.vlgmr.msra.gmra.mrb[32].mxu0 %v11620_v35 }
 0x30c   : > { %v11638_v8 = vpack.c.bf16 %v3701_v38, %v3717_v63  ;;  %v11640_v1 = vpack.c.bf16 %v4296_v40, %v4280_v36  ;;  %v3577_v15 = vmax.f32 %v3545_v9, 0.0  ;;  %v3543_v58 = vadd.f32 %v11612_v23, %v3389_v37  ;;  %v3392_v55 = vpop.f32.mrb[7].mxu0  ;;  %9168 = vmatprep.mubr.bf16.mxu0 %v11618_v16 }
 0x30d   : > { %v3546_v10 = vadd.f32 %v9123_v41, %v11612_v23  ;;  %v3544_v11 = vadd.f32 %v11612_v23, %v3392_v55  ;;  %v11646_v5 = vpack.c.bf16 %v3702_v3, %v3718_v25  ;;  %v4297_v24 = vsel %vm1098_vm0, %v4265_v12, %v4249_v50 }
 0x30e   : > { %v3575_v2 = vmax.f32 %v3543_v58, 0.0  ;;  %v11650_v22 = vpack.c.bf16 %v4297_v24, %v4281_v19  ;;  %v3672_v46 = vrot.slane %v3577_v15, 7  ;;  %v4251_v51 = vrot.slane %v3577_v15, 1 }
 0x30f   : > { %v3578_v53 = vmax.f32 %v3546_v10, 0.0  ;;  %v3576_v52 = vmax.f32 %v3544_v11, 0.0 }
 0x310   : > { %v3671_v61 = vrot.slane %v3575_v2, 7  ;;  %v4250_v43 = vrot.slane %v3575_v2, 1 }
 0x311   : > { %v3688_v17 = vrot.slane %v3578_v53, 7  ;;  %v3687_v13 = vrot.slane %v3576_v52, 7  ;;  %v4266_v27 = vrot.slane %v3576_v52, 1  ;;  %v9126_v32 = vpop.f32.mrb[8].mxu0  ;;  %v4267_v60 = vrot.slane %v3578_v53, 1 }
 0x312   : > { %v3549_v0 = vadd.f32 %v9126_v32, %v11612_v23  ;;  %v3405_v29 = vpop.f32.mrb[9].mxu0  ;;  %v11653_v28 = vpack.c.bf16 %v3576_v52, %v3575_v2  ;;  %v11655_v50 = vpack.c.bf16 %v3578_v53, %v3577_v15 }
 0x313   : > { %v3547_v12 = vadd.f32 %v11612_v23, %v3405_v29  ;;  %v9127_v31 = vpop.f32.mrb[10].mxu0  ;;  %v3703_v9 = vsel %vm516_vm2, %v3671_v61, %v3687_v13  ;;  %v3719_v37 = vsel %vm516_vm2, %v3687_v13, %v3671_v61  ;;  %v3704_v3 = vsel %vm516_vm2, %v3672_v46, %v3688_v17 }
 0x314   : > { %v3581_v25 = vmax.f32 %v3549_v0, 0.0  ;;  %v3550_v19 = vadd.f32 %v9127_v31, %v11612_v23  ;;  %9169 = vmatmul.mubr.bf16.gmra.mrb[36].mxu0 %v11653_v28  ;;  %v3408_v38 = vpop.f32.mrb[11].mxu0  ;;  %v11666_v63 = vpack.c.bf16 %v3703_v9, %v3719_v37  ;;  %v3720_v36 = vsel %vm516_vm2, %v3688_v17, %v3672_v46 }
 0x315   : > { %v3579_v40 = vmax.f32 %v3547_v12, 0.0  ;;  %v3548_v41 = vadd.f32 %v11612_v23, %v3408_v38  ;;  %9172 = vmatprep.mubr.bf16.mxu0 %v11655_v50  ;;  %v11672_v15 = vpack.c.bf16 %v3704_v3, %v3720_v36  ;;  %v4282_v58 = vsel %vm1098_vm0, %v4250_v43, %v4266_v27 }
 0x316   : > { %v3674_v55 = vrot.slane %v3581_v25, 7  ;;  %v4253_v10 = vrot.slane %v3581_v25, 1  ;;  %v3582_v11 = vmax.f32 %v3550_v19, 0.0  ;;  %v4298_v24 = vsel %vm1098_vm0, %v4266_v27, %v4250_v43 }
 0x317   : > { %v3673_v2 = vrot.slane %v3579_v40, 7  ;;  %v4252_v53 = vrot.slane %v3579_v40, 1  ;;  %v3580_v52 = vmax.f32 %v3548_v41, 0.0  ;;  %v11678_v46 = vpack.c.bf16 %v4298_v24, %v4282_v58 }
 0x318   : > { %v3690_v61 = vrot.slane %v3582_v11, 7  ;;  %v4269_v17 = vrot.slane %v3582_v11, 1  ;;  %v11680_v13 = vpack.c.bf16 %v3582_v11, %v3581_v25  ;;  %v4283_v32 = vsel %vm1098_vm0, %v4251_v51, %v4267_v60 }
 0x319   : > { %v3689_v0 = vrot.slane %v3580_v52, 7  ;;  %v4268_v29 = vrot.slane %v3580_v52, 1  ;;  %v9130_v12 = vpop.f32.mrb[12].mxu0  ;;  %v11684_v31 = vpack.c.bf16 %v3580_v52, %v3579_v40  ;;  %v4299_v43 = vsel %vm1098_vm0, %v4267_v60, %v4251_v51 }
 0x31a   : > { %v3553_v27 = vadd.f32 %v9130_v12, %v11612_v23  ;;  %v3421_v9 = vpop.f32.mrb[13].mxu0  ;;  %v3706_v37 = vsel %vm516_vm2, %v3674_v55, %v3690_v61  ;;  %v3722_v3 = vsel %vm516_vm2, %v3690_v61, %v3674_v55  ;;  %v11693_v25 = vpack.c.bf16 %v4299_v43, %v4283_v32 }
 0x31b   : > { %v3551_v19 = vadd.f32 %v11612_v23, %v3421_v9  ;;  %v9131_v38 = vpop.f32.mrb[14].mxu0  ;;  %v3705_v36 = vsel %vm516_vm2, %v3673_v2, %v3689_v0  ;;  %v3721_v51 = vsel %vm516_vm2, %v3689_v0, %v3673_v2  ;;  %v11700_v60 = vpack.c.bf16 %v3706_v37, %v3722_v3 }
 0x31c   : > { %v3585_v40 = vmax.f32 %v3553_v27, 0.0  ;;  %v3554_v41 = vadd.f32 %v9131_v38, %v11612_v23  ;;  %9173 = vmatmul.mubr.bf16.gmra.mrb[40].mxu0 %v11684_v31  ;;  %v3424_v58 = vpop.f32.mrb[15].mxu0  ;;  %v11704_v55 = vpack.c.bf16 %v3705_v36, %v3721_v51  ;;  %v4284_v11 = vsel %vm1098_vm0, %v4252_v53, %v4268_v29 }
 0x31d   : > { %v3583_v24 = vmax.f32 %v3551_v19, 0.0  ;;  %v3552_v52 = vadd.f32 %v11612_v23, %v3424_v58  ;;  %9176 = vmatprep.mubr.bf16.mxu0 %v11680_v13  ;;  %v4300_v2 = vsel %vm1098_vm0, %v4268_v29, %v4252_v53  ;;  %v4285_v61 = vsel %vm1098_vm0, %v4253_v10, %v4269_v17 }
 0x31e   : > { %v3676_v32 = vrot.slane %v3585_v40, 7  ;;  %v3586_v0 = vmax.f32 %v3554_v41, 0.0  ;;  %v11714_v12 = vpack.c.bf16 %v4300_v2, %v4284_v11  ;;  %v4255_v43 = vrot.slane %v3585_v40, 1 }
 0x31f   : > { %v3675_v27 = vrot.slane %v3583_v24, 7  ;;  %v3584_v9 = vmax.f32 %v3552_v52, 0.0  ;;  %v4301_v37 = vsel %vm1098_vm0, %v4269_v17, %v4253_v10  ;;  %v4254_v53 = vrot.slane %v3583_v24, 1 }
 0x320   : > { %v3692_v3 = vrot.slane %v3586_v0, 7  ;;  %v4271_v19 = vrot.slane %v3586_v0, 1  ;;  %v11718_v38 = vpack.c.bf16 %v3586_v0, %v3585_v40  ;;  %v11720_v36 = vpack.c.bf16 %v4301_v37, %v4285_v61 }
 0x321   : > { %v3691_v29 = vrot.slane %v3584_v9, 7  ;;  %v4270_v51 = vrot.slane %v3584_v9, 1  ;;  %v9134_v58 = vpop.f32.mrb[16].mxu0  ;;  %v11722_v59 = vpack.c.bf16 %v3584_v9, %v3583_v24 }
 0x322   : > { %12652 = vst [vmem:[#allocation20_spill] sm:$0xff] %v11718_v38  ;;  %v3557_v41 = vadd.f32 %v9134_v58, %v11612_v23  ;;  %v3437_v11 = vpop.f32.mrb[17].mxu0  ;;  %9180 = vmatprep.mubr.bf16.mxu1 %v11718_v38  ;;  %v3708_v10 = vsel %vm516_vm2, %v3676_v32, %v3692_v3  ;;  %v3724_v17 = vsel %vm516_vm2, %v3692_v3, %v3676_v32 }
 0x323   : > { %v4287_v40 = vsel %vm1098_vm0, %v4255_v43, %v4271_v19  ;;  %v3555_v52 = vadd.f32 %v11612_v23, %v3437_v11  ;;  %v9135_v2 = vpop.f32.mrb[18].mxu0  ;;  %v3707_v24 = vsel %vm516_vm2, %v3675_v27, %v3691_v29  ;;  %v3723_v61 = vsel %vm516_vm2, %v3691_v29, %v3675_v27 }
 0x324   : > { %v11737_v0 = vpack.c.bf16 %v3708_v10, %v3724_v17  ;;  %v3589_v9 = vmax.f32 %v3557_v41, 0.0  ;;  %v3558_v37 = vadd.f32 %v9135_v2, %v11612_v23  ;;  %9177 = vmatmul.mubr.bf16.gmra.mrb[44].mxu0 %v11722_v59  ;;  %v3440_v32 = vpop.f32.mrb[19].mxu0  ;;  %v11741_v3 = vpack.c.bf16 %v3707_v24, %v3723_v61 }
 0x325   : > { %v4286_v58 = vsel %vm1098_vm0, %v4254_v53, %v4270_v51  ;;  %v3587_v11 = vmax.f32 %v3555_v52, 0.0  ;;  %v3556_v56 = vadd.f32 %v11612_v23, %v3440_v32  ;;  %v4302_v33 = vsel %vm1098_vm0, %v4270_v51, %v4254_v53 }
 0x326   : > { %v4303_v27 = vsel %vm1098_vm0, %v4271_v19, %v4255_v43  ;;  %v3590_v29 = vmax.f32 %v3558_v37, 0.0  ;;  %v11750_v41 = vpack.c.bf16 %v4302_v33, %v4286_v58  ;;  %v3678_v10 = vrot.slane %v3589_v9, 7  ;;  %v10360_v33 = vld [vmem:[%s12571_s3 + $0x8] sm:$0xff]  }
 0x327   : > { %v4257_v17 = vrot.slane %v3589_v9, 1  ;;  %v3588_v2 = vmax.f32 %v3556_v56, 0.0  ;;  %v11752_v24 = vpack.c.bf16 %v4303_v27, %v4287_v40  ;;  %v3677_v61 = vrot.slane %v3587_v11, 7 }
 0x328   : > { %v3694_v49 = vrot.slane %v3590_v29, 7  ;;  %v4273_v47 = vrot.slane %v3590_v29, 1  ;;  %v11754_v52 = vpack.c.bf16 %v3590_v29, %v3589_v9  ;;  %v4256_v32 = vrot.slane %v3587_v11, 1 }
 0x329   : > { %v3693_v20 = vrot.slane %v3588_v2, 7  ;;  %v4272_v14 = vrot.slane %v3588_v2, 1  ;;  %v9138_v53 = vpop.f32.mrb[20].mxu0  ;;  %v11756_v51 = vpack.c.bf16 %v3588_v2, %v3587_v11 }
 0x32a   : > { %12653 = vst [vmem:[#allocation21_spill] sm:$0xff] %v11754_v52  ;;  %v3561_v43 = vadd.f32 %v9138_v53, %v11612_v23  ;;  %v3453_v56 = vpop.f32.mrb[21].mxu0  ;;  %v3710_v19 = vsel %vm516_vm2, %v3678_v10, %v3694_v49  ;;  %v3726_v40 = vsel %vm516_vm2, %v3694_v49, %v3678_v10  ;;  %v4289_v9 = vsel %vm1098_vm0, %v4257_v17, %v4273_v47 }
 0x32b   : > { %12654 = vst [vmem:[#allocation22_spill] sm:$0xff] %v11756_v51  ;;  %v3559_v37 = vadd.f32 %v11612_v23, %v3453_v56  ;;  %v9139_v58 = vpop.f32.mrb[22].mxu0  ;;  %9181 = vmatmul.mubr.bf16.vlgmr.msra.gmra.mrb[0].mxu1 %v11756_v51  ;;  %v3709_v11 = vsel %vm516_vm2, %v3677_v61, %v3693_v20  ;;  %v3725_v27 = vsel %vm516_vm2, %v3693_v20, %v3677_v61  ;;  %v10361_v20 = vld [vmem:[%s12571_s3 + $0x10] sm:$0xff]  }
 0x32c   : > { %v11774_v29 = vpack.c.bf16 %v3710_v19, %v3726_v40  ;;  %v3593_v2 = vmax.f32 %v3561_v43, 0.0  ;;  %v3562_v53 = vadd.f32 %v9139_v58, %v11612_v23  ;;  %v3456_v49 = vpop.f32.mrb[23].mxu0  ;;  %9184 = vmatprep.mubr.bf16.mxu1 %v11754_v52  ;;  %9197 = vmatpush3.bf16.msra.mxu1 %v11606_v44  ;;  %v11779_v10 = vpack.c.bf16 %v3709_v11, %v3725_v27 }
 0x32d   : > { %v4288_v56 = vsel %vm1098_vm0, %v4256_v32, %v4272_v14  ;;  %v3591_v4 = vmax.f32 %v3559_v37, 0.0  ;;  %v3560_v62 = vadd.f32 %v11612_v23, %v3456_v49  ;;  %9198 = vmatprep.subr.bf16.mxu1 %v10360_v33  ;;  %v4304_v61 = vsel %vm1098_vm0, %v4272_v14, %v4256_v32 }
 0x32e   : > { %v4305_v43 = vsel %vm1098_vm0, %v4273_v47, %v4257_v17  ;;  %v3594_v44 = vmax.f32 %v3562_v53, 0.0  ;;  %v11791_v19 = vpack.c.bf16 %v4304_v61, %v4288_v56  ;;  %v3680_v40 = vrot.slane %v3593_v2, 7  ;;  %v10362_v47 = vld [vmem:[%s12571_s3 + $0x18] sm:$0xff]  }
 0x32f   : > { %v4259_v58 = vrot.slane %v3593_v2, 1  ;;  %v3592_v11 = vmax.f32 %v3560_v62, 0.0  ;;  %v11793_v37 = vpack.c.bf16 %v4305_v43, %v4289_v9  ;;  %v3679_v27 = vrot.slane %v3591_v4, 7 }
 0x330   : > { %v3696_v49 = vrot.slane %v3594_v44, 7  ;;  %v4275_v48 = vrot.slane %v3594_v44, 1  ;;  %9199 = vmatpush3.bf16.msra.mxu1 %v10360_v33  ;;  %v11795_v39 = vpack.c.bf16 %v3594_v44, %v3593_v2  ;;  %v4258_v34 = vrot.slane %v3591_v4, 1 }
 0x331   : > { %v3695_v26 = vrot.slane %v3592_v11, 7  ;;  %v4274_v14 = vrot.slane %v3592_v11, 1  ;;  %v9142_v32 = vpop.f32.mrb[24].mxu0  ;;  %v11797_v21 = vpack.c.bf16 %v3592_v11, %v3591_v4  ;;  %9200 = vmatprep.subr.bf16.mxu1 %v10361_v20 }
 0x332   : > { %12655 = vst [vmem:[#allocation23_spill] sm:$0xff] %v11795_v39  ;;  %v3565_v62 = vadd.f32 %v9142_v32, %v11612_v23  ;;  %v3469_v17 = vpop.f32.mrb[25].mxu0  ;;  %v3712_v9 = vsel %vm516_vm2, %v3680_v40, %v3696_v49  ;;  %v3728_v33 = vsel %vm516_vm2, %v3696_v49, %v3680_v40  ;;  %v4291_v2 = vsel %vm1098_vm0, %v4259_v58, %v4275_v48 }
 0x333   : > { %12656 = vst [vmem:[#allocation24_spill] sm:$0xff] %v11797_v21  ;;  %v3563_v4 = vadd.f32 %v11612_v23, %v3469_v17  ;;  %v9143_v53 = vpop.f32.mrb[26].mxu0  ;;  %9185 = vmatmul.mubr.bf16.gmra.mrb[4].mxu1 %v11797_v21  ;;  %v3711_v56 = vsel %vm516_vm2, %v3679_v27, %v3695_v26  ;;  %v3727_v61 = vsel %vm516_vm2, %v3695_v26, %v3679_v27  ;;  %v10363_v26 = vld [vmem:[%s12571_s3 + $0x20] sm:$0xff]  }
 0x334   : > { %v11815_v43 = vpack.c.bf16 %v3712_v9, %v3728_v33  ;;  %v3597_v44 = vmax.f32 %v3565_v62, 0.0  ;;  %v3566_v11 = vadd.f32 %v9143_v53, %v11612_v23  ;;  %v3472_v40 = vpop.f32.mrb[27].mxu0  ;;  %9188 = vmatprep.mubr.bf16.mxu1 %v11795_v39  ;;  %9201 = vmatpush3.bf16.msra.mxu1 %v10361_v20  ;;  %v11819_v49 = vpack.c.bf16 %v3711_v56, %v3727_v61 }
 0x335   : > { %v4290_v32 = vsel %vm1098_vm0, %v4258_v34, %v4274_v14  ;;  %v3595_v17 = vmax.f32 %v3563_v4, 0.0  ;;  %v3564_v18 = vadd.f32 %v11612_v23, %v3472_v40  ;;  %9202 = vmatprep.subr.bf16.mxu1 %v10362_v47  ;;  %v4306_v27 = vsel %vm1098_vm0, %v4274_v14, %v4258_v34 }
 0x336   : > { %v4307_v62 = vsel %vm1098_vm0, %v4275_v48, %v4259_v58  ;;  %v3598_v20 = vmax.f32 %v3566_v11, 0.0  ;;  %v11831_v9 = vpack.c.bf16 %v4306_v27, %v4290_v32  ;;  %v3682_v33 = vrot.slane %v3597_v44, 7  ;;  %v10364_v48 = vld [vmem:[%s12571_s3 + $0x28] sm:$0xff]  }
 0x337   : > { %v4261_v53 = vrot.slane %v3597_v44, 1  ;;  %v3596_v56 = vmax.f32 %v3564_v18, 0.0  ;;  %v11833_v4 = vpack.c.bf16 %v4307_v62, %v4291_v2  ;;  %v3681_v61 = vrot.slane %v3595_v17, 7 }
 0x338   : > { %v3698_v40 = vrot.slane %v3598_v20, 7  ;;  %v4277_v6 = vrot.slane %v3598_v20, 1  ;;  %9203 = vmatpush3.bf16.msra.mxu1 %v10362_v47  ;;  %v11835_v42 = vpack.c.bf16 %v3598_v20, %v3597_v44  ;;  %v4260_v39 = vrot.slane %v3595_v17, 1 }
 0x339   : > { %v3697_v21 = vrot.slane %v3596_v56, 7  ;;  %v4276_v34 = vrot.slane %v3596_v56, 1  ;;  %v9146_v14 = vpop.f32.mrb[28].mxu0  ;;  %v11837_v52 = vpack.c.bf16 %v3596_v56, %v3595_v17  ;;  %9204 = vmatprep.subr.bf16.mxu1 %v10363_v26 }
 0x33a   : > { %12657 = vst [vmem:[#allocation25_spill] sm:$0xff] %v11835_v42  ;;  %v3569_v18 = vadd.f32 %v9146_v14, %v11612_v23  ;;  %v3485_v58 = vpop.f32.mrb[29].mxu0  ;;  %v3714_v2 = vsel %vm516_vm2, %v3682_v33, %v3698_v40  ;;  %v3730_v47 = vsel %vm516_vm2, %v3698_v40, %v3682_v33  ;;  %v4293_v44 = vsel %vm1098_vm0, %v4261_v53, %v4277_v6 }
 0x33b   : > { %12658 = vst [vmem:[#allocation26_spill] sm:$0xff] %v11837_v52  ;;  %v3567_v11 = vadd.f32 %v11612_v23, %v3485_v58  ;;  %v9147_v32 = vpop.f32.mrb[30].mxu0  ;;  %9189 = vmatmul.mubr.bf16.gmra.mrb[8].mxu1 %v11837_v52  ;;  %v3713_v17 = vsel %vm516_vm2, %v3681_v61, %v3697_v21  ;;  %v3729_v27 = vsel %vm516_vm2, %v3697_v21, %v3681_v61  ;;  %v10365_v21 = vld [vmem:[%s12571_s3 + $0x30] sm:$0xff]  }
 0x33c   : > { %v11855_v62 = vpack.c.bf16 %v3714_v2, %v3730_v47  ;;  %v3601_v20 = vmax.f32 %v3569_v18, 0.0  ;;  %v3570_v56 = vadd.f32 %v9147_v32, %v11612_v23  ;;  %v3488_v33 = vpop.f32.mrb[31].mxu0  ;;  %9192 = vmatprep.mubr.bf16.mxu1 %v11835_v42  ;;  %9205 = vmatpush3.bf16.msra.mxu1 %v10363_v26  ;;  %v11859_v40 = vpack.c.bf16 %v3713_v17, %v3729_v27 }
 0x33d   : > { %v4292_v14 = vsel %vm1098_vm0, %v4260_v39, %v4276_v34  ;;  %v3599_v58 = vmax.f32 %v3567_v11, 0.0  ;;  %v3568_v52 = vadd.f32 %v11612_v23, %v3488_v33  ;;  %9206 = vmatprep.subr.bf16.mxu1 %v10364_v48  ;;  %v4308_v61 = vsel %vm1098_vm0, %v4276_v34, %v4260_v39 }
 0x33e   : > { %v4309_v18 = vsel %vm1098_vm0, %v4277_v6, %v4261_v53  ;;  %v3602_v26 = vmax.f32 %v3570_v56, 0.0  ;;  %v11871_v2 = vpack.c.bf16 %v4308_v61, %v4292_v14  ;;  %v4664_v47 = vrot.slane %v3601_v20, 7  ;;  %v10366_v6 = vld [vmem:[%s12571_s3 + $0x38] sm:$0xff]  }
 0x33f   : > { %v5308_v32 = vrot.slane %v3601_v20, 1  ;;  %v3600_v17 = vmax.f32 %v3568_v52, 0.0  ;;  %v11873_v11 = vpack.c.bf16 %v4309_v18, %v4293_v44  ;;  %v3683_v23 = vrot.slane %v3599_v58, 7 }
 0x340   : > { %v4680_v27 = vrot.slane %v3602_v26, 7  ;;  %v5324_v33 = vrot.slane %v3602_v26, 1  ;;  %9207 = vmatpush3.bf16.msra.mxu1 %v10364_v48  ;;  %v11875_v42 = vpack.c.bf16 %v3602_v26, %v3601_v20  ;;  %v4262_v51 = vrot.slane %v3599_v58, 1 }
 0x341   : > { %v3699_v38 = vrot.slane %v3600_v17, 7  ;;  %v4278_v39 = vrot.slane %v3600_v17, 1  ;;  %v11877_v34 = vpack.c.bf16 %v3600_v17, %v3599_v58  ;;  %9208 = vmatprep.subr.bf16.mxu1 %v10365_v21  ;;  %v10372_v17 = vld [vmem:[%s12571_s3 + $0xa8] sm:$0xff]  }
 0x342   : > { %v4696_v52 = vsel %vm516_vm2, %v4664_v47, %v4680_v27  ;;  %v4712_v53 = vsel %vm516_vm2, %v4680_v27, %v4664_v47  ;;  %v5340_v48 = vsel %vm1098_vm0, %v5308_v32, %v5324_v33  ;;  %v5356_v44 = vsel %vm1098_vm0, %v5324_v33, %v5308_v32  ;;  %v10371_v32 = vld [vmem:[%s12571_s3 + $0xa0] sm:$0xff]   ;;  %v10374_v27 = vld [vmem:[%s12571_s3 + $0xb8] sm:$0xff]  }
 0x343   : > { %9193 = vmatmul.mubr.bf16.gmra.mrb[12].mxu1 %v11877_v34  ;;  %v3715_v20 = vsel %vm516_vm2, %v3683_v23, %v3699_v38  ;;  %v3731_v56 = vsel %vm516_vm2, %v3699_v38, %v3683_v23  ;;  %v4294_v14 = vsel %vm1098_vm0, %v4262_v51, %v4278_v39  ;;  %v4310_v58 = vsel %vm1098_vm0, %v4278_v39, %v4262_v51  ;;  %v10367_v38 = vld [vmem:[%s12571_s3 + $0x80] sm:$0xff]   ;;  %v10369_v51 = vld [vmem:[%s12571_s3 + $0x90] sm:$0xff]   ;;  %v10376_v39 = vld [vmem:[%s12571_s3 + $0xc8] sm:$0xff]  }
 0x344   : > { %9209 = vmatpush3.bf16.msra.mxu1 %v10365_v21  ;;  %9212 = vmatprep.mubr.msk.bf16.mxu1 %vm10890_vm4, %v10909_v57  ;;  %v11902_v61 = vpack.c.bf16 %v3715_v20, %v3731_v56  ;;  %v11904_v18 = vpack.c.bf16 %v4310_v58, %v4294_v14  ;;  %v11906_v26 = vpack.c.bf16 %v4696_v52, %v4712_v53  ;;  %v10370_v21 = vld [vmem:[%s12571_s3 + $0x98] sm:$0xff]   ;;  %v10373_v23 = vld [vmem:[%s12571_s3 + $0xb0] sm:$0xff]   ;;  %v10375_v33 = vld [vmem:[%s12571_s3 + $0xc0] sm:$0xff]  }
 0x345   : > { %9210 = vmatprep.subr.bf16.mxu1 %v10366_v6  ;;  %v11911_v47 = vpack.c.bf16 %v5356_v44, %v5340_v48  ;;  %v10378_v52 = vld [vmem:[%s12571_s3 + $0xd8] sm:$0xff]   ;;  %v10379_v53 = vld [vmem:[%s12571_s3 + $0xe0] sm:$0xff]   ;;  %v10380_v48 = vld [vmem:[%s12571_s3 + $0xe8] sm:$0xff]  }
 0x346   : > { %v10381_v44 = vld [vmem:[%s12571_s3 + $0xf0] sm:$0xff]   ;;  %v10382_v20 = vld [vmem:[%s12571_s3 + $0xf8] sm:$0xff]   ;;  %v10383_v56 = vld [vmem:[%s12571_s3 + $0x100] sm:$0xff]  }
 0x347   : > { %v10384_v14 = vld [vmem:[%s12571_s3 + $0x108] sm:$0xff]   ;;  %v10385_v58 = vld [vmem:[%s12571_s3 + $0x110] sm:$0xff]  }
 0x348   : > { %9211 = vmatpush3.bf16.msra.mxu1 %v10366_v6  ;;  %v10377_v6 = vld [vmem:[%s12571_s3 + $0xd0] sm:$0xff]  }
 0x349   : > { %9244 = vmatprep.subr.bf16.mxu1 %v10367_v38 }
 0x34b   : > { %9213 = vmatmul.mubr.msk.bf16.vlgmr.msra.gmra.mrb[16].mxu1 %vm10890_vm4, %v11638_v8 }
 0x34c   : > { %9216 = vmatprep.mubr.msk.bf16.mxu1 %vm10890_vm4, %v11646_v5  ;;  %9245 = vmatpush3.bf16.msra.mxu1 %v10367_v38  ;;  %v10387_v38 = vld [vmem:[%s12571_s3 + $0x120] sm:$0xff]  }
 0x34d   : > { %9246 = vmatprep.subr.bf16.mxu1 %v10368_v7 }
 0x350   : > { %9247 = vmatpush3.bf16.msra.mxu1 %v10368_v7  ;;  %v10388_v7 = vld [vmem:[%s12571_s3 + $0x128] sm:$0xff]  }
 0x351   : > { %9248 = vmatprep.subr.bf16.mxu1 %v10369_v51 }
 0x353   : > { %9217 = vmatmul.mubr.msk.bf16.gmra.mrb[20].mxu1 %vm10890_vm4, %v11666_v63 }
 0x354   : > { %9220 = vmatprep.mubr.msk.bf16.mxu1 %vm10890_vm4, %v11672_v15  ;;  %9249 = vmatpush3.bf16.msra.mxu1 %v10369_v51  ;;  %v10389_v51 = vld [vmem:[%s12571_s3 + $0x130] sm:$0xff]  }
 0x355   : > { %9250 = vmatprep.subr.bf16.mxu1 %v10370_v21 }
 0x358   : > { %9251 = vmatpush3.bf16.msra.mxu1 %v10370_v21 }
 0x359   : > { %9252 = vmatprep.subr.bf16.mxu1 %v10371_v32 }
 0x35b   : > { %9221 = vmatmul.mubr.msk.bf16.gmra.mrb[24].mxu1 %vm10890_vm4, %v11704_v55 }
 0x35c   : > { %9224 = vmatprep.mubr.msk.bf16.mxu1 %vm10890_vm4, %v11700_v60  ;;  %9253 = vmatpush3.bf16.msra.mxu1 %v10371_v32 }
 0x35d   : > { %9254 = vmatprep.subr.bf16.mxu1 %v10372_v17 }
 0x360   : > { %9255 = vmatpush3.bf16.msra.mxu1 %v10372_v17 }
 0x361   : > { %9256 = vmatprep.subr.bf16.mxu1 %v10373_v23 }
 0x363   : > { %9225 = vmatmul.mubr.msk.bf16.gmra.mrb[28].mxu1 %vm10890_vm4, %v11741_v3 }
 0x364   : > { %9228 = vmatprep.mubr.msk.bf16.mxu1 %vm10890_vm4, %v11737_v0  ;;  %9257 = vmatpush3.bf16.msra.mxu1 %v10373_v23 }
 0x365   : > { %9258 = vmatprep.subr.bf16.mxu1 %v10374_v27 }
 0x368   : > { %9259 = vmatpush3.bf16.msra.mxu1 %v10374_v27  ;;  %v10390_v27 = vld [vmem:[%s12571_s3 + $0x138] sm:$0xff]  }
 0x369   : > { %9292 = vmatprep.subr.bf16.mxu1 %v10375_v33 }
 0x36b   : > { %9229 = vmatmul.mubr.msk.bf16.gmra.mrb[0].mxu1 %vm10890_vm4, %v11779_v10 }
 0x36c   : > { %9232 = vmatprep.mubr.msk.bf16.mxu1 %vm10890_vm4, %v11774_v29 }
 0x373   : > { %9233 = vmatmul.mubr.msk.bf16.gmra.mrb[4].mxu1 %vm10890_vm4, %v11819_v49 }
 0x374   : > { %9236 = vmatprep.mubr.msk.bf16.mxu1 %vm10890_vm4, %v11815_v43 }
 0x37b   : > { %9237 = vmatmul.mubr.msk.bf16.gmra.mrb[8].mxu1 %vm10890_vm4, %v11859_v40 }
 0x37c   : > { %9240 = vmatprep.mubr.msk.bf16.mxu1 %vm10890_vm4, %v11855_v62 }
 0x383   : > { %9241 = vmatmul.mubr.msk.bf16.gmra.mrb[12].mxu1 %vm10890_vm4, %v11902_v61 }
 0x384   : > { %9260 = vmatprep.mubr.msk.bf16.mxu1 %vm11133_vm6, %v11130_v45 }
 0x38b   : > { %9261 = vmatmul.mubr.msk.bf16.vlgmr.msra.gmra.mrb[16].mxu1 %vm11133_vm6, %v11640_v1 }
 0x38c   : > { %9264 = vmatprep.mubr.msk.bf16.mxu1 %vm11133_vm6, %v11650_v22  ;;  %9293 = vmatpush3.bf16.msra.mxu1 %v10375_v33  ;;  %v10391_v33 = vld [vmem:[%s12571_s3 + $0x140] sm:$0xff]  }
 0x38d   : > { %9294 = vmatprep.subr.bf16.mxu1 %v10376_v39 }
 0x390   : > { %9295 = vmatpush3.bf16.msra.mxu1 %v10376_v39 }
 0x391   : > { %9296 = vmatprep.subr.bf16.mxu1 %v10377_v6 }
 0x393   : > { %9265 = vmatmul.mubr.msk.bf16.gmra.mrb[20].mxu1 %vm11133_vm6, %v11678_v46 }
 0x394   : > { %9268 = vmatprep.mubr.msk.bf16.mxu1 %vm11133_vm6, %v11693_v25  ;;  %9297 = vmatpush3.bf16.msra.mxu1 %v10377_v6 }
 0x395   : > { %9298 = vmatprep.subr.bf16.mxu1 %v10378_v52 }
 0x398   : > { %9299 = vmatpush3.bf16.msra.mxu1 %v10378_v52 }
 0x399   : > { %9300 = vmatprep.subr.bf16.mxu1 %v10379_v53 }
 0x39b   : > { %9269 = vmatmul.mubr.msk.bf16.gmra.mrb[24].mxu1 %vm11133_vm6, %v11714_v12 }
 0x39c   : > { %9272 = vmatprep.mubr.msk.bf16.mxu1 %vm11133_vm6, %v11720_v36  ;;  %9301 = vmatpush3.bf16.msra.mxu1 %v10379_v53 }
 0x39d   : > { %9302 = vmatprep.subr.bf16.mxu1 %v10380_v48 }
 0x3a0   : > { %9303 = vmatpush3.bf16.msra.mxu1 %v10380_v48 }
 0x3a1   : > { %9304 = vmatprep.subr.bf16.mxu1 %v10381_v44 }
 0x3a3   : > { %9273 = vmatmul.mubr.msk.bf16.gmra.mrb[28].mxu1 %vm11133_vm6, %v11750_v41 }
 0x3a4   : > { %9276 = vmatprep.mubr.msk.bf16.mxu1 %vm11133_vm6, %v11752_v24  ;;  %9305 = vmatpush3.bf16.msra.mxu1 %v10381_v44 }
 0x3a5   : > { %9306 = vmatprep.subr.bf16.mxu1 %v10382_v20 }
 0x3a8   : > { %9307 = vmatpush3.bf16.msra.mxu1 %v10382_v20 }
 0x3a9   : > { %9340 = vmatprep.subr.bf16.mxu1 %v10383_v56 }
 0x3ab   : > { %9277 = vmatmul.mubr.msk.bf16.gmra.mrb[0].mxu1 %vm11133_vm6, %v11791_v19 }
 0x3ac   : > { %9280 = vmatprep.mubr.msk.bf16.mxu1 %vm11133_vm6, %v11793_v37 }
 0x3b3   : > { %9281 = vmatmul.mubr.msk.bf16.gmra.mrb[4].mxu1 %vm11133_vm6, %v11831_v9 }
 0x3b4   : > { %9284 = vmatprep.mubr.msk.bf16.mxu1 %vm11133_vm6, %v11833_v4 }
 0x3bb   : > { %9285 = vmatmul.mubr.msk.bf16.gmra.mrb[8].mxu1 %vm11133_vm6, %v11871_v2 }
 0x3bc   : > { %9288 = vmatprep.mubr.msk.bf16.mxu1 %vm11133_vm6, %v11873_v11 }
 0x3c3   : > { %9289 = vmatmul.mubr.msk.bf16.gmra.mrb[12].mxu1 %vm11133_vm6, %v11904_v18 }
 0x3c4   : > { %9308 = vmatprep.mubr.msk.bf16.mxu1 %vm10890_vm4, %v11638_v8  ;;  %v10386_v8 = vld [vmem:[%s12571_s3 + $0x118] sm:$0xff]  }
 0x3cb   : > { %9309 = vmatmul.mubr.msk.bf16.vlgmr.msra.gmra.mrb[16].mxu1 %vm10890_vm4, %v11646_v5 }
 0x3cc   : > { %9312 = vmatprep.mubr.msk.bf16.mxu1 %vm10890_vm4, %v11666_v63  ;;  %9341 = vmatpush3.bf16.msra.mxu1 %v10383_v56 }
 0x3cd   : > { %9342 = vmatprep.subr.bf16.mxu1 %v10384_v14 }
 0x3d0   : > { %9343 = vmatpush3.bf16.msra.mxu1 %v10384_v14 }
 0x3d1   : > { %9344 = vmatprep.subr.bf16.mxu1 %v10385_v58 }
 0x3d3   : > { %9313 = vmatmul.mubr.msk.bf16.gmra.mrb[20].mxu1 %vm10890_vm4, %v11672_v15 }
 0x3d4   : > { %9316 = vmatprep.mubr.msk.bf16.mxu1 %vm10890_vm4, %v11704_v55  ;;  %9345 = vmatpush3.bf16.msra.mxu1 %v10385_v58 }
 0x3d5   : > { %9346 = vmatprep.subr.bf16.mxu1 %v10386_v8 }
 0x3d8   : > { %9347 = vmatpush3.bf16.msra.mxu1 %v10386_v8 }
 0x3d9   : > { %9348 = vmatprep.subr.bf16.mxu1 %v10387_v38 }
 0x3db   : > { %9317 = vmatmul.mubr.msk.bf16.gmra.mrb[24].mxu1 %vm10890_vm4, %v11700_v60 }
 0x3dc   : > { %9320 = vmatprep.mubr.msk.bf16.mxu1 %vm10890_vm4, %v11741_v3  ;;  %9349 = vmatpush3.bf16.msra.mxu1 %v10387_v38 }
 0x3dd   : > { %9350 = vmatprep.subr.bf16.mxu1 %v10388_v7 }
 0x3de   : > { %v12093_v21 = vpop.f32.mrb[32].mxu0 }
 0x3df   : > { %v12095_v32 = vpop.f32.mrb[33].mxu0 }
 0x3e0   : > { %v12097_v17 = vpop.f32.mrb[34].mxu0  ;;  %9351 = vmatpush3.bf16.msra.mxu1 %v10388_v7  ;;  %v10392_v7 = vld [vmem:[%s12571_s3 + $0x148] sm:$0xff]  }
 0x3e1   : > { %v12099_v23 = vpop.f32.mrb[35].mxu0  ;;  %9352 = vmatprep.subr.bf16.mxu1 %v10389_v51 }
 0x3e3   : > { %9321 = vmatmul.mubr.msk.bf16.gmra.mrb[28].mxu1 %vm10890_vm4, %v11737_v0 }
 0x3e4   : > { %9324 = vmatprep.mubr.msk.bf16.mxu1 %vm10890_vm4, %v11779_v10  ;;  %9353 = vmatpush3.bf16.msra.mxu1 %v10389_v51  ;;  %v10393_v51 = vld [vmem:[%s12571_s3 + $0x150] sm:$0xff]  }
 0x3e5   : > { %9354 = vmatprep.subr.bf16.mxu1 %v10390_v27 }
 0x3e7   : > { %v12113_v39 = vpop.f32.mrb[36].mxu0 }
 0x3e8   : > { %v12115_v6 = vpop.f32.mrb[37].mxu0  ;;  %9355 = vmatpush3.bf16.msra.mxu1 %v10390_v27  ;;  %v10395_v27 = vld [vmem:[%s12571_s3 + $0x160] sm:$0xff]  }
 0x3e9   : > { %v12117_v52 = vpop.f32.mrb[38].mxu0  ;;  %9388 = vmatprep.subr.bf16.mxu1 %v10391_v33 }
 0x3ea   : > { %v12119_v53 = vpop.f32.mrb[39].mxu0 }
 0x3eb   : > { %9325 = vmatmul.mubr.msk.bf16.gmra.mrb[0].mxu1 %vm10890_vm4, %v11774_v29 }
 0x3ec   : > { %9328 = vmatprep.mubr.msk.bf16.mxu1 %vm10890_vm4, %v11819_v49 }
 0x3ef   : > { %v12127_v48 = vpop.f32.mrb[40].mxu0 }
 0x3f0   : > { %v12129_v44 = vpop.f32.mrb[41].mxu0 }
 0x3f1   : > { %v12131_v20 = vpop.f32.mrb[42].mxu0 }
 0x3f2   : > { %v12133_v56 = vpop.f32.mrb[43].mxu0 }
 0x3f3   : > { %12659 = vst [vmem:[#allocation27_spill] sm:$0xff] %v12133_v56  ;;  %9329 = vmatmul.mubr.msk.bf16.gmra.mrb[4].mxu1 %vm10890_vm4, %v11815_v43  ;;  %v12670_v56 = vld [vmem:[#allocation25_spill] sm:$0xff] }
 0x3f4   : > { %9332 = vmatprep.mubr.msk.bf16.mxu1 %vm10890_vm4, %v11859_v40 }
 0x3f7   : > { %v12141_v14 = vpop.f32.mrb[44].mxu0 }
 0x3f8   : > { %12660 = vst [vmem:[#allocation28_spill] sm:$0xff] %v12141_v14  ;;  %v12143_v58 = vpop.f32.mrb[45].mxu0  ;;  %v12669_v14 = vld [vmem:[#allocation26_spill] sm:$0xff] }
 0x3f9   : > { %12661 = vst [vmem:[#allocation29_spill] sm:$0xff] %v12143_v58  ;;  %v12145_v8 = vpop.f32.mrb[46].mxu0  ;;  %v12668_v58 = vld [vmem:[#allocation23_spill] sm:$0xff] }
 0x3fa   : > { %12662 = vst [vmem:[#allocation30_spill] sm:$0xff] %v12145_v8  ;;  %v12147_v38 = vpop.f32.mrb[47].mxu0  ;;  %v12666_v8 = vld [vmem:[#allocation21_spill] sm:$0xff] }
 0x3fb   : > { %12663 = vst [vmem:[#allocation31_spill] sm:$0xff] %v12147_v38  ;;  %9333 = vmatmul.mubr.msk.bf16.gmra.mrb[8].mxu1 %vm10890_vm4, %v11855_v62  ;;  %v12665_v38 = vld [vmem:[#allocation22_spill] sm:$0xff] }
 0x3fc   : > { %9336 = vmatprep.mubr.msk.bf16.mxu1 %vm10890_vm4, %v11902_v61 }
 0x403   : > { %9337 = vmatmul.mubr.msk.bf16.gmra.mrb[12].mxu1 %vm10890_vm4, %v11906_v26 }
 0x404   : > { %9356 = vmatprep.mubr.bf16.mxu1 %v11620_v35  ;;  %v10394_v35 = vld [vmem:[%s12571_s3 + $0x158] sm:$0xff]  }
 0x40b   : > { %9357 = vmatmul.mubr.bf16.vlgmr.msra.gmra.mrb[16].mxu1 %v11618_v16 }
 0x40c   : > { %9360 = vmatprep.mubr.bf16.mxu1 %v11653_v28  ;;  %9389 = vmatpush3.bf16.msra.mxu1 %v10391_v33  ;;  %v10396_v33 = vld [vmem:[%s12571_s3 + $0x168] sm:$0xff]  }
 0x40d   : > { %9390 = vmatprep.subr.bf16.mxu1 %v10392_v7 }
 0x410   : > { %9391 = vmatpush3.bf16.msra.mxu1 %v10392_v7  ;;  %v10397_v7 = vld [vmem:[%s12571_s3 + $0x170] sm:$0xff]  }
 0x411   : > { %9392 = vmatprep.subr.bf16.mxu1 %v10393_v51 }
 0x413   : > { %9361 = vmatmul.mubr.bf16.gmra.mrb[20].mxu1 %v11655_v50 }
 0x414   : > { %9364 = vmatprep.mubr.bf16.mxu1 %v11684_v31  ;;  %9393 = vmatpush3.bf16.msra.mxu1 %v10393_v51  ;;  %v10398_v51 = vld [vmem:[%s12571_s3 + $0x178] sm:$0xff]  }
 0x415   : > { %9394 = vmatprep.subr.bf16.mxu1 %v10394_v35 }
 0x418   : > { %9395 = vmatpush3.bf16.msra.mxu1 %v10394_v35  ;;  %v12664_v35 = vld [vmem:[#allocation20_spill] sm:$0xff] }
 0x419   : > { %9396 = vmatprep.subr.bf16.mxu1 %v10395_v27 }
 0x41b   : > { %9365 = vmatmul.mubr.bf16.gmra.mrb[24].mxu1 %v11680_v13 }
 0x41c   : > { %9368 = vmatprep.mubr.bf16.mxu1 %v11722_v59  ;;  %9397 = vmatpush3.bf16.msra.mxu1 %v10395_v27  ;;  %v10399_v27 = vld [vmem:[%s12571_s3 + $0x180] sm:$0xff]  }
 0x41d   : > { %9398 = vmatprep.subr.bf16.mxu1 %v10396_v33 }
 0x420   : > { %9399 = vmatpush3.bf16.msra.mxu1 %v10396_v33  ;;  %v12667_v33 = vld [vmem:[#allocation24_spill] sm:$0xff] }
 0x421   : > { %9400 = vmatprep.subr.bf16.mxu1 %v10397_v7 }
 0x423   : > { %9369 = vmatmul.mubr.bf16.gmra.mrb[28].mxu1 %v12664_v35 }
 0x424   : > { %9372 = vmatprep.mubr.bf16.mxu1 %v12665_v38  ;;  %9401 = vmatpush3.bf16.msra.mxu1 %v10397_v7  ;;  %v10400_v7 = vld [vmem:[%s12571_s3 + $0x188] sm:$0xff]  }
 0x425   : > { %9402 = vmatprep.subr.bf16.mxu1 %v10398_v51 }
 0x428   : > { %9403 = vmatpush3.bf16.msra.mxu1 %v10398_v51  ;;  %v10401_v51 = vld [vmem:[%s12571_s3 + $0x190] sm:$0xff]  }
 0x429   : > { %9436 = vmatprep.subr.bf16.mxu1 %v10399_v27 }
 0x42b   : > { %9373 = vmatmul.mubr.bf16.gmra.mrb[0].mxu1 %v12666_v8 }
 0x42c   : > { %9376 = vmatprep.mubr.bf16.mxu1 %v12667_v33 }
 0x433   : > { %9377 = vmatmul.mubr.bf16.gmra.mrb[4].mxu1 %v12668_v58 }
 0x434   : > { %9380 = vmatprep.mubr.bf16.mxu1 %v12669_v14 }
 0x43b   : > { %9381 = vmatmul.mubr.bf16.gmra.mrb[8].mxu1 %v12670_v56 }
 0x43c   : > { %9384 = vmatprep.mubr.bf16.mxu1 %v11877_v34 }
 0x443   : > { %9385 = vmatmul.mubr.bf16.gmra.mrb[12].mxu1 %v11875_v42 }
 0x444   : > { %9404 = vmatprep.mubr.msk.bf16.mxu1 %vm11133_vm6, %v11640_v1  ;;  %v10402_v1 = vld [vmem:[%s12571_s3 + $0x198] sm:$0xff]  }
 0x44b   : > { %9405 = vmatmul.mubr.msk.bf16.vlgmr.msra.gmra.mrb[16].mxu1 %vm11133_vm6, %v11650_v22 }
 0x44c   : > { %9408 = vmatprep.mubr.msk.bf16.mxu1 %vm11133_vm6, %v11678_v46  ;;  %9437 = vmatpush3.bf16.msra.mxu1 %v10399_v27  ;;  %v10403_v27 = vld [vmem:[%s12571_s3 + $0x1a0] sm:$0xff]  }
 0x44d   : > { %9438 = vmatprep.subr.bf16.mxu1 %v10400_v7 }
 0x450   : > { %9439 = vmatpush3.bf16.msra.mxu1 %v10400_v7  ;;  %v10404_v7 = vld [vmem:[%s12571_s3 + $0x1a8] sm:$0xff]  }
 0x451   : > { %9440 = vmatprep.subr.bf16.mxu1 %v10401_v51 }
 0x453   : > { %9409 = vmatmul.mubr.msk.bf16.gmra.mrb[20].mxu1 %vm11133_vm6, %v11693_v25 }
 0x454   : > { %9412 = vmatprep.mubr.msk.bf16.mxu1 %vm11133_vm6, %v11714_v12  ;;  %9441 = vmatpush3.bf16.msra.mxu1 %v10401_v51  ;;  %v10405_v51 = vld [vmem:[%s12571_s3 + $0x1b0] sm:$0xff]  }
 0x455   : > { %9442 = vmatprep.subr.bf16.mxu1 %v10402_v1 }
 0x458   : > { %9443 = vmatpush3.bf16.msra.mxu1 %v10402_v1  ;;  %v10406_v1 = vld [vmem:[%s12571_s3 + $0x1b8] sm:$0xff]  }
 0x459   : > { %9444 = vmatprep.subr.bf16.mxu1 %v10403_v27 }
 0x45b   : > { %9413 = vmatmul.mubr.msk.bf16.gmra.mrb[24].mxu1 %vm11133_vm6, %v11720_v36 }
 0x45c   : > { %9416 = vmatprep.mubr.msk.bf16.mxu1 %vm11133_vm6, %v11750_v41  ;;  %9445 = vmatpush3.bf16.msra.mxu1 %v10403_v27  ;;  %v10407_v27 = vld [vmem:[%s12571_s3 + $0x1c0] sm:$0xff]  }
 0x45d   : > { %9446 = vmatprep.subr.bf16.mxu1 %v10404_v7 }
 0x460   : > { %9447 = vmatpush3.bf16.msra.mxu1 %v10404_v7  ;;  %v10408_v7 = vld [vmem:[%s12571_s3 + $0x1c8] sm:$0xff]  }
 0x461   : > { %9448 = vmatprep.subr.bf16.mxu1 %v10405_v51 }
 0x463   : > { %9417 = vmatmul.mubr.msk.bf16.gmra.mrb[28].mxu1 %vm11133_vm6, %v11752_v24 }
 0x464   : > { %9420 = vmatprep.mubr.msk.bf16.mxu1 %vm11133_vm6, %v11791_v19  ;;  %9449 = vmatpush3.bf16.msra.mxu1 %v10405_v51  ;;  %v10409_v51 = vld [vmem:[%s12571_s3 + $0x1d0] sm:$0xff]  }
 0x465   : > { %9450 = vmatprep.subr.bf16.mxu1 %v10406_v1 }
 0x468   : > { %9451 = vmatpush3.bf16.msra.mxu1 %v10406_v1 }
 0x469   : > { %9484 = vmatprep.subr.bf16.mxu1 %v10407_v27 }
 0x46b   : > { %9421 = vmatmul.mubr.msk.bf16.gmra.mrb[0].mxu1 %vm11133_vm6, %v11793_v37 }
 0x46c   : > { %9424 = vmatprep.mubr.msk.bf16.mxu1 %vm11133_vm6, %v11831_v9 }
 0x473   : > { %9425 = vmatmul.mubr.msk.bf16.gmra.mrb[4].mxu1 %vm11133_vm6, %v11833_v4 }
 0x474   : > { %9428 = vmatprep.mubr.msk.bf16.mxu1 %vm11133_vm6, %v11871_v2 }
 0x47b   : > { %9429 = vmatmul.mubr.msk.bf16.gmra.mrb[8].mxu1 %vm11133_vm6, %v11873_v11 }
 0x47c   : > { %9432 = vmatprep.mubr.msk.bf16.mxu1 %vm11133_vm6, %v11904_v18 }
 0x483   : > { %9433 = vmatmul.mubr.msk.bf16.gmra.mrb[12].mxu1 %vm11133_vm6, %v11911_v47 }
 0x484   : > { %9452 = vmatprep.mubr.msk.bf16.mxu1 %vm10890_vm4, %v11646_v5  ;;  %v10410_v5 = vld [vmem:[%s12571_s3 + $0x1d8] sm:$0xff]  }
 0x48b   : > { %9453 = vmatmul.mubr.msk.bf16.vlgmr.msra.gmra.mrb[16].mxu1 %vm10890_vm4, %v11666_v63  ;;  %v10411_v63 = vld [vmem:[%s12571_s3 + $0x1e0] sm:$0xff]  }
 0x48c   : > { %9456 = vmatprep.mubr.msk.bf16.mxu1 %vm10890_vm4, %v11672_v15  ;;  %9485 = vmatpush3.bf16.msra.mxu1 %v10407_v27  ;;  %v10412_v15 = vld [vmem:[%s12571_s3 + $0x1e8] sm:$0xff]  }
 0x48d   : > { %9486 = vmatprep.subr.bf16.mxu1 %v10408_v7 }
 0x490   : > { %9487 = vmatpush3.bf16.msra.mxu1 %v10408_v7 }
 0x491   : > { %9488 = vmatprep.subr.bf16.mxu1 %v10409_v51 }
 0x493   : > { %9457 = vmatmul.mubr.msk.bf16.gmra.mrb[20].mxu1 %vm10890_vm4, %v11704_v55  ;;  %v10414_v55 = vld [vmem:[%s12571_s3 + $0x1f8] sm:$0xff]  }
 0x494   : > { %9460 = vmatprep.mubr.msk.bf16.mxu1 %vm10890_vm4, %v11700_v60  ;;  %9489 = vmatpush3.bf16.msra.mxu1 %v10409_v51  ;;  %v10413_v60 = vld [vmem:[%s12571_s3 + $0x1f0] sm:$0xff]  }
 0x495   : > { %9490 = vmatprep.subr.bf16.mxu1 %v10410_v5 }
 0x498   : > { %9491 = vmatpush3.bf16.msra.mxu1 %v10410_v5 }
 0x499   : > { %9492 = vmatprep.subr.bf16.mxu1 %v10411_v63 }
 0x49b   : > { %9461 = vmatmul.mubr.msk.bf16.gmra.mrb[24].mxu1 %vm10890_vm4, %v11741_v3  ;;  %v10416_v3 = vld [vmem:[%s12571_s3 + $0x208] sm:$0xff]  }
 0x49c   : > { %9464 = vmatprep.mubr.msk.bf16.mxu1 %vm10890_vm4, %v11737_v0  ;;  %9493 = vmatpush3.bf16.msra.mxu1 %v10411_v63  ;;  %v10415_v0 = vld [vmem:[%s12571_s3 + $0x200] sm:$0xff]  }
 0x49d   : > { %9494 = vmatprep.subr.bf16.mxu1 %v10412_v15 }
 0x4a0   : > { %9495 = vmatpush3.bf16.msra.mxu1 %v10412_v15 }
 0x4a1   : > { %9496 = vmatprep.subr.bf16.mxu1 %v10413_v60 }
 0x4a3   : > { %9465 = vmatmul.mubr.msk.bf16.gmra.mrb[28].mxu1 %vm10890_vm4, %v11779_v10  ;;  %v12674_v10 = vld [vmem:[#allocation6_spill] sm:$0xff] }
 0x4a4   : > { %9468 = vmatprep.mubr.msk.bf16.mxu1 %vm10890_vm4, %v11774_v29  ;;  %9497 = vmatpush3.bf16.msra.mxu1 %v10413_v60  ;;  %v10417_v29 = vld [vmem:[%s12571_s3 + $0x210] sm:$0xff]  }
 0x4a5   : > { %9498 = vmatprep.subr.bf16.mxu1 %v10414_v55 }
 0x4a8   : > { %9499 = vmatpush3.bf16.msra.mxu1 %v10414_v55 }
 0x4a9   : > { %9532 = vmatprep.subr.bf16.mxu1 %v10415_v0 }
 0x4ab   : > { %9469 = vmatmul.mubr.msk.bf16.gmra.mrb[0].mxu1 %vm10890_vm4, %v11819_v49  ;;  %v12678_v49 = vld [vmem:[#allocation10_spill] sm:$0xff] }
 0x4ac   : > { %9472 = vmatprep.mubr.msk.bf16.mxu1 %vm10890_vm4, %v11815_v43  ;;  %v12677_v43 = vld [vmem:[#allocation9_spill] sm:$0xff] }
 0x4b3   : > { %9473 = vmatmul.mubr.msk.bf16.gmra.mrb[4].mxu1 %vm10890_vm4, %v11859_v40  ;;  %v12684_v40 = vld [vmem:[#allocation16_spill] sm:$0xff] }
 0x4b4   : > { %9476 = vmatprep.mubr.msk.bf16.mxu1 %vm10890_vm4, %v11855_v62  ;;  %v12683_v62 = vld [vmem:[#allocation15_spill] sm:$0xff] }
 0x4bb   : > { %9477 = vmatmul.mubr.msk.bf16.gmra.mrb[8].mxu1 %vm10890_vm4, %v11902_v61  ;;  %v12470_v61 = vld [vmem:[%s12572_s4] ss:$0 sm:$0xff] }
 0x4bc   : > { %9480 = vmatprep.mubr.msk.bf16.mxu1 %vm10890_vm4, %v11906_v26  ;;  %v9653_v26 = vadd.f32 %v12470_v61, %v12099_v23  ;;  %v9656_v1 = vadd.f32 %v12113_v39, %v12470_v61  ;;  %v9662_v39 = vadd.f32 %v12117_v52, %v12470_v61 }
 0x4c3   : > { %9481 = vmatmul.mubr.msk.bf16.gmra.mrb[12].mxu1 %vm10890_vm4, %v10909_v57  ;;  %v10419_v57 = vld [vmem:[%s12571_s3 + $0x220] sm:$0xff]  }
 0x4c4   : > { %9500 = vmatprep.mubr.bf16.mxu1 %v11618_v16  ;;  %v10420_v16 = vld [vmem:[%s12571_s3 + $0x228] sm:$0xff]  }
 0x4cb   : > { %9501 = vmatmul.mubr.bf16.vlgmr.msra.gmra.mrb[16].mxu1 %v11653_v28  ;;  %v10421_v28 = vld [vmem:[%s12571_s3 + $0x230] sm:$0xff]  }
 0x4cc   : > { %9504 = vmatprep.mubr.bf16.mxu1 %v11655_v50  ;;  %9533 = vmatpush3.bf16.msra.mxu1 %v10415_v0  ;;  %v10422_v50 = vld [vmem:[%s12571_s3 + $0x238] sm:$0xff]  }
 0x4cd   : > { %9534 = vmatprep.subr.bf16.mxu1 %v10416_v3 }
 0x4d0   : > { %9535 = vmatpush3.bf16.msra.mxu1 %v10416_v3 }
 0x4d1   : > { %9536 = vmatprep.subr.bf16.mxu1 %v10417_v29 }
 0x4d3   : > { %9505 = vmatmul.mubr.bf16.gmra.mrb[20].mxu1 %v11684_v31  ;;  %v10424_v31 = vld [vmem:[%s12573_s5 + $0x8] sm:$0xff]  }
 0x4d4   : > { %9508 = vmatprep.mubr.bf16.mxu1 %v11680_v13  ;;  %9537 = vmatpush3.bf16.msra.mxu1 %v10417_v29  ;;  %v12671_v13 = vmov 0.0|0.0  }
 0x4d5   : > { %9538 = vmatprep.subr.bf16.mxu1 %v10418_v30 }
 0x4d8   : > { %9539 = vmatpush3.bf16.msra.mxu1 %v10418_v30 }
 0x4d9   : > { %9540 = vmatprep.subr.bf16.mxu1 %v10419_v57 }
 0x4db   : > { %9509 = vmatmul.mubr.bf16.gmra.mrb[24].mxu1 %v11722_v59  ;;  %v10423_v59 = vld [vmem:[%s12573_s5] sm:$0xff]  }
 0x4dc   : > { %9512 = vmatprep.mubr.bf16.mxu1 %v12664_v35  ;;  %9541 = vmatpush3.bf16.msra.mxu1 %v10419_v57 }
 0x4dd   : > { %9542 = vmatprep.subr.bf16.mxu1 %v10420_v16 }
 0x4e0   : > { %9543 = vmatpush3.bf16.msra.mxu1 %v10420_v16 }
 0x4e1   : > { %9544 = vmatprep.subr.bf16.mxu1 %v10421_v28 }
 0x4e3   : > { %9513 = vmatmul.mubr.bf16.gmra.mrb[28].mxu1 %v12665_v38 }
 0x4e4   : > { %9516 = vmatprep.mubr.bf16.mxu1 %v12666_v8  ;;  %9545 = vmatpush3.bf16.msra.mxu1 %v10421_v28 }
 0x4e5   : > { %9546 = vmatprep.subr.bf16.mxu1 %v10422_v50 }
 0x4e8   : > { %9547 = vmatpush3.bf16.msra.mxu1 %v10422_v50  ;;  %v9668_v50 = vadd.f32 %v12127_v48, %v12470_v61 }
 0x4e9   : > { %9580 = vmatprep.subr.bf16.mxu1 %v10423_v59 }
 0x4eb   : > { %9517 = vmatmul.mubr.bf16.gmra.mrb[0].mxu1 %v12667_v33 }
 0x4ec   : > { %9520 = vmatprep.mubr.bf16.mxu1 %v12668_v58 }
 0x4f3   : > { %9521 = vmatmul.mubr.bf16.gmra.mrb[4].mxu1 %v12669_v14  ;;  %v9647_v14 = vadd.f32 %v12470_v61, %v12095_v32  ;;  %v9659_v32 = vadd.f32 %v12470_v61, %v12115_v6  ;;  %v9665_v6 = vadd.f32 %v12470_v61, %v12119_v53 }
 0x4f4   : > { %9524 = vmatprep.mubr.bf16.mxu1 %v12670_v56  ;;  %v9644_v56 = vadd.f32 %v12093_v21, %v12470_v61 }
 0x4fb   : > { %9525 = vmatmul.mubr.bf16.gmra.mrb[8].mxu1 %v11877_v34  ;;  %v12687_v34 = vld [vmem:[#allocation19_spill] sm:$0xff] }
 0x4fc   : > { %9528 = vmatprep.mubr.bf16.mxu1 %v11875_v42  ;;  %v10425_v42 = vld [vmem:[%s12573_s5 + $0x10] sm:$0xff]  }
 0x503   : > { %9529 = vmatmul.mubr.bf16.gmra.mrb[12].mxu1 %v12671_v13 }
 0x504   : > { %9548 = vmatprep.mubr.msk.bf16.mxu1 %vm11133_vm6, %v11650_v22  ;;  %v10426_v22 = vld [vmem:[%s12573_s5 + $0x18] sm:$0xff]  }
 0x50b   : > { %9549 = vmatmul.mubr.msk.bf16.vlgmr.msra.gmra.mrb[16].mxu1 %vm11133_vm6, %v11678_v46  ;;  %v10427_v46 = vld [vmem:[%s12573_s5 + $0x20] sm:$0xff]  }
 0x50c   : > { %9552 = vmatprep.mubr.msk.bf16.mxu1 %vm11133_vm6, %v11693_v25  ;;  %9581 = vmatpush3.bf16.msra.mxu1 %v10423_v59  ;;  %v10428_v25 = vld [vmem:[%s12573_s5 + $0x28] sm:$0xff]  }
 0x50d   : > { %9582 = vmatprep.subr.bf16.mxu1 %v10424_v31 }
 0x510   : > { %9583 = vmatpush3.bf16.msra.mxu1 %v10424_v31 }
 0x511   : > { %9584 = vmatprep.subr.bf16.mxu1 %v10425_v42 }
 0x513   : > { %9553 = vmatmul.mubr.msk.bf16.gmra.mrb[20].mxu1 %vm11133_vm6, %v11714_v12  ;;  %v10429_v12 = vld [vmem:[%s12573_s5 + $0x30] sm:$0xff]  }
 0x514   : > { %9556 = vmatprep.mubr.msk.bf16.mxu1 %vm11133_vm6, %v11720_v36  ;;  %9585 = vmatpush3.bf16.msra.mxu1 %v10425_v42  ;;  %v10430_v36 = vld [vmem:[%s12573_s5 + $0x38] sm:$0xff]   ;;  %v9671_v42 = vadd.f32 %v12470_v61, %v12129_v44 }
 0x515   : > { %9586 = vmatprep.subr.bf16.mxu1 %v10426_v22 }
 0x518   : > { %9587 = vmatpush3.bf16.msra.mxu1 %v10426_v22 }
 0x519   : > { %9588 = vmatprep.subr.bf16.mxu1 %v10427_v46 }
 0x51b   : > { %9557 = vmatmul.mubr.msk.bf16.gmra.mrb[24].mxu1 %vm11133_vm6, %v11750_v41  ;;  %v12672_v41 = vld [vmem:[#allocation4_spill] sm:$0xff] }
 0x51c   : > { %9560 = vmatprep.mubr.msk.bf16.mxu1 %vm11133_vm6, %v11752_v24  ;;  %9589 = vmatpush3.bf16.msra.mxu1 %v10427_v46  ;;  %v12673_v24 = vld [vmem:[#allocation5_spill] sm:$0xff] }
 0x51d   : > { %9590 = vmatprep.subr.bf16.mxu1 %v10428_v25 }
 0x520   : > { %9591 = vmatpush3.bf16.msra.mxu1 %v10428_v25  ;;  %v9674_v25 = vadd.f32 %v12131_v20, %v12470_v61 }
 0x521   : > { %9592 = vmatprep.subr.bf16.mxu1 %v10429_v12 }
 0x523   : > { %9561 = vmatmul.mubr.msk.bf16.gmra.mrb[28].mxu1 %vm11133_vm6, %v11791_v19  ;;  %v12675_v19 = vld [vmem:[#allocation7_spill] sm:$0xff] }
 0x524   : > { %9564 = vmatprep.mubr.msk.bf16.mxu1 %vm11133_vm6, %v11793_v37  ;;  %9593 = vmatpush3.bf16.msra.mxu1 %v10429_v12  ;;  %v12676_v37 = vld [vmem:[#allocation8_spill] sm:$0xff] }
 0x525   : > { %9594 = vmatprep.subr.bf16.mxu1 %v10430_v36 }
 0x528   : > { %9595 = vmatpush3.bf16.msra.mxu1 %v10430_v36  ;;  %v12688_v36 = vld [vmem:[#allocation27_spill] sm:$0xff] }
 0x52b   : > { %9565 = vmatmul.mubr.msk.bf16.gmra.mrb[0].mxu1 %vm11133_vm6, %v11831_v9  ;;  %v12679_v9 = vld [vmem:[#allocation11_spill] sm:$0xff] }
 0x52c   : > { %9568 = vmatprep.mubr.msk.bf16.mxu1 %vm11133_vm6, %v11833_v4  ;;  %v12680_v4 = vld [vmem:[#allocation12_spill] sm:$0xff] }
 0x533   : > { %9569 = vmatmul.mubr.msk.bf16.gmra.mrb[4].mxu1 %vm11133_vm6, %v11871_v2  ;;  %v12685_v2 = vld [vmem:[#allocation17_spill] sm:$0xff] }
 0x534   : > { %9572 = vmatprep.mubr.msk.bf16.mxu1 %vm11133_vm6, %v11873_v11  ;;  %v12686_v11 = vld [vmem:[#allocation18_spill] sm:$0xff] }
 0x53b   : > { %9573 = vmatmul.mubr.msk.bf16.gmra.mrb[8].mxu1 %vm11133_vm6, %v11904_v18  ;;  %v9650_v18 = vadd.f32 %v12097_v17, %v12470_v61 }
 0x53c   : > { %9576 = vmatprep.mubr.msk.bf16.mxu1 %vm11133_vm6, %v11911_v47  ;;  %v12479_v47 = vld [vmem:[%s12574_s6] ss:$0 sm:$0xff] }
 0x53d   : > { %v9651_v17 = vadd.f32 %v9650_v18, %v12479_v47  ;;  %v9654_v23 = vadd.f32 %v9653_v26, %v12479_v47  ;;  %v9657_v0 = vadd.f32 %v9656_v1, %v12479_v47  ;;  %v9660_v29 = vadd.f32 %v9659_v32, %v12479_v47  ;;  %v12691_v26 = vld [vmem:[#allocation30_spill] sm:$0xff] }
 0x53e   : > { %v9663_v52 = vadd.f32 %v9662_v39, %v12479_v47  ;;  %v9666_v28 = vadd.f32 %v9665_v6, %v12479_v47  ;;  %v9669_v48 = vadd.f32 %v9668_v50, %v12479_v47  ;;  %v9672_v44 = vadd.f32 %v9671_v42, %v12479_v47 }
 0x53f   : > { %v9675_v20 = vadd.f32 %v9674_v25, %v12479_v47 }
 0x543   : > { %9577 = vmatmul.mubr.msk.bf16.gmra.mrb[12].mxu1 %vm11133_vm6, %v11130_v45  ;;  %v12681_v45 = vld [vmem:[#allocation13_spill] sm:$0xff] }
 0x544   : > { %9596 = vmatprep.mubr.bf16.mxu1 %v12672_v41  ;;  %v9677_v41 = vadd.f32 %v12470_v61, %v12688_v36 }
 0x54b   : > { %9597 = vmatmul.mubr.bf16.vlgmr.msra.gmra.mrb[16].mxu1 %v12673_v24 }
 0x54c   : > { %9600 = vmatprep.mubr.bf16.mxu1 %v12674_v10 }
 0x553   : > { %9601 = vmatmul.mubr.bf16.gmra.mrb[20].mxu1 %v12675_v19 }
 0x554   : > { %9604 = vmatprep.mubr.bf16.mxu1 %v12676_v37 }
 0x55b   : > { %9605 = vmatmul.mubr.bf16.gmra.mrb[24].mxu1 %v12677_v43 }
 0x55c   : > { %9608 = vmatprep.mubr.bf16.mxu1 %v12678_v49 }
 0x563   : > { %9609 = vmatmul.mubr.bf16.gmra.mrb[28].mxu1 %v12679_v9  ;;  %v9678_v9 = vadd.f32 %v9677_v41, %v12479_v47 }
 0x564   : > { %9612 = vmatprep.mubr.bf16.mxu1 %v12680_v4  ;;  %v12689_v4 = vld [vmem:[#allocation28_spill] sm:$0xff] }
 0x56b   : > { %9613 = vmatmul.mubr.bf16.gmra.mrb[0].mxu1 %v12681_v45  ;;  %v9680_v45 = vadd.f32 %v12689_v4, %v12470_v61 }
 0x56c   : > { %9616 = vmatprep.mubr.bf16.mxu1 %v12682_v54 }
 0x573   : > { %9617 = vmatmul.mubr.bf16.gmra.mrb[4].mxu1 %v12683_v62 }
 0x574   : > { %9620 = vmatprep.mubr.bf16.mxu1 %v12684_v40 }
 0x57b   : > { %9621 = vmatmul.mubr.bf16.gmra.mrb[8].mxu1 %v12685_v2  ;;  %v12690_v2 = vld [vmem:[#allocation29_spill] sm:$0xff] }
 0x57c   : > { %9624 = vmatprep.mubr.bf16.mxu1 %v12686_v11  ;;  %v9683_v11 = vadd.f32 %v12470_v61, %v12690_v2 }
 0x583   : > { %9625 = vmatmul.mubr.bf16.gmra.mrb[12].mxu1 %v12687_v34 }
 0x61e   : > { %v9598_v58 = vpop.f32.mrb[16].mxu1 }
 0x61f   : > { %v9645_v8 = vadd.f32 %v9644_v56, %v9598_v58  ;;  %v6950_v38 = vpop.f32.mrb[17].mxu1  ;;  %v9686_v56 = vadd.f32 %v12691_v26, %v12470_v61  ;;  %v12692_v58 = vld [vmem:[#allocation31_spill] sm:$0xff] }
 0x620   : > { %v9648_v35 = vadd.f32 %v9647_v14, %v6950_v38  ;;  %v9599_v33 = vpop.f32.mrb[18].mxu1 }
 0x621   : > { %v9646_v27 = vadd.f32 %v9645_v8, %v12479_v47  ;;  %v9652_v7 = vadd.f32 %v9651_v17, %v9599_v33  ;;  %v6953_v21 = vpop.f32.mrb[19].mxu1  ;;  %v9689_v8 = vadd.f32 %v12470_v61, %v12692_v58  ;;  %v9681_v17 = vadd.f32 %v9680_v45, %v12479_v47 }
 0x622   : > { %v9649_v51 = vadd.f32 %v9648_v35, %v12479_v47  ;;  %v9655_v5 = vadd.f32 %v9654_v23, %v6953_v21  ;;  %v9684_v33 = vadd.f32 %v9683_v11, %v12479_v47 }
 0x623   : > { %v7111_v63 = vmax.f32 %v9646_v27, 0.0  ;;  %v7112_v15 = vmax.f32 %v9652_v7, 0.0  ;;  %v9687_v27 = vadd.f32 %v9686_v56, %v12479_v47  ;;  %v9690_v32 = vadd.f32 %v9689_v8, %v12479_v47 }
 0x624   : > { %v7109_v60 = vmax.f32 %v9649_v51, 0.0  ;;  %v7110_v55 = vmax.f32 %v9655_v5, 0.0 }
 0x625   : > { %7143 = vst [vmem:[%s12496_s30 + $0x10] sm:$0xff] %v7111_v63  ;;  %7144 = vst [vmem:[%s12496_s30 + $0x18] sm:$0xff] %v7112_v15 }
 0x626   : > { %7141 = vst [vmem:[%s12496_s30] sm:$0xff] %v7109_v60  ;;  %7142 = vst [vmem:[%s12496_s30 + $0x8] sm:$0xff] %v7110_v55  ;;  %v9602_v3 = vpop.f32.mrb[20].mxu1  ;;  %v9694_v60 = vadd.f32 %v12479_v47, %v12470_v61 }
 0x627   : > { %v9658_v30 = vadd.f32 %v9657_v0, %v9602_v3  ;;  %v6966_v57 = vpop.f32.mrb[21].mxu1 }
 0x628   : > { %v9661_v16 = vadd.f32 %v9660_v29, %v6966_v57  ;;  %v9603_v53 = vpop.f32.mrb[22].mxu1 }
 0x629   : > { %v7115_v59 = vmax.f32 %v9658_v30, 0.0  ;;  %v9664_v13 = vadd.f32 %v9663_v52, %v9603_v53  ;;  %v6969_v31 = vpop.f32.mrb[23].mxu1 }
 0x62a   : > { %v7113_v22 = vmax.f32 %v9661_v16, 0.0  ;;  %v9667_v46 = vadd.f32 %v9666_v28, %v6969_v31 }
 0x62b   : > { %7147 = vst [vmem:[%s12496_s30 + $0x30] sm:$0xff] %v7115_v59  ;;  %v7116_v12 = vmax.f32 %v9664_v13, 0.0 }
 0x62c   : > { %7145 = vst [vmem:[%s12496_s30 + $0x20] sm:$0xff] %v7113_v22  ;;  %v7114_v24 = vmax.f32 %v9667_v46, 0.0 }
 0x62d   : > { %7148 = vst [vmem:[%s12496_s30 + $0x38] sm:$0xff] %v7116_v12 }
 0x62e   : > { %7146 = vst [vmem:[%s12496_s30 + $0x28] sm:$0xff] %v7114_v24  ;;  %v9606_v10 = vpop.f32.mrb[24].mxu1 }
 0x62f   : > { %v9670_v19 = vadd.f32 %v9669_v48, %v9606_v10  ;;  %v6982_v37 = vpop.f32.mrb[25].mxu1 }
 0x630   : > { %v9673_v43 = vadd.f32 %v9672_v44, %v6982_v37  ;;  %v9607_v49 = vpop.f32.mrb[26].mxu1 }
 0x631   : > { %v7119_v54 = vmax.f32 %v9670_v19, 0.0  ;;  %v9676_v62 = vadd.f32 %v9675_v20, %v9607_v49  ;;  %v6985_v40 = vpop.f32.mrb[27].mxu1 }
 0x632   : > { %v7117_v34 = vmax.f32 %v9673_v43, 0.0  ;;  %v9679_v18 = vadd.f32 %v9678_v9, %v6985_v40 }
 0x633   : > { %7151 = vst [vmem:[%s12496_s30 + $0x50] sm:$0xff] %v7119_v54  ;;  %v7120_v14 = vmax.f32 %v9676_v62, 0.0 }
 0x634   : > { %7149 = vst [vmem:[%s12496_s30 + $0x40] sm:$0xff] %v7117_v34  ;;  %v7118_v38 = vmax.f32 %v9679_v18, 0.0 }
 0x635   : > { %7152 = vst [vmem:[%s12496_s30 + $0x58] sm:$0xff] %v7120_v14 }
 0x636   : > { %7150 = vst [vmem:[%s12496_s30 + $0x48] sm:$0xff] %v7118_v38  ;;  %v9610_v35 = vpop.f32.mrb[28].mxu1 }
 0x637   : > { %v9682_v23 = vadd.f32 %v9681_v17, %v9610_v35  ;;  %v6998_v1 = vpop.f32.mrb[29].mxu1 }
 0x638   : > { %v9685_v7 = vadd.f32 %v9684_v33, %v6998_v1  ;;  %v9611_v21 = vpop.f32.mrb[30].mxu1 }
 0x639   : > { %v7123_v51 = vmax.f32 %v9682_v23, 0.0  ;;  %v9688_v5 = vadd.f32 %v9687_v27, %v9611_v21  ;;  %v7001_v39 = vpop.f32.mrb[31].mxu1 }
 0x63a   : > { %v7121_v63 = vmax.f32 %v9685_v7, 0.0  ;;  %v9691_v15 = vadd.f32 %v9690_v32, %v7001_v39 }
 0x63b   : > { %7155 = vst [vmem:[%s12496_s30 + $0x70] sm:$0xff] %v7123_v51  ;;  %v7124_v6 = vmax.f32 %v9688_v5, 0.0 }
 0x63c   : > { %7153 = vst [vmem:[%s12496_s30 + $0x60] sm:$0xff] %v7121_v63  ;;  %v7122_v55 = vmax.f32 %v9691_v15, 0.0 }
 0x63d   : > { %7156 = vst [vmem:[%s12496_s30 + $0x78] sm:$0xff] %v7124_v6 }
 0x63e   : > { %7154 = vst [vmem:[%s12496_s30 + $0x68] sm:$0xff] %v7122_v55  ;;  %v9614_v0 = vpop.f32.mrb[0].mxu1 }
 0x63f   : > { %v9693_v3 = vadd.f32 %v9694_v60, %v9614_v0  ;;  %v7014_v29 = vpop.f32.mrb[1].mxu1 }
 0x640   : > { %v9695_v30 = vadd.f32 %v9694_v60, %v7014_v29  ;;  %v9615_v57 = vpop.f32.mrb[2].mxu1 }
 0x641   : > { %v7127_v52 = vmax.f32 %v9693_v3, 0.0  ;;  %v9697_v16 = vadd.f32 %v9694_v60, %v9615_v57  ;;  %v7017_v53 = vpop.f32.mrb[3].mxu1 }
 0x642   : > { %v7125_v28 = vmax.f32 %v9695_v30, 0.0  ;;  %v9699_v50 = vadd.f32 %v9694_v60, %v7017_v53 }
 0x643   : > { %7159 = vst [vmem:[%s12496_s30 + $0x90] sm:$0xff] %v7127_v52  ;;  %v7128_v61 = vmax.f32 %v9697_v16, 0.0 }
 0x644   : > { %7157 = vst [vmem:[%s12496_s30 + $0x80] sm:$0xff] %v7125_v28  ;;  %v7126_v47 = vmax.f32 %v9699_v50, 0.0 }
 0x645   : > { %7160 = vst [vmem:[%s12496_s30 + $0x98] sm:$0xff] %v7128_v61 }
 0x646   : > { %7158 = vst [vmem:[%s12496_s30 + $0x88] sm:$0xff] %v7126_v47  ;;  %v9618_v59 = vpop.f32.mrb[4].mxu1 }
 0x647   : > { %v9701_v13 = vadd.f32 %v9694_v60, %v9618_v59  ;;  %v7030_v31 = vpop.f32.mrb[5].mxu1 }
 0x648   : > { %v9703_v42 = vadd.f32 %v9694_v60, %v7030_v31  ;;  %v9619_v22 = vpop.f32.mrb[6].mxu1 }
 0x649   : > { %v7131_v46 = vmax.f32 %v9701_v13, 0.0  ;;  %v9705_v25 = vadd.f32 %v9694_v60, %v9619_v22  ;;  %v7033_v12 = vpop.f32.mrb[7].mxu1 }
 0x64a   : > { %v7129_v36 = vmax.f32 %v9703_v42, 0.0  ;;  %v9707_v41 = vadd.f32 %v9694_v60, %v7033_v12 }
 0x64b   : > { %7163 = vst [vmem:[%s12496_s30 + $0xb0] sm:$0xff] %v7131_v46  ;;  %v7132_v24 = vmax.f32 %v9705_v25, 0.0 }
 0x64c   : > { %7161 = vst [vmem:[%s12496_s30 + $0xa0] sm:$0xff] %v7129_v36  ;;  %v7130_v48 = vmax.f32 %v9707_v41, 0.0 }
 0x64d   : > { %7164 = vst [vmem:[%s12496_s30 + $0xb8] sm:$0xff] %v7132_v24 }
 0x64e   : > { %7162 = vst [vmem:[%s12496_s30 + $0xa8] sm:$0xff] %v7130_v48  ;;  %v9622_v10 = vpop.f32.mrb[8].mxu1 }
 0x64f   : > { %v9709_v44 = vadd.f32 %v9694_v60, %v9622_v10  ;;  %v7046_v19 = vpop.f32.mrb[9].mxu1 }
 0x650   : > { %v9711_v37 = vadd.f32 %v9694_v60, %v7046_v19  ;;  %v9623_v20 = vpop.f32.mrb[10].mxu1 }
 0x651   : > { %v7135_v43 = vmax.f32 %v9709_v44, 0.0  ;;  %v9713_v49 = vadd.f32 %v9694_v60, %v9623_v20  ;;  %v7049_v9 = vpop.f32.mrb[11].mxu1 }
 0x652   : > { %v7133_v4 = vmax.f32 %v9711_v37, 0.0  ;;  %v9715_v45 = vadd.f32 %v9694_v60, %v7049_v9 }
 0x653   : > { %7167 = vst [vmem:[%s12496_s30 + $0xd0] sm:$0xff] %v7135_v43  ;;  %v7136_v54 = vmax.f32 %v9713_v49, 0.0 }
 0x654   : > { %7165 = vst [vmem:[%s12496_s30 + $0xc0] sm:$0xff] %v7133_v4  ;;  %v7134_v62 = vmax.f32 %v9715_v45, 0.0 }
 0x655   : > { %7168 = vst [vmem:[%s12496_s30 + $0xd8] sm:$0xff] %v7136_v54 }
 0x656   : > { %7166 = vst [vmem:[%s12496_s30 + $0xc8] sm:$0xff] %v7134_v62  ;;  %v9626_v40 = vpop.f32.mrb[12].mxu1 }
 0x657   : > { %v9717_v2 = vadd.f32 %v9694_v60, %v9626_v40  ;;  %v7062_v11 = vpop.f32.mrb[13].mxu1 }
 0x658   : > { %v9719_v34 = vadd.f32 %v9694_v60, %v7062_v11  ;;  %v9627_v18 = vpop.f32.mrb[14].mxu1 }
 0x659   : > { %v7139_v26 = vmax.f32 %v9717_v2, 0.0  ;;  %v9721_v56 = vadd.f32 %v9694_v60, %v9627_v18  ;;  %v7065_v14 = vpop.f32.mrb[15].mxu1 }
 0x65a   : > { %v7137_v58 = vmax.f32 %v9719_v34, 0.0  ;;  %v9723_v8 = vadd.f32 %v9694_v60, %v7065_v14 }
 0x65b   : > { %7171 = vst [vmem:[%s12496_s30 + $0xf0] sm:$0xff] %v7139_v26  ;;  %v7140_v38 = vmax.f32 %v9721_v56, 0.0 }
 0x65c   : > { %7169 = vst [vmem:[%s12496_s30 + $0xe0] sm:$0xff] %v7137_v58  ;;  %v7138_v17 = vmax.f32 %v9723_v8, 0.0 }
 0x65d   : > { %7172 = vst [vmem:[%s12496_s30 + $0xf8] sm:$0xff] %v7140_v38 }
 0x65e   : > { %7170 = vst [vmem:[%s12496_s30 + $0xe8] sm:$0xff] %v7138_v17 }
 0x65f PF: > { %s17_s24 = sadd.s32 1, %s10453_s24  }
 0x660   : > { %p14_p4 = scmp.ge.s32.totalorder %s17_s24, 4  }
 0x662   :  { %16 = sbr.rel (!%p14_p4) target bundleno = 1 (0x1), region = 98 }

</bundles_post_ra>
